<compile_context>
chip_gen: v5e
topology: v5e:2x2
jax: 0.10.0
libtpu: 0.0.40
codegen_flags: <defaults>
</compile_context>

<pallas_src>
import functools

import jax
import jax.numpy as jnp
from jax.experimental import pallas as pl
from jax.experimental.pallas import tpu as pltpu

LEAKY_SLOPE = 0.2


def _round_up(x, m):
    return (x + m - 1) // m * m


def _leaky_relu(x, slope=LEAKY_SLOPE):
    return jnp.where(x > 0, x, slope * x)


# --------------------------------------------------------------------------- #
# Kernel: one batch tile through the whole 4-layer MLP.
# --------------------------------------------------------------------------- #
def discriminator_kernel(x_ref,
                         w1_ref, b1_ref,
                         w2_ref, b2_ref,
                         w3_ref, b3_ref,
                         w4_ref, b4_ref,
                         out_ref):
    # x_ref : (TB, Kp) bf16   -- flattened, zero-padded image tile
    # w*    : bf16 weights (in, out); w4 is a (1, 256) row
    # b*    : f32 biases
    # out   : (TB, 1) f32
    x = x_ref[...]                                                   # bf16

    h = jnp.dot(x, w1_ref[...], preferred_element_type=jnp.float32) + b1_ref[...]
    h = _leaky_relu(h).astype(jnp.bfloat16)                          # (TB, 1024)

    h = jnp.dot(h, w2_ref[...], preferred_element_type=jnp.float32) + b2_ref[...]
    h = _leaky_relu(h).astype(jnp.bfloat16)                          # (TB, 512)

    h = jnp.dot(h, w3_ref[...], preferred_element_type=jnp.float32) + b3_ref[...]
    h = _leaky_relu(h)                                               # f32 (TB, 256)

    # Final 256 -> 1 layer: N=1 wastes the MXU, so do it as a VPU multiply +
    # cross-lane (XLU) reduction in f32.
    logit = jnp.sum(h * w4_ref[...].astype(jnp.float32), axis=-1, keepdims=True)
    logit = logit + b4_ref[...]
    out_ref[...] = jax.nn.sigmoid(logit)                             # (TB, 1)


# --------------------------------------------------------------------------- #
# Parameter prep (call once, reuse across forward calls).
# --------------------------------------------------------------------------- #
def prepare_params(params, k_pad_multiple=128):
    """bf16-cast the weights, zero-pad W1's input dim to a 128-multiple, and
    reshape the last layer's weight to a (1, 256) row.  Biases stay f32."""
    w1, b1, w2, b2, w3, b3, w4, b4 = params
    k = w1.shape[0]
    kp = _round_up(k, k_pad_multiple)
    w1p = jnp.pad(w1, ((0, kp - k), (0, 0)))          # zero rows => identity
    return (
        w1p.astype(jnp.bfloat16), b1.astype(jnp.float32),
        w2.astype(jnp.bfloat16), b2.astype(jnp.float32),
        w3.astype(jnp.bfloat16), b3.astype(jnp.float32),
        w4.T.astype(jnp.bfloat16),                    # (1, 256) row
        b4.reshape(1, 1).astype(jnp.float32),
    )


# --------------------------------------------------------------------------- #
# Forward wrapper.
# --------------------------------------------------------------------------- #
@functools.partial(jax.jit, static_argnames=("batch_tile",))
def discriminator_forward(img, kparams, batch_tile=256):
    """img: (B, C, H, W); kparams: output of prepare_params."""
    w1, b1, w2, b2, w3, b3, w4, b4 = kparams
    kp = w1.shape[0]

    B = img.shape[0]
    x = img.reshape(B, -1)
    k = x.shape[1]

    # Batch tile: multiple of 8 (sublane); capped so x-tile + activations stay
    # well inside VMEM alongside the resident weights.
    tb = min(batch_tile, _round_up(B, 8))
    bp = _round_up(B, tb)

    xp = jnp.zeros((bp, kp), jnp.bfloat16)
    xp = xp.at[:B, :k].set(x.astype(jnp.bfloat16))

    grid = (bp // tb,)
    full = lambda i: (0, 0)   # weights/biases: resident, never re-indexed

    weight_bytes = sum(int(a.size) * a.dtype.itemsize for a in kparams)
    flops = 2 * bp * (kp * 1024 + 1024 * 512 + 512 * 256 + 256)
    cost = pl.CostEstimate(
        flops=flops,
        transcendentals=bp,
        bytes_accessed=weight_bytes + int(xp.size) * 2 + bp * 4,
    )

    out = pl.pallas_call(
        discriminator_kernel,
        out_shape=jax.ShapeDtypeStruct((bp, 1), jnp.float32),
        grid=grid,
        in_specs=[
            pl.BlockSpec((tb, kp), lambda i: (i, 0)),                 # x tile
            pl.BlockSpec(w1.shape, full), pl.BlockSpec(b1.shape, full),
            pl.BlockSpec(w2.shape, full), pl.BlockSpec(b2.shape, full),
            pl.BlockSpec(w3.shape, full), pl.BlockSpec(b3.shape, full),
            pl.BlockSpec(w4.shape, full), pl.BlockSpec(b4.shape, full),
        ],
        out_specs=pl.BlockSpec((tb, 1), lambda i: (i, 0)),
        compiler_params=pltpu.CompilerParams(
            dimension_semantics=("parallel",),        # v7x: shard batch over both TCs
            vmem_limit_bytes=48 * 1024 * 1024,        # v5e default (16 MiB) is tight
        ),
        cost_estimate=cost,
    )(xp, *kparams)

    return out[:B]


# --------------------------------------------------------------------------- #
# Init + references.
# --------------------------------------------------------------------------- #
def init_params(key, img_shape=(1, 28, 28)):
    """Mimics nn.Linear's U(-1/sqrt(fan_in), 1/sqrt(fan_in)) init. W: (in, out)."""
    in_dim = int(img_shape[0] * img_shape[1] * img_shape[2])
    dims = [in_dim, 1024, 512, 256, 1]
    params = []
    for i in range(4):
        key, kw, kb = jax.random.split(key, 3)
        fan_in, fan_out = dims[i], dims[i + 1]
        bound = 1.0 / jnp.sqrt(fan_in)
        w = jax.random.uniform(kw, (fan_in, fan_out), jnp.float32, -bound, bound)
        b = jax.random.uniform(kb, (1, fan_out), jnp.float32, -bound, bound)
        params += [w, b]
    return tuple(params)


def reference_forward_f32(img, params):
    """Exact PyTorch-semantics f32 reference."""
    B = img.shape[0]
    x = img.reshape(B, -1).astype(jnp.float32)
    w1, b1, w2, b2, w3, b3, w4, b4 = params
    h = _leaky_relu(x @ w1 + b1)
    h = _leaky_relu(h @ w2 + b2)
    h = _leaky_relu(h @ w3 + b3)
    return jax.nn.sigmoid(h @ w4 + b4)


def reference_forward_bf16(img, params):
    """Reference mimicking the kernel arithmetic (bf16 operands, f32 accumulate)."""
    B = img.shape[0]
    x = img.reshape(B, -1).astype(jnp.bfloat16)
    w1, b1, w2, b2, w3, b3, w4, b4 = params

    def dot(a, w):
        return jax.lax.dot(a, w.astype(jnp.bfloat16),
                           preferred_element_type=jnp.float32)

    h = _leaky_relu(dot(x, w1) + b1).astype(jnp.bfloat16)
    h = _leaky_relu(dot(h, w2) + b2).astype(jnp.bfloat16)
    h = _leaky_relu(dot(h, w3) + b3)
    w4_row = w4.T.astype(jnp.bfloat16).astype(jnp.float32)
    logit = jnp.sum(h * w4_row, axis=-1, keepdims=True) + b4
    return jax.nn.sigmoid(logit)


if __name__ == "__main__":
    key = jax.random.PRNGKey(0)
    img_shape = (1, 28, 28)
    batch = 2

    key, k_img = jax.random.split(key)
    img = jax.random.normal(k_img, (batch,) + img_shape, jnp.float32)
    params = init_params(key, img_shape)
    kparams = prepare_params(params)

    out = discriminator_forward(img, kparams)
    out = jax.block_until_ready(out)

    assert out.shape == (batch, 1)
    ref_bf16 = reference_forward_bf16(img, params)
    ref_f32 = reference_forward_f32(img, params)
    assert jnp.allclose(out, ref_bf16, atol=5e-3, rtol=5e-3), "mismatch vs bf16 reference"
    assert jnp.allclose(out, ref_f32, atol=5e-2, rtol=5e-2), "mismatch vs f32 reference"

    print("KERNEL_OK")
</pallas_src>

<mosaic_0001>
module attributes {stable_mosaic.version = 11 : i64} {
  func.func @discriminator_kernel(%arg0: i32, %arg1: memref<8x896xbf16, #tpu.memory_space<vmem>>, %arg2: memref<896x1024xbf16, #tpu.memory_space<vmem>>, %arg3: memref<1x1024xf32, #tpu.memory_space<vmem>>, %arg4: memref<1024x512xbf16, #tpu.memory_space<vmem>>, %arg5: memref<1x512xf32, #tpu.memory_space<vmem>>, %arg6: memref<512x256xbf16, #tpu.memory_space<vmem>>, %arg7: memref<1x256xf32, #tpu.memory_space<vmem>>, %arg8: memref<1x256xbf16, #tpu.memory_space<vmem>>, %arg9: memref<1x1xf32, #tpu.memory_space<vmem>>, %arg10: memref<8x1xf32, #tpu.memory_space<vmem>>) attributes {dimension_semantics = [#tpu.dimension_semantics<parallel>], iteration_bounds = array<i64: 1>, scalar_prefetch = 0 : i64, scratch_operands = 0 : i64, tpu.core_type = #tpu.core_type<tc>, window_params = [{transform_indices = @transform_0, window_bounds = array<i64: 8, 896>}, {pipeline_mode = #tpu.pipeline_mode<synchronous>, transform_indices = @transform_1, window_bounds = array<i64: 896, 1024>}, {pipeline_mode = #tpu.pipeline_mode<synchronous>, transform_indices = @transform_2, window_bounds = array<i64: 1, 1024>}, {pipeline_mode = #tpu.pipeline_mode<synchronous>, transform_indices = @transform_3, window_bounds = array<i64: 1024, 512>}, {pipeline_mode = #tpu.pipeline_mode<synchronous>, transform_indices = @transform_4, window_bounds = array<i64: 1, 512>}, {pipeline_mode = #tpu.pipeline_mode<synchronous>, transform_indices = @transform_5, window_bounds = array<i64: 512, 256>}, {pipeline_mode = #tpu.pipeline_mode<synchronous>, transform_indices = @transform_6, window_bounds = array<i64: 1, 256>}, {pipeline_mode = #tpu.pipeline_mode<synchronous>, transform_indices = @transform_7, window_bounds = array<i64: 1, 256>}, {pipeline_mode = #tpu.pipeline_mode<synchronous>, transform_indices = @transform_8, window_bounds = array<i64: 1, 1>}, {transform_indices = @transform_9, window_bounds = array<i64: 8, 1>}]} {
    %c0 = arith.constant 0 : index
    %c0_0 = arith.constant 0 : index
    %0 = vector.load %arg1[%c0, %c0_0] : memref<8x896xbf16, #tpu.memory_space<vmem>>, vector<8x896xbf16>
    %c0_1 = arith.constant 0 : index
    %c0_2 = arith.constant 0 : index
    %1 = vector.load %arg2[%c0_1, %c0_2] : memref<896x1024xbf16, #tpu.memory_space<vmem>>, vector<896x1024xbf16>
    %cst = arith.constant dense<0.000000e+00> : vector<8x1024xf32>
    %2 = tpu.matmul %0, %1, %cst {dimension_numbers = #tpu.dot_dimension_numbers<[1], [0], [0], [1], [0, 0, 1, 1], [], []>} : vector<8x896xbf16>, vector<896x1024xbf16>, vector<8x1024xf32> -> vector<8x1024xf32>
    %c0_3 = arith.constant 0 : index
    %c0_4 = arith.constant 0 : index
    %3 = vector.load %arg3[%c0_3, %c0_4] : memref<1x1024xf32, #tpu.memory_space<vmem>>, vector<1x1024xf32>
    %4 = vector.broadcast %3 : vector<1x1024xf32> to vector<8x1024xf32>
    %5 = arith.addf %2, %4 : vector<8x1024xf32>
    %cst_5 = arith.constant 0.000000e+00 : f32
    %6 = vector.broadcast %cst_5 : f32 to vector<8x1024xf32>
    %7 = arith.cmpf ogt, %5, %6 : vector<8x1024xf32>
    %cst_6 = arith.constant 2.000000e-01 : f32
    %8 = vector.broadcast %cst_6 : f32 to vector<8x1024xf32>
    %9 = arith.mulf %8, %5 : vector<8x1024xf32>
    %10 = arith.select %7, %5, %9 : vector<8x1024xi1>, vector<8x1024xf32>
    %11 = arith.truncf %10 : vector<8x1024xf32> to vector<8x1024xbf16>
    %c0_7 = arith.constant 0 : index
    %c0_8 = arith.constant 0 : index
    %12 = vector.load %arg4[%c0_7, %c0_8] : memref<1024x512xbf16, #tpu.memory_space<vmem>>, vector<1024x512xbf16>
    %cst_9 = arith.constant dense<0.000000e+00> : vector<8x512xf32>
    %13 = tpu.matmul %11, %12, %cst_9 {dimension_numbers = #tpu.dot_dimension_numbers<[1], [0], [0], [1], [0, 0, 1, 1], [], []>} : vector<8x1024xbf16>, vector<1024x512xbf16>, vector<8x512xf32> -> vector<8x512xf32>
    %c0_10 = arith.constant 0 : index
    %c0_11 = arith.constant 0 : index
    %14 = vector.load %arg5[%c0_10, %c0_11] : memref<1x512xf32, #tpu.memory_space<vmem>>, vector<1x512xf32>
    %15 = vector.broadcast %14 : vector<1x512xf32> to vector<8x512xf32>
    %16 = arith.addf %13, %15 : vector<8x512xf32>
    %cst_12 = arith.constant 0.000000e+00 : f32
    %17 = vector.broadcast %cst_12 : f32 to vector<8x512xf32>
    %18 = arith.cmpf ogt, %16, %17 : vector<8x512xf32>
    %cst_13 = arith.constant 2.000000e-01 : f32
    %19 = vector.broadcast %cst_13 : f32 to vector<8x512xf32>
    %20 = arith.mulf %19, %16 : vector<8x512xf32>
    %21 = arith.select %18, %16, %20 : vector<8x512xi1>, vector<8x512xf32>
    %22 = arith.truncf %21 : vector<8x512xf32> to vector<8x512xbf16>
    %c0_14 = arith.constant 0 : index
    %c0_15 = arith.constant 0 : index
    %23 = vector.load %arg6[%c0_14, %c0_15] : memref<512x256xbf16, #tpu.memory_space<vmem>>, vector<512x256xbf16>
    %cst_16 = arith.constant dense<0.000000e+00> : vector<8x256xf32>
    %24 = tpu.matmul %22, %23, %cst_16 {dimension_numbers = #tpu.dot_dimension_numbers<[1], [0], [0], [1], [0, 0, 1, 1], [], []>} : vector<8x512xbf16>, vector<512x256xbf16>, vector<8x256xf32> -> vector<8x256xf32>
    %c0_17 = arith.constant 0 : index
    %c0_18 = arith.constant 0 : index
    %25 = vector.load %arg7[%c0_17, %c0_18] : memref<1x256xf32, #tpu.memory_space<vmem>>, vector<1x256xf32>
    %26 = vector.broadcast %25 : vector<1x256xf32> to vector<8x256xf32>
    %27 = arith.addf %24, %26 : vector<8x256xf32>
    %cst_19 = arith.constant 0.000000e+00 : f32
    %28 = vector.broadcast %cst_19 : f32 to vector<8x256xf32>
    %29 = arith.cmpf ogt, %27, %28 : vector<8x256xf32>
    %cst_20 = arith.constant 2.000000e-01 : f32
    %30 = vector.broadcast %cst_20 : f32 to vector<8x256xf32>
    %31 = arith.mulf %30, %27 : vector<8x256xf32>
    %32 = arith.select %29, %27, %31 : vector<8x256xi1>, vector<8x256xf32>
    %c0_21 = arith.constant 0 : index
    %c0_22 = arith.constant 0 : index
    %33 = vector.load %arg8[%c0_21, %c0_22] : memref<1x256xbf16, #tpu.memory_space<vmem>>, vector<1x256xbf16>
    %34 = arith.extf %33 : vector<1x256xbf16> to vector<1x256xf32>
    %35 = vector.broadcast %34 : vector<1x256xf32> to vector<8x256xf32>
    %36 = arith.mulf %32, %35 : vector<8x256xf32>
    %cst_23 = arith.constant dense<0.000000e+00> : vector<8xf32>
    %37 = vector.multi_reduction <add>, %36, %cst_23 [1] : vector<8x256xf32> to vector<8xf32>
    %38 = vector.shape_cast %37 : vector<8xf32> to vector<8x1xf32>
    %c0_24 = arith.constant 0 : index
    %c0_25 = arith.constant 0 : index
    %39 = vector.load %arg9[%c0_24, %c0_25] : memref<1x1xf32, #tpu.memory_space<vmem>>, vector<1x1xf32>
    %40 = vector.broadcast %39 : vector<1x1xf32> to vector<8x1xf32>
    %41 = arith.addf %38, %40 : vector<8x1xf32>
    %42 = arith.negf %41 : vector<8x1xf32>
    %43 = math.exp %42 : vector<8x1xf32>
    %cst_26 = arith.constant 1.000000e+00 : f32
    %44 = vector.broadcast %cst_26 : f32 to vector<8x1xf32>
    %45 = arith.addf %44, %43 : vector<8x1xf32>
    %46 = arith.divf %44, %45 : vector<8x1xf32>
    %c0_27 = arith.constant 0 : index
    %c0_28 = arith.constant 0 : index
    %47 = vector.load %arg10[%c0_27, %c0_28] : memref<8x1xf32, #tpu.memory_space<vmem>>, vector<8x1xf32>
    tpu.vector_store %arg10[%c0_27, %c0_28], %46 {strides = array<i32>} : memref<8x1xf32, #tpu.memory_space<vmem>>, vector<8x1xf32>,
    return
  }
  func.func @transform_0(%arg0: i32) -> (i32, i32) {
    %c0_i32 = arith.constant 0 : i32
    %c0_i32_0 = arith.constant 0 : i32
    return %arg0, %c0_i32 : i32, i32
  }
  func.func @transform_1(%arg0: i32) -> (i32, i32) {
    %c0_i32 = arith.constant 0 : i32
    %c0_i32_0 = arith.constant 0 : i32
    %c0_i32_1 = arith.constant 0 : i32
    return %c0_i32, %c0_i32_0 : i32, i32
  }
  func.func @transform_2(%arg0: i32) -> (i32, i32) {
    %c0_i32 = arith.constant 0 : i32
    %c0_i32_0 = arith.constant 0 : i32
    %c0_i32_1 = arith.constant 0 : i32
    return %c0_i32, %c0_i32_0 : i32, i32
  }
  func.func @transform_3(%arg0: i32) -> (i32, i32) {
    %c0_i32 = arith.constant 0 : i32
    %c0_i32_0 = arith.constant 0 : i32
    %c0_i32_1 = arith.constant 0 : i32
    return %c0_i32, %c0_i32_0 : i32, i32
  }
  func.func @transform_4(%arg0: i32) -> (i32, i32) {
    %c0_i32 = arith.constant 0 : i32
    %c0_i32_0 = arith.constant 0 : i32
    %c0_i32_1 = arith.constant 0 : i32
    return %c0_i32, %c0_i32_0 : i32, i32
  }
  func.func @transform_5(%arg0: i32) -> (i32, i32) {
    %c0_i32 = arith.constant 0 : i32
    %c0_i32_0 = arith.constant 0 : i32
    %c0_i32_1 = arith.constant 0 : i32
    return %c0_i32, %c0_i32_0 : i32, i32
  }
  func.func @transform_6(%arg0: i32) -> (i32, i32) {
    %c0_i32 = arith.constant 0 : i32
    %c0_i32_0 = arith.constant 0 : i32
    %c0_i32_1 = arith.constant 0 : i32
    return %c0_i32, %c0_i32_0 : i32, i32
  }
  func.func @transform_7(%arg0: i32) -> (i32, i32) {
    %c0_i32 = arith.constant 0 : i32
    %c0_i32_0 = arith.constant 0 : i32
    %c0_i32_1 = arith.constant 0 : i32
    return %c0_i32, %c0_i32_0 : i32, i32
  }
  func.func @transform_8(%arg0: i32) -> (i32, i32) {
    %c0_i32 = arith.constant 0 : i32
    %c0_i32_0 = arith.constant 0 : i32
    %c0_i32_1 = arith.constant 0 : i32
    return %c0_i32, %c0_i32_0 : i32, i32
  }
  func.func @transform_9(%arg0: i32) -> (i32, i32) {
    %c0_i32 = arith.constant 0 : i32
    %c0_i32_0 = arith.constant 0 : i32
    return %arg0, %c0_i32 : i32, i32
  }
}

</mosaic_0001>

<bundles_post_ra>
// kernel: discriminator_forward.1
= control target key start
LH: loop header
LB: loop body
LE: loop exit
PB: predicated region body
PF: predicated region fallthrough
CT: control target
= control target key end

     0   :  { %s10583_s0 = inlined_call_operand.vmem [shape: bf16[8,896], index: 0, kind: input, shape index: {}]   ;;  %s10584_s1 = inlined_call_operand.hbm [shape: bf16[896,1024], index: 1, kind: input, shape index: {}]   ;;  %s10585_s2 = inlined_call_operand.hbm [shape: f32[1,1024], index: 2, kind: input, shape index: {}]   ;;  %s10586_s3 = inlined_call_operand.hbm [shape: bf16[1024,512], index: 3, kind: input, shape index: {}]   ;;  %s10587_s4 = inlined_call_operand.hbm [shape: f32[1,512], index: 4, kind: input, shape index: {}]   ;;  %s10588_s5 = inlined_call_operand.hbm [shape: bf16[512,256], index: 5, kind: input, shape index: {}]   ;;  %s10589_s6 = inlined_call_operand.hbm [shape: f32[1,256], index: 6, kind: input, shape index: {}]   ;;  %s10590_s7 = inlined_call_operand.hbm [shape: bf16[1,256], index: 7, kind: input, shape index: {}]   ;;  %s10591_s8 = inlined_call_operand.<no memory space> [shape: f32[1,1], index: 8, kind: input, shape index: {}]   ;;  %s10592_s9 = inlined_call_operand.vmem [shape: f32[8,1], index: 9, kind: output, shape index: {}]  }
   0x1   :  { %v14_v0 = vstv %s10591_s8 }
   0x2   :  { %15 = vst [vmem:[#allocation2] sm:$0x1] %v14_v0 }
   0x3   :  { %16 = vsyncpa [#allocation4], 0 }
   0x4   :  { %17 = vsyncpa [#allocation6], 0 }
   0x5   :  { %18 = vsyncpa [#allocation9], 0  ;;  %s40_s13 = sshll.u32 %s10585_s2, 4  ;;  %s41_s13 = int_to_ptr.hbm [resolvable:$true] %s40_s13 }
   0x6   :  { %19 = vsyncpa [#allocation12], 0  ;;  %s10194_s14 = smov [#allocation5]   ;;  %s64_s18 = sshll.u32 %s10587_s4, 4  ;;  %s65_s18 = int_to_ptr.hbm [resolvable:$true] %s64_s18 }
   0x7   :  { %s42_s15 = sshll.u32 %s10194_s14, 4  ;;  %s10195_s8 = smov [#allocation8]   ;;  %s43_s15 = int_to_ptr.vmem [resolvable:$true] %s42_s15 }
   0x8   :  { %45 = dma.hbm_to_vmem [thread:$0]  %s41_s13, 128, %s43_s15, [#allocation6]  }
   0x9   :  { %s66_s19 = sshll.u32 %s10195_s8, 4  ;;  %s88_s22 = sshll.u32 %s10589_s6, 4  ;;  %s67_s19 = int_to_ptr.vmem [resolvable:$true] %s66_s19  ;;  %s89_s22 = int_to_ptr.hbm [resolvable:$true] %s88_s22 }
   0xa   :  { %69 = dma.hbm_to_vmem [thread:$0]  %s65_s18, 64, %s67_s19, [#allocation9]  }
   0xb   :  { %s26_s24 = sshll.u32 %s10584_s1, 4  ;;  %s10196_s25 = smov [#allocation11]   ;;  %s27_s24 = int_to_ptr.hbm [resolvable:$true] %s26_s24 }
   0xc   :  { %s90_s26 = sshll.u32 %s10196_s25, 4  ;;  %s10197_s4 = smov [#allocation3]   ;;  %s91_s26 = int_to_ptr.vmem [resolvable:$true] %s90_s26 }
   0xd   :  { %93 = dma.hbm_to_vmem [thread:$0]  %s89_s22, 32, %s91_s26, [#allocation12]  }
   0xe   :  { %s28_s27 = sshll.u32 %s10197_s4, 4  ;;  %s10198_s28 = smov 512   ;;  %s29_s27 = int_to_ptr.vmem [resolvable:$true] %s28_s27 }
   0xf   :  { %s10199_s29 = smov 32   ;;  %s50_s10 = sshll.u32 %s10586_s3, 4  ;;  %s51_s10 = int_to_ptr.hbm [resolvable:$true] %s50_s10 }
  0x10   :  { %34 = dma.hbm_to_vmem [thread:$0]  %s27_s24, 57344, %s29_s27, [#allocation4], %s10198_s28, %s10198_s28, %s10199_s29  }
  0x11   :  { %s10200_s11 = smov [#allocation7]   ;;  %s74_s14 = sshll.u32 %s10588_s5, 4  ;;  %s75_s14 = int_to_ptr.hbm [resolvable:$true] %s74_s14 }
  0x12   :  { %s52_s12 = sshll.u32 %s10200_s11, 4  ;;  %s10201_s15 = smov 256   ;;  %s53_s12 = int_to_ptr.vmem [resolvable:$true] %s52_s12 }
  0x13   :  { %s10202_s16 = smov 16   ;;  %s10203_s17 = smov [#allocation10]  }
  0x14   :  { %58 = dma.hbm_to_vmem [thread:$0]  %s51_s10, 32768, %s53_s12, [#allocation6], %s10201_s15, %s10201_s15, %s10202_s16  }
  0x15   :  { %s76_s18 = sshll.u32 %s10203_s17, 4  ;;  %s10204_s8 = smov 128   ;;  %s77_s18 = int_to_ptr.vmem [resolvable:$true] %s76_s18 }
  0x16   :  { %s10205_s19 = smov 8   ;;  %s99_s21 = sshll.u32 %s10590_s7, 4  ;;  %s100_s21 = int_to_ptr.hbm [resolvable:$true] %s99_s21 }
  0x17   :  { %82 = dma.hbm_to_vmem [thread:$0]  %s75_s14, 8192, %s77_s18, [#allocation9], %s10204_s8, %s10204_s8, %s10205_s19  }
  0x18   :  { %s10206_s22 = smov [#allocation13]  }
  0x19   :  { %s101_s2 = sshll.u32 %s10206_s22, 4  ;;  %s102_s2 = int_to_ptr.vmem [resolvable:$true] %s101_s2 }
  0x1a   :  { %104 = dma.hbm_to_vmem [thread:$0]  %s100_s21, 32, %s102_s2, [#allocation12]  }
  0x1b   :  { %10186 = dma.done.wait [#allocation4], 57344  }
  0x1c   :  { %10187 = vsyncadd [#allocation4], 4294909952 }
  0x1d   :  { %10188 = dma.done.wait [#allocation6], 32896  }
  0x1e   :  { %10189 = vsyncadd [#allocation6], 4294934400 }
  0x1f   :  { %10190 = dma.done.wait [#allocation9], 8256  }
  0x20   :  { %10191 = vsyncadd [#allocation9], 4294959040 }
  0x21   :  { %10192 = dma.done.wait [#allocation12], 64  }
  0x22   :  { %10193 = vsyncadd [#allocation12], 4294967232  ;;  %v6382_v1 = vld [vmem:[#allocation3 + $0x1c0] sm:$0xf] }
  0x23   :  { %v9289_v2 = vld [vmem:[#allocation3 + $0x1dc] sm:$0xf0] }
  0x24   :  { %v6638_v3 = vld [vmem:[#allocation3 + $0x3c0] sm:$0xf]  ;;  %v6383_v4 = vor.u32 %v9289_v2, %v6382_v1 }
  0x25   :  { %v9353_v5 = vld [vmem:[#allocation3 + $0x3dc] sm:$0xf0] }
  0x26   :  { %v6894_v6 = vld [vmem:[#allocation3 + $0x5c0] sm:$0xf]  ;;  %v6639_v8 = vor.u32 %v9353_v5, %v6638_v3  ;;  %2870 = vmatpush.bf16.msra.mxu0 %v6383_v4 }
  0x27   :  { %v9417_v7 = vld [vmem:[#allocation3 + $0x5dc] sm:$0xf0] }
  0x28   :  { %v6895_v9 = vor.u32 %v9417_v7, %v6894_v6  ;;  %v7150_v10 = vld [vmem:[#allocation3 + $0x7c0] sm:$0xf]  ;;  %2883 = vmatpush.bf16.msra.mxu1 %v6639_v8 }
  0x29   :  { %v9481_v11 = vld [vmem:[#allocation3 + $0x7dc] sm:$0xf0] }
  0x2a   :  { %v6350_v12 = vld [vmem:[#allocation3 + $0x180] sm:$0xf]  ;;  %v7151_v13 = vor.u32 %v9481_v11, %v7150_v10  ;;  %2896 = vmatpush.bf16.msra.mxu2 %v6895_v9 }
  0x2b   :  { %v9281_v14 = vld [vmem:[#allocation3 + $0x19c] sm:$0xf0] }
  0x2c   :  { %v6606_v15 = vld [vmem:[#allocation3 + $0x380] sm:$0xf]  ;;  %v6351_v17 = vor.u32 %v9281_v14, %v6350_v12  ;;  %2909 = vmatpush.bf16.msra.mxu3 %v7151_v13 }
  0x2d   :  { %v9345_v16 = vld [vmem:[#allocation3 + $0x39c] sm:$0xf0] }
  0x2e   :  { %v6607_v18 = vor.u32 %v9345_v16, %v6606_v15  ;;  %v6862_v19 = vld [vmem:[#allocation3 + $0x580] sm:$0xf]  ;;  %2871 = vmatpush.bf16.msra.mxu0 %v6351_v17 }
  0x2f   :  { %v9409_v20 = vld [vmem:[#allocation3 + $0x59c] sm:$0xf0] }
  0x30   :  { %v7118_v21 = vld [vmem:[#allocation3 + $0x780] sm:$0xf]  ;;  %v6863_v22 = vor.u32 %v9409_v20, %v6862_v19  ;;  %2884 = vmatpush.bf16.msra.mxu1 %v6607_v18 }
  0x31   :  { %v9473_v23 = vld [vmem:[#allocation3 + $0x79c] sm:$0xf0] }
  0x32   :  { %v6318_v24 = vld [vmem:[#allocation3 + $0x140] sm:$0xf]  ;;  %v7119_v26 = vor.u32 %v9473_v23, %v7118_v21  ;;  %2897 = vmatpush.bf16.msra.mxu2 %v6863_v22 }
  0x33   :  { %v9273_v25 = vld [vmem:[#allocation3 + $0x15c] sm:$0xf0] }
  0x34   :  { %v6574_v27 = vld [vmem:[#allocation3 + $0x340] sm:$0xf]  ;;  %v6319_v30 = vor.u32 %v9273_v25, %v6318_v24  ;;  %2910 = vmatpush.bf16.msra.mxu3 %v7119_v26 }
  0x35   :  { %v9337_v28 = vld [vmem:[#allocation3 + $0x35c] sm:$0xf0] }
  0x36   :  { %v6830_v29 = vld [vmem:[#allocation3 + $0x540] sm:$0xf]  ;;  %v6575_v34 = vor.u32 %v9337_v28, %v6574_v27  ;;  %2872 = vmatpush.bf16.msra.mxu0 %v6319_v30 }
  0x37   :  { %v9401_v31 = vld [vmem:[#allocation3 + $0x55c] sm:$0xf0] }
  0x38   :  { %v7086_v32 = vld [vmem:[#allocation3 + $0x740] sm:$0xf]  ;;  %v6831_v35 = vor.u32 %v9401_v31, %v6830_v29  ;;  %2885 = vmatpush.bf16.msra.mxu1 %v6575_v34 }
  0x39   :  { %v9465_v33 = vld [vmem:[#allocation3 + $0x75c] sm:$0xf0] }
  0x3a   :  { %v6286_v36 = vld [vmem:[#allocation3 + $0x100] sm:$0xf]  ;;  %v7087_v39 = vor.u32 %v9465_v33, %v7086_v32  ;;  %2898 = vmatpush.bf16.msra.mxu2 %v6831_v35 }
  0x3b   :  { %v9265_v37 = vld [vmem:[#allocation3 + $0x11c] sm:$0xf0] }
  0x3c   :  { %v6542_v38 = vld [vmem:[#allocation3 + $0x300] sm:$0xf]  ;;  %v6287_v45 = vor.u32 %v9265_v37, %v6286_v36  ;;  %2911 = vmatpush.bf16.msra.mxu3 %v7087_v39  ;;  %v6384_v39 = vld [vmem:[#allocation3 + $0x1e0] sm:$0xf0] }
  0x3d   :  { %v9329_v40 = vld [vmem:[#allocation3 + $0x31c] sm:$0xf0] }
  0x3e   :  { %v6798_v41 = vld [vmem:[#allocation3 + $0x500] sm:$0xf]  ;;  %v6543_v46 = vor.u32 %v9329_v40, %v6542_v38  ;;  %2873 = vmatpush.bf16.msra.mxu0 %v6287_v45  ;;  %v9285_v38 = vld [vmem:[#allocation3 + $0x1c4] sm:$0xf] }
  0x3f   :  { %v9393_v42 = vld [vmem:[#allocation3 + $0x51c] sm:$0xf0] }
  0x40   :  { %v7054_v43 = vld [vmem:[#allocation3 + $0x700] sm:$0xf]  ;;  %v6799_v47 = vor.u32 %v9393_v42, %v6798_v41  ;;  %2886 = vmatpush.bf16.msra.mxu1 %v6543_v46 }
  0x41   :  { %v9457_v44 = vld [vmem:[#allocation3 + $0x71c] sm:$0xf0] }
  0x42   :  { %v6254_v48 = vld [vmem:[#allocation3 + $0xc0] sm:$0xf]  ;;  %v7055_v51 = vor.u32 %v9457_v44, %v7054_v43  ;;  %2899 = vmatpush.bf16.msra.mxu2 %v6799_v47  ;;  %v6387_v47 = vor.u32 %v9285_v38, %v6384_v39 }
  0x43   :  { %v9257_v49 = vld [vmem:[#allocation3 + $0xdc] sm:$0xf0] }
  0x44   :  { %v6510_v50 = vld [vmem:[#allocation3 + $0x2c0] sm:$0xf]  ;;  %v6255_v57 = vor.u32 %v9257_v49, %v6254_v48  ;;  %2912 = vmatpush.bf16.msra.mxu3 %v7055_v51  ;;  %v9277_v51 = vld [vmem:[#allocation3 + $0x184] sm:$0xf] }
  0x45   :  { %v9321_v52 = vld [vmem:[#allocation3 + $0x2dc] sm:$0xf0] }
  0x46   :  { %v6766_v53 = vld [vmem:[#allocation3 + $0x4c0] sm:$0xf]  ;;  %v6511_v58 = vor.u32 %v9321_v52, %v6510_v50  ;;  %2874 = vmatpush.bf16.msra.mxu0 %v6255_v57  ;;  %v6352_v52 = vld [vmem:[#allocation3 + $0x1a0] sm:$0xf0] }
  0x47   :  { %v9385_v54 = vld [vmem:[#allocation3 + $0x4dc] sm:$0xf0] }
  0x48   :  { %v7022_v55 = vld [vmem:[#allocation3 + $0x6c0] sm:$0xf]  ;;  %v6767_v59 = vor.u32 %v9385_v54, %v6766_v53  ;;  %2887 = vmatpush.bf16.msra.mxu1 %v6511_v58 }
  0x49   :  { %v9449_v56 = vld [vmem:[#allocation3 + $0x6dc] sm:$0xf0] }
  0x4a   :  { %v6222_v60 = vld [vmem:[#allocation3 + $0x80] sm:$0xf]  ;;  %v7023_v63 = vor.u32 %v9449_v56, %v7022_v55  ;;  %2900 = vmatpush.bf16.msra.mxu2 %v6767_v59  ;;  %v136_v59 = vld [vmem:[%s10583_s0 + $0x8] sm:$0xff] }
  0x4b   :  { %v9249_v61 = vld [vmem:[#allocation3 + $0x9c] sm:$0xf0] }
  0x4c   :  { %v6478_v62 = vld [vmem:[#allocation3 + $0x280] sm:$0xf]  ;;  %v6223_v5 = vor.u32 %v9249_v61, %v6222_v60  ;;  %2913 = vmatpush.bf16.msra.mxu3 %v7023_v63  ;;  %v6355_v60 = vor.u32 %v9277_v51, %v6352_v52 }
  0x4d   :  { %v9313_v0 = vld [vmem:[#allocation3 + $0x29c] sm:$0xf0] }
  0x4e   :  { %v6734_v1 = vld [vmem:[#allocation3 + $0x480] sm:$0xf]  ;;  %v6479_v6 = vor.u32 %v9313_v0, %v6478_v62  ;;  %2875 = vmatpush.bf16.msra.mxu0 %v6223_v5  ;;  %v611_v0 = vunpack.c.l.b16 %v136_v59 }
  0x4f   :  { %v9377_v2 = vld [vmem:[#allocation3 + $0x49c] sm:$0xf0] }
  0x50   :  { %v6990_v3 = vld [vmem:[#allocation3 + $0x680] sm:$0xf]  ;;  %v6735_v7 = vor.u32 %v9377_v2, %v6734_v1  ;;  %2888 = vmatpush.bf16.msra.mxu1 %v6479_v6  ;;  %v612_v1 = vunpack.c.h.b16 %v136_v59  ;;  %v9269_v2 = vld [vmem:[#allocation3 + $0x144] sm:$0xf]  ;;  %v10284_v5 = vpack.c.b16 %v611_v0, %v611_v0 }
  0x51   :  { %v9441_v4 = vld [vmem:[#allocation3 + $0x69c] sm:$0xf0] }
  0x52   :  { %v6190_v8 = vld [vmem:[#allocation3 + $0x40] sm:$0xf]  ;;  %v6991_v11 = vor.u32 %v9441_v4, %v6990_v3  ;;  %2901 = vmatpush.bf16.msra.mxu2 %v6735_v7  ;;  %v6320_v3 = vld [vmem:[#allocation3 + $0x160] sm:$0xf0]  ;;  %v10289_v7 = vpack.c.b16 %v612_v1, %v612_v1 }
  0x53   :  { %v9241_v9 = vld [vmem:[#allocation3 + $0x5c] sm:$0xf0] }
  0x54   :  { %v6446_v10 = vld [vmem:[#allocation3 + $0x240] sm:$0xf]  ;;  %v6191_v17 = vor.u32 %v9241_v9, %v6190_v8  ;;  %2914 = vmatpush.bf16.msra.mxu3 %v6991_v11 }
  0x55   :  { %v9305_v12 = vld [vmem:[#allocation3 + $0x25c] sm:$0xf0] }
  0x56   :  { %v6702_v13 = vld [vmem:[#allocation3 + $0x440] sm:$0xf]  ;;  %v6447_v20 = vor.u32 %v9305_v12, %v6446_v10  ;;  %2876 = vmatpush.bf16.msra.mxu0 %v6191_v17 }
  0x57   :  { %v9369_v14 = vld [vmem:[#allocation3 + $0x45c] sm:$0xf0] }
  0x58   :  { %v6958_v15 = vld [vmem:[#allocation3 + $0x640] sm:$0xf]  ;;  %v6703_v21 = vor.u32 %v9369_v14, %v6702_v13  ;;  %2889 = vmatpush.bf16.msra.mxu1 %v6447_v20  ;;  %v6288_v20 = vld [vmem:[#allocation3 + $0x120] sm:$0xf0] }
  0x59   :  { %v9433_v16 = vld [vmem:[#allocation3 + $0x65c] sm:$0xf0] }
  0x5a   :  { %v6158_v18 = vld [vmem:[#allocation3] sm:$0xf]  ;;  %v6959_v25 = vor.u32 %v9433_v16, %v6958_v15  ;;  %2902 = vmatpush.bf16.msra.mxu2 %v6703_v21  ;;  %v6323_v15 = vor.u32 %v9269_v2, %v6320_v3 }
  0x5b   :  { %v9233_v19 = vld [vmem:[#allocation3 + $0x1c] sm:$0xf0] }
  0x5c   :  { %v6414_v22 = vld [vmem:[#allocation3 + $0x200] sm:$0xf]  ;;  %v6159_v32 = vor.u32 %v9233_v19, %v6158_v18  ;;  %2915 = vmatpush.bf16.msra.mxu3 %v6959_v25  ;;  %v9261_v19 = vld [vmem:[#allocation3 + $0x104] sm:$0xf] }
  0x5d   :  { %v9297_v23 = vld [vmem:[#allocation3 + $0x21c] sm:$0xf0] }
  0x5e   :  { %v6670_v24 = vld [vmem:[#allocation3 + $0x400] sm:$0xf]  ;;  %v6415_v36 = vor.u32 %v9297_v23, %v6414_v22  ;;  %2877 = vmatpush.bf16.msra.mxu0 %v6159_v32 }
  0x5f   :  { %v9361_v26 = vld [vmem:[#allocation3 + $0x41c] sm:$0xf0] }
  0x60   :  { %v6926_v27 = vld [vmem:[#allocation3 + $0x600] sm:$0xf]  ;;  %v6671_v37 = vor.u32 %v9361_v26, %v6670_v24  ;;  %2890 = vmatpush.bf16.msra.mxu1 %v6415_v36 }
  0x61   :  { %v9425_v28 = vld [vmem:[#allocation3 + $0x61c] sm:$0xf0] }
  0x62   :  { %v7406_v29 = vld [vmem:[#allocation3 + $0x9c0] sm:$0xf]  ;;  %v6927_v40 = vor.u32 %v9425_v28, %v6926_v27  ;;  %2903 = vmatpush.bf16.msra.mxu2 %v6671_v37 }
  0x63   :  { %v9545_v30 = vld [vmem:[#allocation3 + $0x9dc] sm:$0xf0] }
  0x64   :  { %v7662_v31 = vld [vmem:[#allocation3 + $0xbc0] sm:$0xf]  ;;  %v7407_v41 = vor.u32 %v9545_v30, %v7406_v29  ;;  %2916 = vmatpush.bf16.msra.mxu3 %v6927_v40  ;;  %v6291_v29 = vor.u32 %v9261_v19, %v6288_v20 }
  0x65   :  { %v9609_v33 = vld [vmem:[#allocation3 + $0xbdc] sm:$0xf0]  ;;  %2904 = vmatmul.bf16.vlgmr.msra.gmra.mxu2 %v10284_v5 }
  0x66   :  { %v7918_v34 = vld [vmem:[#allocation3 + $0xdc0] sm:$0xf]  ;;  %v7663_v42 = vor.u32 %v9609_v33, %v7662_v31  ;;  %2922 = vmatpush.bf16.msrb.mxu0 %v7407_v41  ;;  %v9253_v33 = vld [vmem:[#allocation3 + $0xc4] sm:$0xf] }
  0x67   :  { %v9673_v35 = vld [vmem:[#allocation3 + $0xddc] sm:$0xf0]  ;;  %2917 = vmatmul.bf16.vlgmr.msra.gmra.mxu3 %v10289_v7 }
  0x68   :  { %v7919_v43 = vor.u32 %v9673_v35, %v7918_v34  ;;  %v7374_v44 = vld [vmem:[#allocation3 + $0x980] sm:$0xf]  ;;  %2935 = vmatpush.bf16.msrb.mxu1 %v7663_v42  ;;  %2961 = vmatpush.bf16.msrb.mxu3 %v6387_v47  ;;  %v6256_v34 = vld [vmem:[#allocation3 + $0xe0] sm:$0xf0] }
  0x69   :  { %v9537_v45 = vld [vmem:[#allocation3 + $0x99c] sm:$0xf0]  ;;  %v6259_v41 = vor.u32 %v9253_v33, %v6256_v34  ;;  %v9405_v33 = vld [vmem:[#allocation3 + $0x584] sm:$0xf] }
  0x6a   :  { %v7630_v46 = vld [vmem:[#allocation3 + $0xb80] sm:$0xf]  ;;  %v7375_v53 = vor.u32 %v9537_v45, %v7374_v44  ;;  %2948 = vmatpush.bf16.msrb.mxu2 %v7919_v43  ;;  %v9245_v45 = vld [vmem:[#allocation3 + $0x84] sm:$0xf] }
  0x6b   :  { %v9601_v48 = vld [vmem:[#allocation3 + $0xb9c] sm:$0xf0] }
  0x6c   :  { %v7886_v49 = vld [vmem:[#allocation3 + $0xd80] sm:$0xf]  ;;  %v7631_v55 = vor.u32 %v9601_v48, %v7630_v46  ;;  %2923 = vmatpush.bf16.msrb.mxu0 %v7375_v53  ;;  %2962 = vmatpush.bf16.msrb.mxu3 %v6355_v60  ;;  %v6224_v46 = vld [vmem:[#allocation3 + $0xa0] sm:$0xf0] }
  0x6d   :  { %v9665_v50 = vld [vmem:[#allocation3 + $0xd9c] sm:$0xf0]  ;;  %v6227_v53 = vor.u32 %v9245_v45, %v6224_v46  ;;  %v9333_v46 = vld [vmem:[#allocation3 + $0x344] sm:$0xf] }
  0x6e   :  { %v7342_v54 = vld [vmem:[#allocation3 + $0x940] sm:$0xf]  ;;  %v7887_v56 = vor.u32 %v9665_v50, %v7886_v49  ;;  %2936 = vmatpush.bf16.msrb.mxu1 %v7631_v55 }
  0x6f   :  { %v9529_v57 = vld [vmem:[#allocation3 + $0x95c] sm:$0xf0] }
  0x70   :  { %v7598_v58 = vld [vmem:[#allocation3 + $0xb40] sm:$0xf]  ;;  %v7343_v4 = vor.u32 %v9529_v57, %v7342_v54  ;;  %2949 = vmatpush.bf16.msrb.mxu2 %v7887_v56  ;;  %2963 = vmatpush.bf16.msrb.mxu3 %v6323_v15  ;;  %v9237_v57 = vld [vmem:[#allocation3 + $0x44] sm:$0xf] }
  0x71   :  { %v9593_v61 = vld [vmem:[#allocation3 + $0xb5c] sm:$0xf0]  ;;  %v6896_v15 = vld [vmem:[#allocation3 + $0x5e0] sm:$0xf0] }
  0x72   :  { %v7854_v62 = vld [vmem:[#allocation3 + $0xd40] sm:$0xf]  ;;  %v7599_v8 = vor.u32 %v9593_v61, %v7598_v58  ;;  %2924 = vmatpush.bf16.msrb.mxu0 %v7343_v4  ;;  %v6192_v58 = vld [vmem:[#allocation3 + $0x60] sm:$0xf0]  ;;  %v138_v4 = vld [vmem:[%s10583_s0 + $0x18] sm:$0xf] }
  0x73   :  { %v9657_v63 = vld [vmem:[#allocation3 + $0xd5c] sm:$0xf0] }
  0x74   :  { %v135_v6 = vld [vmem:[%s10583_s0] sm:$0xff]  ;;  %v7855_v9 = vor.u32 %v9657_v63, %v7854_v62  ;;  %2937 = vmatpush.bf16.msrb.mxu1 %v7599_v8  ;;  %2964 = vmatpush.bf16.msrb.mxu3 %v6291_v29 }
  0x75   :  { %v7310_v10 = vld [vmem:[#allocation3 + $0x900] sm:$0xf]  ;;  %v609_v13 = vunpack.c.l.b16 %v135_v6  ;;  %v610_v14 = vunpack.c.h.b16 %v135_v6  ;;  %v6195_v6 = vor.u32 %v9237_v57, %v6192_v58  ;;  %v9229_v8 = vld [vmem:[#allocation3 + $0x4] sm:$0xf] }
  0x76   :  { %v9521_v11 = vld [vmem:[#allocation3 + $0x91c] sm:$0xf0]  ;;  %2950 = vmatpush.bf16.msrb.mxu2 %v7855_v9  ;;  %v6160_v9 = vld [vmem:[#allocation3 + $0x20] sm:$0xf0] }
  0x77   :  { %v7566_v12 = vld [vmem:[#allocation3 + $0xb00] sm:$0xf]  ;;  %v10292_v21 = vpack.c.b16 %v609_v13, %v609_v13  ;;  %v10294_v22 = vpack.c.b16 %v610_v14, %v610_v14  ;;  %v7311_v23 = vor.u32 %v9521_v11, %v7310_v10  ;;  %v137_v10 = vld [vmem:[%s10583_s0 + $0x10] sm:$0xff]  ;;  %v9349_v11 = vld [vmem:[#allocation3 + $0x3c4] sm:$0xf] }
  0x78   :  { %v9585_v16 = vld [vmem:[#allocation3 + $0xb1c] sm:$0xf0]  ;;  %2965 = vmatpush.bf16.msrb.mxu3 %v6259_v41  ;;  %v9413_v13 = vld [vmem:[#allocation3 + $0x5c4] sm:$0xf] }
  0x79   :  { %v7822_v17 = vld [vmem:[#allocation3 + $0xd00] sm:$0xf]  ;;  %v7567_v24 = vor.u32 %v9585_v16, %v7566_v12  ;;  %2878 = vmatmul.bf16.vlgmr.msra.gmra.mxu0 %v10292_v21  ;;  %2891 = vmatmul.bf16.vlgmr.msra.gmra.mxu1 %v10294_v22  ;;  %v6640_v12 = vld [vmem:[#allocation3 + $0x3e0] sm:$0xf0]  ;;  %v6899_v29 = vor.u32 %v9413_v13, %v6896_v15 }
  0x7a   :  { %v9649_v18 = vld [vmem:[#allocation3 + $0xd1c] sm:$0xf0]  ;;  %2925 = vmatpush.bf16.msrb.mxu0 %v7311_v23  ;;  %v9477_v16 = vld [vmem:[#allocation3 + $0x7c4] sm:$0xf] }
  0x7b   :  { %v7823_v25 = vor.u32 %v9649_v18, %v7822_v17  ;;  %v7278_v26 = vld [vmem:[#allocation3 + $0x8c0] sm:$0xf]  ;;  %2938 = vmatpush.bf16.msrb.mxu1 %v7567_v24  ;;  %v7152_v17 = vld [vmem:[#allocation3 + $0x7e0] sm:$0xf0]  ;;  %v615_v18 = vunpack.c.l.b16 %v138_v4 }
  0x7c   :  { %v9513_v27 = vld [vmem:[#allocation3 + $0x8dc] sm:$0xf0]  ;;  %2966 = vmatpush.bf16.msrb.mxu3 %v6227_v53  ;;  %v9541_v23 = vld [vmem:[#allocation3 + $0x9c4] sm:$0xf] }
  0x7d   :  { %v7534_v28 = vld [vmem:[#allocation3 + $0xac0] sm:$0xf]  ;;  %v7279_v35 = vor.u32 %v9513_v27, %v7278_v26  ;;  %2951 = vmatpush.bf16.msrb.mxu2 %v7823_v25  ;;  %v7408_v24 = vld [vmem:[#allocation3 + $0x9e0] sm:$0xf0]  ;;  %v613_v25 = vunpack.c.l.b16 %v137_v10  ;;  %v614_v26 = vunpack.c.h.b16 %v137_v10  ;;  %v6163_v27 = vor.u32 %v9229_v8, %v6160_v9 }
  0x7e   :  { %v9577_v30 = vld [vmem:[#allocation3 + $0xadc] sm:$0xf0]  ;;  %v7411_v34 = vor.u32 %v9541_v23, %v7408_v24  ;;  %v9525_v53 = vld [vmem:[#allocation3 + $0x944] sm:$0xf] }
  0x7f   :  { %v7790_v31 = vld [vmem:[#allocation3 + $0xcc0] sm:$0xf]  ;;  %v7535_v36 = vor.u32 %v9577_v30, %v7534_v28  ;;  %2926 = vmatpush.bf16.msrb.mxu0 %v7279_v35  ;;  %v6643_v28 = vor.u32 %v9349_v11, %v6640_v12  ;;  %v7155_v30 = vor.u32 %v9477_v16, %v7152_v17  ;;  %v6864_v35 = vld [vmem:[#allocation3 + $0x5a0] sm:$0xf0]  ;;  %v10307_v41 = vpack.c.b16 %v613_v25, %v613_v25 }
  0x80   :  { %v9641_v32 = vld [vmem:[#allocation3 + $0xcdc] sm:$0xf0]  ;;  %2967 = vmatpush.bf16.msrb.mxu3 %v6195_v6  ;;  %v9325_v58 = vld [vmem:[#allocation3 + $0x304] sm:$0xf] }
  0x81   :  { %v7791_v37 = vor.u32 %v9641_v32, %v7790_v31  ;;  %v7246_v38 = vld [vmem:[#allocation3 + $0x880] sm:$0xf]  ;;  %2939 = vmatpush.bf16.msrb.mxu1 %v7535_v36  ;;  %v9341_v31 = vld [vmem:[#allocation3 + $0x384] sm:$0xf] }
  0x82   :  { %v9505_v39 = vld [vmem:[#allocation3 + $0x89c] sm:$0xf0]  ;;  %v6608_v32 = vld [vmem:[#allocation3 + $0x3a0] sm:$0xf0] }
  0x83   :  { %v7502_v40 = vld [vmem:[#allocation3 + $0xa80] sm:$0xf]  ;;  %v7247_v47 = vor.u32 %v9505_v39, %v7246_v38  ;;  %2952 = vmatpush.bf16.msrb.mxu2 %v7791_v37  ;;  %v9469_v36 = vld [vmem:[#allocation3 + $0x784] sm:$0xf]  ;;  %v10305_v38 = vpack.c.b16 %v615_v18, %v615_v18 }
  0x84   :  { %v9569_v42 = vld [vmem:[#allocation3 + $0xa9c] sm:$0xf0]  ;;  %v7120_v37 = vld [vmem:[#allocation3 + $0x7a0] sm:$0xf0]  ;;  %2968 = vmatpush.bf16.msrb.mxu3 %v6163_v27 }
  0x85   :  { %v7758_v43 = vld [vmem:[#allocation3 + $0xc80] sm:$0xf]  ;;  %v7503_v48 = vor.u32 %v9569_v42, %v7502_v40  ;;  %2927 = vmatpush.bf16.msrb.mxu0 %v7247_v47  ;;  %v9533_v39 = vld [vmem:[#allocation3 + $0x984] sm:$0xf]  ;;  %v10309_v42 = vpack.c.b16 %v614_v26, %v614_v26  ;;  %v7123_v45 = vor.u32 %v9469_v36, %v7120_v37 }
  0x86   :  { %v9633_v44 = vld [vmem:[#allocation3 + $0xc9c] sm:$0xf0]  ;;  %v7376_v40 = vld [vmem:[#allocation3 + $0x9a0] sm:$0xf0] }
  0x87   :  { %v7759_v49 = vor.u32 %v9633_v44, %v7758_v43  ;;  %v7214_v50 = vld [vmem:[#allocation3 + $0x840] sm:$0xf]  ;;  %2940 = vmatpush.bf16.msrb.mxu1 %v7503_v48  ;;  %v6611_v43 = vor.u32 %v9341_v31, %v6608_v32  ;;  %v6867_v44 = vor.u32 %v9405_v33, %v6864_v35  ;;  %v6576_v47 = vld [vmem:[#allocation3 + $0x360] sm:$0xf0]  ;;  %2969 = vmatmul.bf16.vlgmr.msrb.gmra.mxu3 %v10292_v21 }
  0x88   :  { %v9497_v51 = vld [vmem:[#allocation3 + $0x85c] sm:$0xf0]  ;;  %v9397_v48 = vld [vmem:[#allocation3 + $0x544] sm:$0xf]  ;;  %3013 = vmatpush.bf16.msra.mxu3 %v7411_v34 }
  0x89   :  { %v7470_v52 = vld [vmem:[#allocation3 + $0xa40] sm:$0xf]  ;;  %v7215_v60 = vor.u32 %v9497_v51, %v7214_v50  ;;  %2953 = vmatpush.bf16.msrb.mxu2 %v7759_v49  ;;  %v7379_v49 = vor.u32 %v9533_v39, %v7376_v40  ;;  %v6832_v50 = vld [vmem:[#allocation3 + $0x560] sm:$0xf0] }
  0x8a   :  { %v9561_v54 = vld [vmem:[#allocation3 + $0xa5c] sm:$0xf0]  ;;  %v9461_v51 = vld [vmem:[#allocation3 + $0x744] sm:$0xf] }
  0x8b   :  { %v7726_v55 = vld [vmem:[#allocation3 + $0xc40] sm:$0xf]  ;;  %v7471_v0 = vor.u32 %v9561_v54, %v7470_v52  ;;  %2928 = vmatpush.bf16.msrb.mxu0 %v7215_v60  ;;  %v7088_v52 = vld [vmem:[#allocation3 + $0x760] sm:$0xf0] }
  0x8c   :  { %v9625_v56 = vld [vmem:[#allocation3 + $0xc5c] sm:$0xf0]  ;;  %v7344_v54 = vld [vmem:[#allocation3 + $0x960] sm:$0xf0]  ;;  %v7091_v57 = vor.u32 %v9461_v51, %v7088_v52  ;;  %3014 = vmatpush.bf16.msra.mxu3 %v7379_v49 }
  0x8d   :  { %v7182_v59 = vld [vmem:[#allocation3 + $0x800] sm:$0xf]  ;;  %v7727_v1 = vor.u32 %v9625_v56, %v7726_v55  ;;  %2941 = vmatpush.bf16.msrb.mxu1 %v7471_v0  ;;  %v6579_v55 = vor.u32 %v9333_v46, %v6576_v47  ;;  %v6835_v56 = vor.u32 %v9397_v48, %v6832_v50  ;;  %v9389_v60 = vld [vmem:[#allocation3 + $0x504] sm:$0xf] }
  0x8e   :  { %v9489_v61 = vld [vmem:[#allocation3 + $0x81c] sm:$0xf0]  ;;  %v7056_v0 = vld [vmem:[#allocation3 + $0x720] sm:$0xf0] }
  0x8f   :  { %v7438_v62 = vld [vmem:[#allocation3 + $0xa00] sm:$0xf]  ;;  %v7183_v14 = vor.u32 %v9489_v61, %v7182_v59  ;;  %2954 = vmatpush.bf16.msrb.mxu2 %v7727_v1  ;;  %v6544_v59 = vld [vmem:[#allocation3 + $0x320] sm:$0xf0]  ;;  %v7347_v61 = vor.u32 %v9525_v53, %v7344_v54 }
  0x90   :  { %v9553_v63 = vld [vmem:[#allocation3 + $0xa1c] sm:$0xf0]  ;;  %v9517_v1 = vld [vmem:[#allocation3 + $0x904] sm:$0xf] }
  0x91   :  { %v7694_v2 = vld [vmem:[#allocation3 + $0xc00] sm:$0xf]  ;;  %v7439_v19 = vor.u32 %v9553_v63, %v7438_v62  ;;  %2929 = vmatpush.bf16.msrb.mxu0 %v7183_v14  ;;  %v6800_v62 = vld [vmem:[#allocation3 + $0x520] sm:$0xf0]  ;;  %3015 = vmatpush.bf16.msra.mxu3 %v7347_v61 }
  0x92   :  { %v9617_v3 = vld [vmem:[#allocation3 + $0xc1c] sm:$0xf0]  ;;  %v9453_v63 = vld [vmem:[#allocation3 + $0x704] sm:$0xf]  ;;  %v6803_v4 = vor.u32 %v9389_v60, %v6800_v62 }
  0x93   :  { %v7695_v20 = vor.u32 %v9617_v3, %v7694_v2  ;;  %2942 = vmatpush.bf16.msrb.mxu1 %v7439_v19  ;;  %v7312_v2 = vld [vmem:[#allocation3 + $0x920] sm:$0xf0]  ;;  %v6547_v3 = vor.u32 %v9325_v58, %v6544_v59  ;;  %v7059_v6 = vor.u32 %v9453_v63, %v7056_v0  ;;  %v6390_v63 = vld [vmem:[#allocation3 + $0x1c8] sm:$0xf] }
  0x94   :  { %2930 = vmatmul.bf16.vlgmr.msrb.gmra.mxu0 %v10307_v41  ;;  %v9317_v8 = vld [vmem:[#allocation3 + $0x2c4] sm:$0xf]  ;;  %v7315_v11 = vor.u32 %v9517_v1, %v7312_v2  ;;  %v9290_v0 = vld [vmem:[#allocation3 + $0x1e4] sm:$0xf0] }
  0x95   :  { %2955 = vmatpush.bf16.msrb.mxu2 %v7695_v20  ;;  %2974 = vmatpush.bf16.msra.mxu0 %v6643_v28  ;;  %v6512_v9 = vld [vmem:[#allocation3 + $0x2e0] sm:$0xf0] }
  0x96   :  { %2943 = vmatmul.bf16.vlgmr.msrb.gmra.mxu1 %v10309_v42  ;;  %v9381_v10 = vld [vmem:[#allocation3 + $0x4c4] sm:$0xf]  ;;  %v6515_v17 = vor.u32 %v9317_v8, %v6512_v9  ;;  %3016 = vmatpush.bf16.msra.mxu3 %v7315_v11 }
  0x97   :  { %2987 = vmatpush.bf16.msra.mxu1 %v6899_v29  ;;  %v6768_v12 = vld [vmem:[#allocation3 + $0x4e0] sm:$0xf0] }
  0x98   :  { %2956 = vmatmul.bf16.vlgmr.msrb.gmra.mxu2 %v10305_v38  ;;  %v9445_v13 = vld [vmem:[#allocation3 + $0x6c4] sm:$0xf]  ;;  %v6771_v18 = vor.u32 %v9381_v10, %v6768_v12  ;;  %v6391_v10 = vor.u32 %v9290_v0, %v6390_v63 }
  0x99   :  { %3000 = vmatpush.bf16.msra.mxu2 %v7155_v30  ;;  %2975 = vmatpush.bf16.msra.mxu0 %v6611_v43  ;;  %v7024_v14 = vld [vmem:[#allocation3 + $0x6e0] sm:$0xf0] }
  0x9a   :  { %v9509_v15 = vld [vmem:[#allocation3 + $0x8c4] sm:$0xf]  ;;  %v7027_v19 = vor.u32 %v9445_v13, %v7024_v14 }
  0x9b   :  { %2988 = vmatpush.bf16.msra.mxu1 %v6867_v44  ;;  %v7280_v16 = vld [vmem:[#allocation3 + $0x8e0] sm:$0xf0] }
  0x9c   :  { %v9309_v20 = vld [vmem:[#allocation3 + $0x284] sm:$0xf]  ;;  %v7283_v25 = vor.u32 %v9509_v15, %v7280_v16  ;;  %v6358_v16 = vld [vmem:[#allocation3 + $0x188] sm:$0xf] }
  0x9d   :  { %3001 = vmatpush.bf16.msra.mxu2 %v7123_v45  ;;  %2976 = vmatpush.bf16.msra.mxu0 %v6579_v55  ;;  %v6480_v23 = vld [vmem:[#allocation3 + $0x2a0] sm:$0xf0] }
  0x9e   :  { %v9373_v24 = vld [vmem:[#allocation3 + $0x484] sm:$0xf]  ;;  %v6483_v31 = vor.u32 %v9309_v20, %v6480_v23  ;;  %3017 = vmatpush.bf16.msra.mxu3 %v7283_v25 }
  0x9f   :  { %2989 = vmatpush.bf16.msra.mxu1 %v6835_v56  ;;  %v6736_v26 = vld [vmem:[#allocation3 + $0x4a0] sm:$0xf0] }
  0xa0   :  { %v9437_v27 = vld [vmem:[#allocation3 + $0x684] sm:$0xf]  ;;  %v6739_v32 = vor.u32 %v9373_v24, %v6736_v26 }
  0xa1   :  { %3002 = vmatpush.bf16.msra.mxu2 %v7091_v57  ;;  %2977 = vmatpush.bf16.msra.mxu0 %v6547_v3  ;;  %v6992_v28 = vld [vmem:[#allocation3 + $0x6a0] sm:$0xf0]  ;;  %v6646_v3 = vld [vmem:[#allocation3 + $0x3c8] sm:$0xf] }
  0xa2   :  { %v9501_v29 = vld [vmem:[#allocation3 + $0x884] sm:$0xf]  ;;  %v6995_v33 = vor.u32 %v9437_v27, %v6992_v28 }
  0xa3   :  { %2990 = vmatpush.bf16.msra.mxu1 %v6803_v4  ;;  %v7248_v30 = vld [vmem:[#allocation3 + $0x8a0] sm:$0xf0]  ;;  %v9354_v4 = vld [vmem:[#allocation3 + $0x3e4] sm:$0xf0] }
  0xa4   :  { %v9301_v34 = vld [vmem:[#allocation3 + $0x244] sm:$0xf]  ;;  %v7251_v37 = vor.u32 %v9501_v29, %v7248_v30  ;;  %v6647_v14 = vor.u32 %v9354_v4, %v6646_v3  ;;  %v6326_v30 = vld [vmem:[#allocation3 + $0x148] sm:$0xf] }
  0xa5   :  { %3003 = vmatpush.bf16.msra.mxu2 %v7059_v6  ;;  %2978 = vmatpush.bf16.msra.mxu0 %v6515_v17  ;;  %v6448_v35 = vld [vmem:[#allocation3 + $0x260] sm:$0xf0]  ;;  %v9282_v17 = vld [vmem:[#allocation3 + $0x1a4] sm:$0xf0] }
  0xa6   :  { %v9365_v36 = vld [vmem:[#allocation3 + $0x444] sm:$0xf]  ;;  %v6451_v46 = vor.u32 %v9301_v34, %v6448_v35  ;;  %3018 = vmatpush.bf16.msra.mxu3 %v7251_v37  ;;  %v6359_v24 = vor.u32 %v9282_v17, %v6358_v16 }
  0xa7   :  { %2991 = vmatpush.bf16.msra.mxu1 %v6771_v18  ;;  %v6704_v39 = vld [vmem:[#allocation3 + $0x460] sm:$0xf0]  ;;  %v6614_v18 = vld [vmem:[#allocation3 + $0x388] sm:$0xf] }
  0xa8   :  { %v9429_v40 = vld [vmem:[#allocation3 + $0x644] sm:$0xf]  ;;  %v6707_v49 = vor.u32 %v9365_v36, %v6704_v39 }
  0xa9   :  { %3004 = vmatpush.bf16.msra.mxu2 %v7027_v19  ;;  %v6960_v43 = vld [vmem:[#allocation3 + $0x660] sm:$0xf0]  ;;  %2979 = vmatpush.bf16.msra.mxu0 %v6483_v31  ;;  %v9346_v19 = vld [vmem:[#allocation3 + $0x3a4] sm:$0xf0] }
  0xaa   :  { %v9493_v44 = vld [vmem:[#allocation3 + $0x844] sm:$0xf]  ;;  %v6963_v50 = vor.u32 %v9429_v40, %v6960_v43  ;;  %v6615_v28 = vor.u32 %v9346_v19, %v6614_v18  ;;  %v9274_v31 = vld [vmem:[#allocation3 + $0x164] sm:$0xf0] }
  0xab   :  { %v7216_v45 = vld [vmem:[#allocation3 + $0x860] sm:$0xf0]  ;;  %2992 = vmatpush.bf16.msra.mxu1 %v6739_v32  ;;  %v6582_v32 = vld [vmem:[#allocation3 + $0x348] sm:$0xf]  ;;  %v6327_v36 = vor.u32 %v9274_v31, %v6326_v30 }
  0xac   :  { %v9293_v47 = vld [vmem:[#allocation3 + $0x204] sm:$0xf]  ;;  %v7219_v54 = vor.u32 %v9493_v44, %v7216_v45  ;;  %v6294_v45 = vld [vmem:[#allocation3 + $0x108] sm:$0xf] }
  0xad   :  { %v6416_v48 = vld [vmem:[#allocation3 + $0x220] sm:$0xf0]  ;;  %3005 = vmatpush.bf16.msra.mxu2 %v6995_v33  ;;  %2980 = vmatpush.bf16.msra.mxu0 %v6451_v46  ;;  %v9338_v33 = vld [vmem:[#allocation3 + $0x364] sm:$0xf0] }
  0xae   :  { %v9357_v51 = vld [vmem:[#allocation3 + $0x404] sm:$0xf]  ;;  %v6419_v61 = vor.u32 %v9293_v47, %v6416_v48  ;;  %3019 = vmatpush.bf16.msra.mxu3 %v7219_v54  ;;  %v6583_v43 = vor.u32 %v9338_v33, %v6582_v32  ;;  %v9266_v46 = vld [vmem:[#allocation3 + $0x124] sm:$0xf0] }
  0xaf   :  { %v6672_v52 = vld [vmem:[#allocation3 + $0x420] sm:$0xf0]  ;;  %2993 = vmatpush.bf16.msra.mxu1 %v6707_v49  ;;  %v6550_v47 = vld [vmem:[#allocation3 + $0x308] sm:$0xf] }
  0xb0   :  { %v9421_v53 = vld [vmem:[#allocation3 + $0x604] sm:$0xf]  ;;  %v6675_v1 = vor.u32 %v9357_v51, %v6672_v52  ;;  %v9330_v48 = vld [vmem:[#allocation3 + $0x324] sm:$0xf0]  ;;  %v6295_v51 = vor.u32 %v9266_v46, %v6294_v45 }
  0xb1   :  { %v6928_v55 = vld [vmem:[#allocation3 + $0x620] sm:$0xf0]  ;;  %3006 = vmatpush.bf16.msra.mxu2 %v6963_v50  ;;  %2981 = vmatpush.bf16.msra.mxu0 %v6419_v61  ;;  %v6198_v19 = vld [vmem:[#allocation3 + $0x48] sm:$0xf] }
  0xb2   :  { %v9485_v56 = vld [vmem:[#allocation3 + $0x804] sm:$0xf]  ;;  %v6931_v2 = vor.u32 %v9421_v53, %v6928_v55  ;;  %v6551_v55 = vor.u32 %v9330_v48, %v6550_v47  ;;  %v6166_v32 = vld [vmem:[#allocation3 + $0x8] sm:$0xf] }
  0xb3   :  { %v7184_v57 = vld [vmem:[#allocation3 + $0x820] sm:$0xf0]  ;;  %2994 = vmatpush.bf16.msra.mxu1 %v6675_v1  ;;  %v7414_v45 = vld [vmem:[#allocation3 + $0x9c8] sm:$0xf] }
  0xb4   :  { %v9605_v58 = vld [vmem:[#allocation3 + $0xbc4] sm:$0xf]  ;;  %v7187_v6 = vor.u32 %v9485_v56, %v7184_v57  ;;  %2982 = vmatmul.bf16.vlgmr.msra.gmra.mxu0 %v10294_v22  ;;  %v6262_v57 = vld [vmem:[#allocation3 + $0xc8] sm:$0xf] }
  0xb5   :  { %v7664_v59 = vld [vmem:[#allocation3 + $0xbe0] sm:$0xf0]  ;;  %3007 = vmatpush.bf16.msra.mxu2 %v6931_v2  ;;  %v9546_v46 = vld [vmem:[#allocation3 + $0x9e4] sm:$0xf0] }
  0xb6   :  { %v9669_v60 = vld [vmem:[#allocation3 + $0xdc4] sm:$0xf]  ;;  %v7667_v8 = vor.u32 %v9605_v58, %v7664_v59  ;;  %3020 = vmatpush.bf16.msra.mxu3 %v7187_v6  ;;  %2995 = vmatmul.bf16.vlgmr.msra.gmra.mxu1 %v10284_v5  ;;  %v9258_v58 = vld [vmem:[#allocation3 + $0xe4] sm:$0xf0] }
  0xb7   :  { %v7920_v62 = vld [vmem:[#allocation3 + $0xde0] sm:$0xf0]  ;;  %v6518_v59 = vld [vmem:[#allocation3 + $0x2c8] sm:$0xf]  ;;  %v6263_v63 = vor.u32 %v9258_v58, %v6262_v57 }
  0xb8   :  { %v7923_v9 = vor.u32 %v9669_v60, %v7920_v62  ;;  %v9597_v11 = vld [vmem:[#allocation3 + $0xb84] sm:$0xf]  ;;  %3026 = vmatpush.bf16.msrb.mxu0 %v7667_v8  ;;  %3008 = vmatmul.bf16.vlgmr.msra.gmra.mxu2 %v10289_v7  ;;  %v9322_v60 = vld [vmem:[#allocation3 + $0x2e4] sm:$0xf0] }
  0xb9   :  { %v7632_v12 = vld [vmem:[#allocation3 + $0xba0] sm:$0xf0]  ;;  %3052 = vmatpush.bf16.msrb.mxu2 %v6391_v10  ;;  %3021 = vmatmul.bf16.vlgmr.msra.gmra.mxu3 %v10307_v41  ;;  %v6519_v3 = vor.u32 %v9322_v60, %v6518_v59  ;;  %v6230_v6 = vld [vmem:[#allocation3 + $0x88] sm:$0xf] }
  0xba   :  { %v9661_v13 = vld [vmem:[#allocation3 + $0xd84] sm:$0xf]  ;;  %v7635_v20 = vor.u32 %v9597_v11, %v7632_v12  ;;  %3039 = vmatpush.bf16.msrb.mxu1 %v7923_v9  ;;  %3065 = vmatpush.bf16.msrb.mxu3 %v6647_v14  ;;  %v9250_v8 = vld [vmem:[#allocation3 + $0xa4] sm:$0xf0] }
  0xbb   :  { %v7888_v15 = vld [vmem:[#allocation3 + $0xda0] sm:$0xf0]  ;;  %v6486_v9 = vld [vmem:[#allocation3 + $0x288] sm:$0xf] }
  0xbc   :  { %v7891_v23 = vor.u32 %v9661_v13, %v7888_v15  ;;  %v9589_v25 = vld [vmem:[#allocation3 + $0xb44] sm:$0xf]  ;;  %3027 = vmatpush.bf16.msrb.mxu0 %v7635_v20  ;;  %v9314_v10 = vld [vmem:[#allocation3 + $0x2a4] sm:$0xf0]  ;;  %v6231_v13 = vor.u32 %v9250_v8, %v6230_v6 }
  0xbd   :  { %v7600_v26 = vld [vmem:[#allocation3 + $0xb60] sm:$0xf0]  ;;  %3053 = vmatpush.bf16.msrb.mxu2 %v6359_v24  ;;  %v6487_v17 = vor.u32 %v9314_v10, %v6486_v9  ;;  %v9242_v20 = vld [vmem:[#allocation3 + $0x64] sm:$0xf0] }
  0xbe   :  { %v9653_v27 = vld [vmem:[#allocation3 + $0xd44] sm:$0xf]  ;;  %v7603_v34 = vor.u32 %v9589_v25, %v7600_v26  ;;  %3040 = vmatpush.bf16.msrb.mxu1 %v7891_v23  ;;  %3066 = vmatpush.bf16.msrb.mxu3 %v6615_v28  ;;  %v6454_v23 = vld [vmem:[#allocation3 + $0x248] sm:$0xf] }
  0xbf   :  { %v7856_v29 = vld [vmem:[#allocation3 + $0xd60] sm:$0xf0]  ;;  %v9306_v24 = vld [vmem:[#allocation3 + $0x264] sm:$0xf0] }
  0xc0   :  { %v7859_v35 = vor.u32 %v9653_v27, %v7856_v29  ;;  %v9581_v37 = vld [vmem:[#allocation3 + $0xb04] sm:$0xf]  ;;  %3028 = vmatpush.bf16.msrb.mxu0 %v7603_v34  ;;  %v6199_v29 = vor.u32 %v9242_v20, %v6198_v19  ;;  %v6455_v33 = vor.u32 %v9306_v24, %v6454_v23  ;;  %v9234_v34 = vld [vmem:[#allocation3 + $0x24] sm:$0xf0] }
  0xc1   :  { %v7568_v39 = vld [vmem:[#allocation3 + $0xb20] sm:$0xf0]  ;;  %3054 = vmatpush.bf16.msrb.mxu2 %v6327_v36  ;;  %v9298_v36 = vld [vmem:[#allocation3 + $0x224] sm:$0xf0]  ;;  %v6167_v48 = vor.u32 %v9234_v34, %v6166_v32 }
  0xc2   :  { %v9645_v40 = vld [vmem:[#allocation3 + $0xd04] sm:$0xf]  ;;  %v7571_v49 = vor.u32 %v9581_v37, %v7568_v39  ;;  %3041 = vmatpush.bf16.msrb.mxu1 %v7859_v35  ;;  %3067 = vmatpush.bf16.msrb.mxu3 %v6583_v43  ;;  %v6422_v35 = vld [vmem:[#allocation3 + $0x208] sm:$0xf] }
  0xc3   :  { %v7824_v44 = vld [vmem:[#allocation3 + $0xd20] sm:$0xf0]  ;;  %v6902_v37 = vld [vmem:[#allocation3 + $0x5c8] sm:$0xf] }
  0xc4   :  { %v7827_v50 = vor.u32 %v9645_v40, %v7824_v44  ;;  %v9573_v52 = vld [vmem:[#allocation3 + $0xac4] sm:$0xf]  ;;  %3029 = vmatpush.bf16.msrb.mxu0 %v7571_v49  ;;  %v9418_v39 = vld [vmem:[#allocation3 + $0x5e4] sm:$0xf0] }
  0xc5   :  { %v7536_v53 = vld [vmem:[#allocation3 + $0xae0] sm:$0xf0]  ;;  %3055 = vmatpush.bf16.msrb.mxu2 %v6295_v51  ;;  %v7158_v40 = vld [vmem:[#allocation3 + $0x7c8] sm:$0xf]  ;;  %v6423_v51 = vor.u32 %v9298_v36, %v6422_v35 }
  0xc6   :  { %v9637_v54 = vld [vmem:[#allocation3 + $0xcc4] sm:$0xf]  ;;  %v7539_v61 = vor.u32 %v9573_v52, %v7536_v53  ;;  %3042 = vmatpush.bf16.msrb.mxu1 %v7827_v50  ;;  %3068 = vmatpush.bf16.msrb.mxu3 %v6551_v55  ;;  %v9482_v44 = vld [vmem:[#allocation3 + $0x7e4] sm:$0xf0]  ;;  %v6903_v52 = vor.u32 %v9418_v39, %v6902_v37 }
  0xc7   :  { %v7792_v56 = vld [vmem:[#allocation3 + $0xce0] sm:$0xf0]  ;;  %v7670_v49 = vld [vmem:[#allocation3 + $0xbc8] sm:$0xf]  ;;  %v7159_v53 = vor.u32 %v9482_v44, %v7158_v40 }
  0xc8   :  { %v7795_v62 = vor.u32 %v9637_v54, %v7792_v56  ;;  %v9565_v0 = vld [vmem:[#allocation3 + $0xa84] sm:$0xf]  ;;  %3030 = vmatpush.bf16.msrb.mxu0 %v7539_v61  ;;  %v9610_v50 = vld [vmem:[#allocation3 + $0xbe4] sm:$0xf0]  ;;  %v7415_v54 = vor.u32 %v9546_v46, %v7414_v45 }
  0xc9   :  { %v7504_v1 = vld [vmem:[#allocation3 + $0xaa0] sm:$0xf0]  ;;  %3056 = vmatpush.bf16.msrb.mxu2 %v6263_v63  ;;  %v6870_v55 = vld [vmem:[#allocation3 + $0x588] sm:$0xf]  ;;  %v7671_v58 = vor.u32 %v9610_v50, %v7670_v49 }
  0xca   :  { %v9629_v2 = vld [vmem:[#allocation3 + $0xc84] sm:$0xf]  ;;  %v7507_v11 = vor.u32 %v9565_v0, %v7504_v1  ;;  %3043 = vmatpush.bf16.msrb.mxu1 %v7795_v62  ;;  %3069 = vmatpush.bf16.msrb.mxu3 %v6519_v3  ;;  %v9410_v56 = vld [vmem:[#allocation3 + $0x5a4] sm:$0xf0] }
  0xcb   :  { %v7760_v4 = vld [vmem:[#allocation3 + $0xca0] sm:$0xf0]  ;;  %v7126_v57 = vld [vmem:[#allocation3 + $0x788] sm:$0xf]  ;;  %v6871_v0 = vor.u32 %v9410_v56, %v6870_v55 }
  0xcc   :  { %v7763_v12 = vor.u32 %v9629_v2, %v7760_v4  ;;  %v9557_v14 = vld [vmem:[#allocation3 + $0xa44] sm:$0xf]  ;;  %3031 = vmatpush.bf16.msrb.mxu0 %v7507_v11  ;;  %v9474_v59 = vld [vmem:[#allocation3 + $0x7a4] sm:$0xf0] }
  0xcd   :  { %v7472_v15 = vld [vmem:[#allocation3 + $0xa60] sm:$0xf0]  ;;  %3057 = vmatpush.bf16.msrb.mxu2 %v6231_v13  ;;  %v7382_v60 = vld [vmem:[#allocation3 + $0x988] sm:$0xf]  ;;  %v7127_v1 = vor.u32 %v9474_v59, %v7126_v57 }
  0xce   :  { %v9621_v16 = vld [vmem:[#allocation3 + $0xc44] sm:$0xf]  ;;  %v7475_v25 = vor.u32 %v9557_v14, %v7472_v15  ;;  %3044 = vmatpush.bf16.msrb.mxu1 %v7763_v12  ;;  %3070 = vmatpush.bf16.msrb.mxu3 %v6487_v17  ;;  %v9538_v61 = vld [vmem:[#allocation3 + $0x9a4] sm:$0xf0] }
  0xcf   :  { %v7728_v18 = vld [vmem:[#allocation3 + $0xc60] sm:$0xf0]  ;;  %v7638_v62 = vld [vmem:[#allocation3 + $0xb88] sm:$0xf]  ;;  %v7383_v2 = vor.u32 %v9538_v61, %v7382_v60 }
  0xd0   :  { %v9549_v26 = vld [vmem:[#allocation3 + $0xa04] sm:$0xf]  ;;  %v7731_v28 = vor.u32 %v9621_v16, %v7728_v18  ;;  %3032 = vmatpush.bf16.msrb.mxu0 %v7475_v25  ;;  %v9602_v63 = vld [vmem:[#allocation3 + $0xba4] sm:$0xf0] }
  0xd1   :  { %v7440_v27 = vld [vmem:[#allocation3 + $0xa20] sm:$0xf0]  ;;  %3058 = vmatpush.bf16.msrb.mxu2 %v6199_v29  ;;  %v6838_v3 = vld [vmem:[#allocation3 + $0x548] sm:$0xf]  ;;  %v7639_v8 = vor.u32 %v9602_v63, %v7638_v62 }
  0xd2   :  { %v9613_v30 = vld [vmem:[#allocation3 + $0xc04] sm:$0xf]  ;;  %v7443_v43 = vor.u32 %v9549_v26, %v7440_v27  ;;  %3045 = vmatpush.bf16.msrb.mxu1 %v7731_v28  ;;  %3071 = vmatpush.bf16.msrb.mxu3 %v6455_v33  ;;  %v9402_v4 = vld [vmem:[#allocation3 + $0x564] sm:$0xf0] }
  0xd3   :  { %v7696_v31 = vld [vmem:[#allocation3 + $0xc20] sm:$0xf0]  ;;  %v7094_v6 = vld [vmem:[#allocation3 + $0x748] sm:$0xf]  ;;  %v6839_v14 = vor.u32 %v9402_v4, %v6838_v3 }
  0xd4   :  { %v7699_v47 = vor.u32 %v9613_v30, %v7696_v31  ;;  %3033 = vmatpush.bf16.msrb.mxu0 %v7443_v43  ;;  %v9466_v9 = vld [vmem:[#allocation3 + $0x764] sm:$0xf0] }
  0xd5   :  { %3059 = vmatpush.bf16.msrb.mxu2 %v6167_v48  ;;  %v7350_v10 = vld [vmem:[#allocation3 + $0x948] sm:$0xf]  ;;  %v7095_v15 = vor.u32 %v9466_v9, %v7094_v6 }
  0xd6   :  { %3046 = vmatpush.bf16.msrb.mxu1 %v7699_v47  ;;  %3072 = vmatpush.bf16.msrb.mxu3 %v6423_v51  ;;  %v9530_v11 = vld [vmem:[#allocation3 + $0x964] sm:$0xf0] }
  0xd7   :  { %3034 = vmatmul.bf16.vlgmr.msrb.gmra.mxu0 %v10309_v42  ;;  %v7606_v12 = vld [vmem:[#allocation3 + $0xb48] sm:$0xf]  ;;  %v7351_v16 = vor.u32 %v9530_v11, %v7350_v10 }
  0xd8   :  { %3078 = vmatpush.bf16.msra.mxu0 %v6903_v52  ;;  %v9594_v13 = vld [vmem:[#allocation3 + $0xb64] sm:$0xf0]  ;;  %3060 = vmatmul.bf16.vlgmr.msrb.gmra.mxu2 %v10292_v21 }
  0xd9   :  { %3104 = vmatpush.bf16.msra.mxu2 %v7415_v54  ;;  %3047 = vmatmul.bf16.vlgmr.msrb.gmra.mxu1 %v10305_v38  ;;  %v6806_v17 = vld [vmem:[#allocation3 + $0x508] sm:$0xf]  ;;  %v7607_v20 = vor.u32 %v9594_v13, %v7606_v12 }
  0xda   :  { %3091 = vmatpush.bf16.msra.mxu1 %v7159_v53  ;;  %3117 = vmatpush.bf16.msra.mxu3 %v7671_v58  ;;  %v9394_v18 = vld [vmem:[#allocation3 + $0x524] sm:$0xf0] }
  0xdb   :  { %3073 = vmatmul.bf16.vlgmr.msrb.gmra.mxu3 %v10294_v22  ;;  %v7062_v19 = vld [vmem:[#allocation3 + $0x708] sm:$0xf]  ;;  %v6807_v28 = vor.u32 %v9394_v18, %v6806_v17 }
  0xdc   :  { %3079 = vmatpush.bf16.msra.mxu0 %v6871_v0  ;;  %v9458_v23 = vld [vmem:[#allocation3 + $0x724] sm:$0xf0] }
  0xdd   :  { %3105 = vmatpush.bf16.msra.mxu2 %v7383_v2  ;;  %v7318_v24 = vld [vmem:[#allocation3 + $0x908] sm:$0xf]  ;;  %v7063_v29 = vor.u32 %v9458_v23, %v7062_v19  ;;  %v9286_v19 = vld [vmem:[#allocation3 + $0x1cc] sm:$0xf] }
  0xde   :  { %3092 = vmatpush.bf16.msra.mxu1 %v7127_v1  ;;  %3118 = vmatpush.bf16.msra.mxu3 %v7639_v8  ;;  %v9522_v25 = vld [vmem:[#allocation3 + $0x924] sm:$0xf0]  ;;  %v6392_v23 = vld [vmem:[#allocation3 + $0x1e8] sm:$0xf0] }
  0xdf   :  { %v7574_v26 = vld [vmem:[#allocation3 + $0xb08] sm:$0xf]  ;;  %v7319_v30 = vor.u32 %v9522_v25, %v7318_v24  ;;  %v9350_v24 = vld [vmem:[#allocation3 + $0x3cc] sm:$0xf] }
  0xe0   :  { %v9586_v27 = vld [vmem:[#allocation3 + $0xb24] sm:$0xf0]  ;;  %3080 = vmatpush.bf16.msra.mxu0 %v6839_v14  ;;  %v6648_v25 = vld [vmem:[#allocation3 + $0x3e8] sm:$0xf0] }
  0xe1   :  { %3106 = vmatpush.bf16.msra.mxu2 %v7351_v16  ;;  %v6774_v31 = vld [vmem:[#allocation3 + $0x4c8] sm:$0xf]  ;;  %v7575_v34 = vor.u32 %v9586_v27, %v7574_v26 }
  0xe2   :  { %3093 = vmatpush.bf16.msra.mxu1 %v7095_v15  ;;  %v9386_v32 = vld [vmem:[#allocation3 + $0x4e4] sm:$0xf0]  ;;  %3119 = vmatpush.bf16.msra.mxu3 %v7607_v20 }
  0xe3   :  { %v7030_v33 = vld [vmem:[#allocation3 + $0x6c8] sm:$0xf]  ;;  %v6775_v43 = vor.u32 %v9386_v32, %v6774_v31  ;;  %v6395_v32 = vor.u32 %v9286_v19, %v6392_v23  ;;  %v9382_v19 = vld [vmem:[#allocation3 + $0x4cc] sm:$0xf] }
  0xe4   :  { %v9450_v35 = vld [vmem:[#allocation3 + $0x6e4] sm:$0xf0]  ;;  %3081 = vmatpush.bf16.msra.mxu0 %v6807_v28  ;;  %v9414_v28 = vld [vmem:[#allocation3 + $0x5cc] sm:$0xf] }
  0xe5   :  { %v7286_v36 = vld [vmem:[#allocation3 + $0x8c8] sm:$0xf]  ;;  %3107 = vmatpush.bf16.msra.mxu2 %v7319_v30  ;;  %v7031_v44 = vor.u32 %v9450_v35, %v7030_v33  ;;  %v6651_v33 = vor.u32 %v9350_v24, %v6648_v25 }
  0xe6   :  { %v9514_v37 = vld [vmem:[#allocation3 + $0x8e4] sm:$0xf0]  ;;  %3094 = vmatpush.bf16.msra.mxu1 %v7063_v29  ;;  %3120 = vmatpush.bf16.msra.mxu3 %v7575_v34  ;;  %v6904_v29 = vld [vmem:[#allocation3 + $0x5e8] sm:$0xf0] }
  0xe7   :  { %v7542_v39 = vld [vmem:[#allocation3 + $0xac8] sm:$0xf]  ;;  %v7287_v45 = vor.u32 %v9514_v37, %v7286_v36  ;;  %v9278_v36 = vld [vmem:[#allocation3 + $0x18c] sm:$0xf]  ;;  %v6907_v37 = vor.u32 %v9414_v28, %v6904_v29 }
  0xe8   :  { %v9578_v40 = vld [vmem:[#allocation3 + $0xae4] sm:$0xf0]  ;;  %3082 = vmatpush.bf16.msra.mxu0 %v6775_v43  ;;  %v6616_v43 = vld [vmem:[#allocation3 + $0x3a8] sm:$0xf0] }
  0xe9   :  { %v6742_v46 = vld [vmem:[#allocation3 + $0x488] sm:$0xf]  ;;  %v7543_v49 = vor.u32 %v9578_v40, %v7542_v39  ;;  %3108 = vmatpush.bf16.msra.mxu2 %v7287_v45  ;;  %v6360_v39 = vld [vmem:[#allocation3 + $0x1a8] sm:$0xf0] }
  0xea   :  { %v9378_v47 = vld [vmem:[#allocation3 + $0x4a4] sm:$0xf0]  ;;  %3095 = vmatpush.bf16.msra.mxu1 %v7031_v44  ;;  %v9342_v40 = vld [vmem:[#allocation3 + $0x38c] sm:$0xf] }
  0xeb   :  { %v6998_v48 = vld [vmem:[#allocation3 + $0x688] sm:$0xf]  ;;  %v6743_v55 = vor.u32 %v9378_v47, %v6742_v46  ;;  %3121 = vmatpush.bf16.msra.mxu3 %v7543_v49  ;;  %v9406_v44 = vld [vmem:[#allocation3 + $0x58c] sm:$0xf]  ;;  %v6363_v47 = vor.u32 %v9278_v36, %v6360_v39 }
  0xec   :  { %v9442_v50 = vld [vmem:[#allocation3 + $0x6a4] sm:$0xf0]  ;;  %v6872_v45 = vld [vmem:[#allocation3 + $0x5a8] sm:$0xf0] }
  0xed   :  { %v7254_v51 = vld [vmem:[#allocation3 + $0x888] sm:$0xf]  ;;  %v6999_v56 = vor.u32 %v9442_v50, %v6998_v48  ;;  %3083 = vmatpush.bf16.msra.mxu0 %v6743_v55  ;;  %v6619_v48 = vor.u32 %v9342_v40, %v6616_v43  ;;  %v6584_v55 = vld [vmem:[#allocation3 + $0x368] sm:$0xf0] }
  0xee   :  { %v9506_v52 = vld [vmem:[#allocation3 + $0x8a4] sm:$0xf0]  ;;  %v9246_v29 = vld [vmem:[#allocation3 + $0x8c] sm:$0xf] }
  0xef   :  { %v7510_v53 = vld [vmem:[#allocation3 + $0xa88] sm:$0xf]  ;;  %v7255_v57 = vor.u32 %v9506_v52, %v7254_v51  ;;  %3096 = vmatpush.bf16.msra.mxu1 %v6999_v56  ;;  %v9270_v51 = vld [vmem:[#allocation3 + $0x14c] sm:$0xf]  ;;  %v6875_v52 = vor.u32 %v9406_v44, %v6872_v45 }
  0xf0   :  { %v9570_v54 = vld [vmem:[#allocation3 + $0xaa4] sm:$0xf0]  ;;  %v9398_v56 = vld [vmem:[#allocation3 + $0x54c] sm:$0xf] }
  0xf1   :  { %v6710_v58 = vld [vmem:[#allocation3 + $0x448] sm:$0xf]  ;;  %v7511_v61 = vor.u32 %v9570_v54, %v7510_v53  ;;  %3109 = vmatpush.bf16.msra.mxu2 %v7255_v57  ;;  %v6328_v53 = vld [vmem:[#allocation3 + $0x168] sm:$0xf0] }
  0xf2   :  { %v9370_v59 = vld [vmem:[#allocation3 + $0x464] sm:$0xf0]  ;;  %v9334_v54 = vld [vmem:[#allocation3 + $0x34c] sm:$0xf] }
  0xf3   :  { %v6966_v60 = vld [vmem:[#allocation3 + $0x648] sm:$0xf]  ;;  %v6711_v3 = vor.u32 %v9370_v59, %v6710_v58  ;;  %3122 = vmatpush.bf16.msra.mxu3 %v7511_v61  ;;  %v6840_v57 = vld [vmem:[#allocation3 + $0x568] sm:$0xf0]  ;;  %v6331_v59 = vor.u32 %v9270_v51, %v6328_v53 }
  0xf4   :  { %v9434_v62 = vld [vmem:[#allocation3 + $0x664] sm:$0xf0]  ;;  %v9302_v51 = vld [vmem:[#allocation3 + $0x24c] sm:$0xf] }
  0xf5   :  { %v7222_v63 = vld [vmem:[#allocation3 + $0x848] sm:$0xf]  ;;  %v6967_v8 = vor.u32 %v9434_v62, %v6966_v60  ;;  %3084 = vmatpush.bf16.msra.mxu0 %v6711_v3  ;;  %v6587_v60 = vor.u32 %v9334_v54, %v6584_v55  ;;  %v6552_v3 = vld [vmem:[#allocation3 + $0x328] sm:$0xf0]  ;;  %v2918_v54 = vpop.f32.mrf.mxu3 }
  0xf6   :  { %v9498_v0 = vld [vmem:[#allocation3 + $0x864] sm:$0xf0]  ;;  %v2879_v36 = vpop.f32.mrf.mxu0  ;;  %v2892_v40 = vpop.f32.mrf.mxu1  ;;  %v9366_v55 = vld [vmem:[#allocation3 + $0x44c] sm:$0xf] }
  0xf7   :  { %v7478_v1 = vld [vmem:[#allocation3 + $0xa48] sm:$0xf]  ;;  %v7223_v9 = vor.u32 %v9498_v0, %v7222_v63  ;;  %3097 = vmatpush.bf16.msra.mxu1 %v6967_v8  ;;  %v9262_v63 = vld [vmem:[#allocation3 + $0x10c] sm:$0xf]  ;;  %v6843_v0 = vor.u32 %v9398_v56, %v6840_v57 }
  0xf8   :  { %v9562_v2 = vld [vmem:[#allocation3 + $0xa64] sm:$0xf0]  ;;  %v6712_v56 = vld [vmem:[#allocation3 + $0x468] sm:$0xf0] }
  0xf9   :  { %v6678_v4 = vld [vmem:[#allocation3 + $0x408] sm:$0xf]  ;;  %v7479_v13 = vor.u32 %v9562_v2, %v7478_v1  ;;  %3110 = vmatpush.bf16.msra.mxu2 %v7223_v9  ;;  %v6296_v1 = vld [vmem:[#allocation3 + $0x128] sm:$0xf0] }
  0xfa   :  { %v9362_v6 = vld [vmem:[#allocation3 + $0x424] sm:$0xf0]  ;;  %v9326_v2 = vld [vmem:[#allocation3 + $0x30c] sm:$0xf] }
  0xfb   :  { %v6934_v10 = vld [vmem:[#allocation3 + $0x608] sm:$0xf]  ;;  %v6679_v20 = vor.u32 %v9362_v6, %v6678_v4  ;;  %3123 = vmatpush.bf16.msra.mxu3 %v7479_v13  ;;  %v9390_v4 = vld [vmem:[#allocation3 + $0x50c] sm:$0xf] }
  0xfc   :  { %v9426_v11 = vld [vmem:[#allocation3 + $0x624] sm:$0xf0]  ;;  %v6808_v6 = vld [vmem:[#allocation3 + $0x528] sm:$0xf0] }
  0xfd   :  { %v7190_v12 = vld [vmem:[#allocation3 + $0x808] sm:$0xf]  ;;  %v6935_v26 = vor.u32 %v9426_v11, %v6934_v10  ;;  %3085 = vmatpush.bf16.msra.mxu0 %v6679_v20  ;;  %v6299_v10 = vor.u32 %v9262_v63, %v6296_v1  ;;  %v6555_v11 = vor.u32 %v9326_v2, %v6552_v3  ;;  %v9254_v13 = vld [vmem:[#allocation3 + $0xcc] sm:$0xf]  ;;  %v6715_v2 = vor.u32 %v9366_v55, %v6712_v56 }
  0xfe   :  { %v9490_v14 = vld [vmem:[#allocation3 + $0x824] sm:$0xf0]  ;;  %v6776_v20 = vld [vmem:[#allocation3 + $0x4e8] sm:$0xf0] }
  0xff   :  { %v7446_v15 = vld [vmem:[#allocation3 + $0xa08] sm:$0xf]  ;;  %v7191_v27 = vor.u32 %v9490_v14, %v7190_v12  ;;  %3098 = vmatpush.bf16.msra.mxu1 %v6935_v26  ;;  %v10327_v14 = vld [vmem:[#allocation5] sm:$0xff]  ;;  %v9230_v63 = vld [vmem:[#allocation3 + $0xc] sm:$0xf] }
 0x100   :  { %v9554_v16 = vld [vmem:[#allocation3 + $0xa24] sm:$0xf0]  ;;  %3086 = vmatmul.bf16.vlgmr.msra.gmra.mxu0 %v10284_v5  ;;  %v589_v24 = vperm.slane %v10327_v14, 0  ;;  %v9294_v1 = vld [vmem:[#allocation3 + $0x20c] sm:$0xf] }
 0x101   :  { %v7926_v17 = vld [vmem:[#allocation3 + $0xdc8] sm:$0xf]  ;;  %v7447_v30 = vor.u32 %v9554_v16, %v7446_v15  ;;  %3111 = vmatpush.bf16.msra.mxu2 %v7191_v27  ;;  %v6811_v15 = vor.u32 %v9390_v4, %v6808_v6  ;;  %v6264_v16 = vld [vmem:[#allocation3 + $0xe8] sm:$0xf0] }
 0x102   :  { %v9674_v18 = vld [vmem:[#allocation3 + $0xde4] sm:$0xf0]  ;;  %3099 = vmatmul.bf16.vlgmr.msra.gmra.mxu1 %v10289_v7  ;;  %v6267_v25 = vor.u32 %v9254_v13, %v6264_v16  ;;  %v2880_v39 = vadd.f32 %v2879_v36, %v589_v24  ;;  %v6424_v3 = vld [vmem:[#allocation3 + $0x228] sm:$0xf0] }
 0x103   :  { %v7927_v31 = vor.u32 %v9674_v18, %v7926_v17  ;;  %v7894_v34 = vld [vmem:[#allocation3 + $0xd88] sm:$0xf]  ;;  %3124 = vmatpush.bf16.msra.mxu3 %v7447_v30  ;;  %3143 = vmatpush.bf16.msrb.mxu1 %v6395_v32  ;;  %v9318_v17 = vld [vmem:[#allocation3 + $0x2cc] sm:$0xf]  ;;  %v6779_v30 = vor.u32 %v9382_v19, %v6776_v20  ;;  %v6427_v20 = vor.u32 %v9294_v1, %v6424_v3 }
 0x104   :  { %v9666_v35 = vld [vmem:[#allocation3 + $0xda4] sm:$0xf0]  ;;  %3112 = vmatmul.bf16.vlgmr.msra.gmra.mxu2 %v10307_v41  ;;  %v6520_v18 = vld [vmem:[#allocation3 + $0x2e8] sm:$0xf0]  ;;  %v2893_v53 = vadd.f32 %v2892_v40, %v2880_v39 }
 0x105   :  { %3130 = vmatpush.bf16.msrb.mxu0 %v7927_v31  ;;  %v7895_v46 = vor.u32 %v9666_v35, %v7894_v34  ;;  %3156 = vmatpush.bf16.msrb.mxu2 %v6651_v33  ;;  %v7862_v49 = vld [vmem:[#allocation3 + $0xd48] sm:$0xf]  ;;  %v6523_v26 = vor.u32 %v9318_v17, %v6520_v18  ;;  %v6232_v31 = vld [vmem:[#allocation3 + $0xa8] sm:$0xf0]  ;;  %v2894_v18 = vpop.f32.mrf.mxu1 }
 0x106   :  { %v9658_v50 = vld [vmem:[#allocation3 + $0xd64] sm:$0xf0]  ;;  %3125 = vmatmul.bf16.vlgmr.msra.gmra.mxu3 %v10309_v42  ;;  %v9310_v32 = vld [vmem:[#allocation3 + $0x28c] sm:$0xf]  ;;  %v6235_v43 = vor.u32 %v9246_v29, %v6232_v31 }
 0x107   :  { %3169 = vmatpush.bf16.msrb.mxu3 %v6907_v37  ;;  %v7863_v58 = vor.u32 %v9658_v50, %v7862_v49  ;;  %3144 = vmatpush.bf16.msrb.mxu1 %v6363_v47  ;;  %v7830_v61 = vld [vmem:[#allocation3 + $0xd08] sm:$0xf]  ;;  %v6488_v33 = vld [vmem:[#allocation3 + $0x2a8] sm:$0xf0] }
 0x108   :  { %v9650_v62 = vld [vmem:[#allocation3 + $0xd24] sm:$0xf0]  ;;  %v9374_v34 = vld [vmem:[#allocation3 + $0x48c] sm:$0xf]  ;;  %v6491_v44 = vor.u32 %v9310_v32, %v6488_v33 }
 0x109   :  { %3131 = vmatpush.bf16.msrb.mxu0 %v7895_v46  ;;  %3157 = vmatpush.bf16.msrb.mxu2 %v6619_v48  ;;  %v7831_v8 = vor.u32 %v9650_v62, %v7830_v61  ;;  %v7798_v9 = vld [vmem:[#allocation3 + $0xcc8] sm:$0xf]  ;;  %v6744_v35 = vld [vmem:[#allocation3 + $0x4a8] sm:$0xf0]  ;;  %v2905_v48 = vpop.f32.mrf.mxu2 }
 0x10a   :  { %v9642_v12 = vld [vmem:[#allocation3 + $0xce4] sm:$0xf0]  ;;  %v9238_v47 = vld [vmem:[#allocation3 + $0x4c] sm:$0xf]  ;;  %v6747_v49 = vor.u32 %v9374_v34, %v6744_v35 }
 0x10b   :  { %3170 = vmatpush.bf16.msrb.mxu3 %v6875_v52  ;;  %3145 = vmatpush.bf16.msrb.mxu1 %v6331_v59  ;;  %v7799_v23 = vor.u32 %v9642_v12, %v7798_v9  ;;  %v7766_v27 = vld [vmem:[#allocation3 + $0xc88] sm:$0xf]  ;;  %v6200_v50 = vld [vmem:[#allocation3 + $0x68] sm:$0xf0]  ;;  %v2881_v12 = vpop.f32.mrf.mxu0 }
 0x10c   :  { %v9634_v28 = vld [vmem:[#allocation3 + $0xca4] sm:$0xf0]  ;;  %v6456_v52 = vld [vmem:[#allocation3 + $0x268] sm:$0xf0]  ;;  %v6203_v61 = vor.u32 %v9238_v47, %v6200_v50 }
 0x10d   :  { %3132 = vmatpush.bf16.msrb.mxu0 %v7863_v58  ;;  %3158 = vmatpush.bf16.msrb.mxu2 %v6587_v60  ;;  %v7767_v37 = vor.u32 %v9634_v28, %v7766_v27  ;;  %v7734_v45 = vld [vmem:[#allocation3 + $0xc48] sm:$0xf]  ;;  %v2906_v60 = vadd.f32 %v2905_v48, %v2893_v53  ;;  %v6459_v62 = vor.u32 %v9302_v51, %v6456_v52  ;;  %v9358_v4 = vld [vmem:[#allocation3 + $0x40c] sm:$0xf]  ;;  %v2920_v28 = vpop.f32.mrf.mxu3 }
 0x10e   :  { %v9626_v46 = vld [vmem:[#allocation3 + $0xc64] sm:$0xf0]  ;;  %v6680_v6 = vld [vmem:[#allocation3 + $0x428] sm:$0xf0] }
 0x10f   :  { %3171 = vmatpush.bf16.msrb.mxu3 %v6843_v0  ;;  %3146 = vmatpush.bf16.msrb.mxu1 %v6299_v10  ;;  %v7735_v57 = vor.u32 %v9626_v46, %v7734_v45  ;;  %v7702_v58 = vld [vmem:[#allocation3 + $0xc08] sm:$0xf]  ;;  %v6168_v0 = vld [vmem:[#allocation3 + $0x28] sm:$0xf0] }
 0x110   :  { %v9618_v59 = vld [vmem:[#allocation3 + $0xc24] sm:$0xf0]  ;;  %v9478_v9 = vld [vmem:[#allocation3 + $0x7cc] sm:$0xf]  ;;  %v6171_v19 = vor.u32 %v9230_v63, %v6168_v0 }
 0x111   :  { %3133 = vmatpush.bf16.msrb.mxu0 %v7831_v8  ;;  %3159 = vmatpush.bf16.msrb.mxu2 %v6555_v11  ;;  %v10330_v8 = vadd.f32 %v2918_v54, %v2906_v60  ;;  %v7160_v10 = vld [vmem:[#allocation3 + $0x7e8] sm:$0xf0]  ;;  %v7703_v13 = vor.u32 %v9618_v59, %v7702_v58 }
 0x112   :  { %v9542_v11 = vld [vmem:[#allocation3 + $0x9cc] sm:$0xf]  ;;  %v7163_v27 = vor.u32 %v9478_v9, %v7160_v10 }
 0x113   :  { %3172 = vmatpush.bf16.msrb.mxu3 %v6811_v15  ;;  %3147 = vmatpush.bf16.msrb.mxu1 %v6267_v25  ;;  %v7416_v15 = vld [vmem:[#allocation3 + $0x9e8] sm:$0xf0]  ;;  %v2907_v25 = vpop.f32.mrf.mxu2 }
 0x114   :  { %v9606_v16 = vld [vmem:[#allocation3 + $0xbcc] sm:$0xf]  ;;  %v7419_v29 = vor.u32 %v9542_v11, %v7416_v15 }
 0x115   :  { %3134 = vmatpush.bf16.msrb.mxu0 %v7799_v23  ;;  %3160 = vmatpush.bf16.msrb.mxu2 %v6523_v26  ;;  %v7672_v17 = vld [vmem:[#allocation3 + $0xbe8] sm:$0xf0]  ;;  %v6683_v26 = vor.u32 %v9358_v4, %v6680_v6  ;;  %v2931_v4 = vpop.f32.mrf.mxu0  ;;  %v2944_v6 = vpop.f32.mrf.mxu1 }
 0x116   :  { %v9670_v23 = vld [vmem:[#allocation3 + $0xdcc] sm:$0xf]  ;;  %v2932_v15 = vadd.f32 %v2931_v4, %v10330_v8 }
 0x117   :  { %3173 = vmatpush.bf16.msrb.mxu3 %v6779_v30  ;;  %3148 = vmatpush.bf16.msrb.mxu1 %v6235_v43  ;;  %v7928_v24 = vld [vmem:[#allocation3 + $0xde8] sm:$0xf0]  ;;  %v7675_v30 = vor.u32 %v9606_v16, %v7672_v17 }
 0x118   :  { %v9470_v31 = vld [vmem:[#allocation3 + $0x78c] sm:$0xf]  ;;  %v7931_v34 = vor.u32 %v9670_v23, %v7928_v24  ;;  %v2945_v24 = vadd.f32 %v2944_v6, %v2932_v15  ;;  %v6398_v6 = vld [vmem:[#allocation3 + $0x1d0] sm:$0xf] }
 0x119   :  { %3135 = vmatpush.bf16.msrb.mxu0 %v7767_v37  ;;  %3161 = vmatpush.bf16.msrb.mxu2 %v6491_v44  ;;  %v7128_v32 = vld [vmem:[#allocation3 + $0x7a8] sm:$0xf0]  ;;  %v6910_v15 = vld [vmem:[#allocation3 + $0x5d0] sm:$0xf] }
 0x11a   :  { %v9534_v33 = vld [vmem:[#allocation3 + $0x98c] sm:$0xf]  ;;  %v7131_v43 = vor.u32 %v9470_v31, %v7128_v32 }
 0x11b   :  { %3174 = vmatpush.bf16.msrb.mxu3 %v6747_v49  ;;  %3149 = vmatpush.bf16.msrb.mxu1 %v6203_v61  ;;  %v7384_v35 = vld [vmem:[#allocation3 + $0x9a8] sm:$0xf0]  ;;  %v2957_v31 = vpop.f32.mrf.mxu2 }
 0x11c   :  { %v9598_v36 = vld [vmem:[#allocation3 + $0xb8c] sm:$0xf]  ;;  %v7387_v44 = vor.u32 %v9534_v33, %v7384_v35  ;;  %v10337_v35 = vadd.f32 %v2957_v31, %v2945_v24  ;;  %v9347_v31 = vld [vmem:[#allocation3 + $0x3ac] sm:$0xf0] }
 0x11d   :  { %3136 = vmatpush.bf16.msrb.mxu0 %v7735_v57  ;;  %3162 = vmatpush.bf16.msrb.mxu2 %v6459_v62  ;;  %v7640_v37 = vld [vmem:[#allocation3 + $0xba8] sm:$0xf0] }
 0x11e   :  { %v9662_v39 = vld [vmem:[#allocation3 + $0xd8c] sm:$0xf]  ;;  %v7643_v45 = vor.u32 %v9598_v36, %v7640_v37  ;;  %vm3598_vm0 = vcmp.gt.f32.partialorder %v10337_v35, 0.0 }
 0x11f   :  { %3175 = vmatpush.bf16.msrb.mxu3 %v6715_v2  ;;  %3150 = vmatpush.bf16.msrb.mxu1 %v6171_v19  ;;  %v7896_v40 = vld [vmem:[#allocation3 + $0xda8] sm:$0xf0] }
 0x120   :  { %v9462_v46 = vld [vmem:[#allocation3 + $0x74c] sm:$0xf]  ;;  %v7899_v49 = vor.u32 %v9662_v39, %v7896_v40  ;;  %v10339_v39 = vpop.f32.mrf.mxu3 }
 0x121   :  { %3137 = vmatpush.bf16.msrb.mxu0 %v7703_v13  ;;  %3163 = vmatpush.bf16.msrb.mxu2 %v6427_v20  ;;  %v7096_v47 = vld [vmem:[#allocation3 + $0x768] sm:$0xf0] }
 0x122   :  { %v9526_v48 = vld [vmem:[#allocation3 + $0x94c] sm:$0xf]  ;;  %v7099_v55 = vor.u32 %v9462_v46, %v7096_v47  ;;  %3151 = vmatmul.bf16.vlgmr.msrb.gmra.mxu1 %v10292_v21 }
 0x123   :  { %3176 = vmatpush.bf16.msrb.mxu3 %v6683_v26  ;;  %3195 = vmatpush.bf16.msra.mxu1 %v7419_v29  ;;  %v7352_v50 = vld [vmem:[#allocation3 + $0x968] sm:$0xf0] }
 0x124   :  { %3138 = vmatmul.bf16.vlgmr.msrb.gmra.mxu0 %v10305_v38  ;;  %v9590_v51 = vld [vmem:[#allocation3 + $0xb4c] sm:$0xf]  ;;  %3164 = vmatmul.bf16.vlgmr.msrb.gmra.mxu2 %v10294_v22  ;;  %v7355_v56 = vor.u32 %v9526_v48, %v7352_v50 }
 0x125   :  { %3182 = vmatpush.bf16.msra.mxu0 %v7163_v27  ;;  %3208 = vmatpush.bf16.msra.mxu2 %v7675_v30  ;;  %v7608_v52 = vld [vmem:[#allocation3 + $0xb68] sm:$0xf0] }
 0x126   :  { %v9654_v53 = vld [vmem:[#allocation3 + $0xd4c] sm:$0xf]  ;;  %3177 = vmatmul.bf16.vlgmr.msrb.gmra.mxu3 %v10284_v5  ;;  %v7611_v57 = vor.u32 %v9590_v51, %v7608_v52 }
 0x127   :  { %3221 = vmatpush.bf16.msra.mxu3 %v7931_v34  ;;  %v7864_v54 = vld [vmem:[#allocation3 + $0xd68] sm:$0xf0]  ;;  %3196 = vmatpush.bf16.msra.mxu1 %v7387_v44  ;;  %v2946_v44 = vpop.f32.mrf.mxu1 }
 0x128   :  { %v9454_v58 = vld [vmem:[#allocation3 + $0x70c] sm:$0xf]  ;;  %v7867_v61 = vor.u32 %v9654_v53, %v7864_v54  ;;  %v9275_v44 = vld [vmem:[#allocation3 + $0x16c] sm:$0xf0] }
 0x129   :  { %3183 = vmatpush.bf16.msra.mxu0 %v7131_v43  ;;  %3209 = vmatpush.bf16.msra.mxu2 %v7643_v45  ;;  %v7064_v59 = vld [vmem:[#allocation3 + $0x728] sm:$0xf0]  ;;  %v2933_v43 = vpop.f32.mrf.mxu0 }
 0x12a   :  { %v9518_v60 = vld [vmem:[#allocation3 + $0x90c] sm:$0xf]  ;;  %v7067_v3 = vor.u32 %v9454_v58, %v7064_v59 }
 0x12b   :  { %3222 = vmatpush.bf16.msra.mxu3 %v7899_v49  ;;  %v7320_v62 = vld [vmem:[#allocation3 + $0x928] sm:$0xf0]  ;;  %3197 = vmatpush.bf16.msra.mxu1 %v7355_v56 }
 0x12c   :  { %v9582_v63 = vld [vmem:[#allocation3 + $0xb0c] sm:$0xf]  ;;  %v7323_v9 = vor.u32 %v9518_v60, %v7320_v62 }
 0x12d   :  { %v7576_v0 = vld [vmem:[#allocation3 + $0xb28] sm:$0xf0]  ;;  %3184 = vmatpush.bf16.msra.mxu0 %v7099_v55  ;;  %3210 = vmatpush.bf16.msra.mxu2 %v7611_v57 }
 0x12e   :  { %v9646_v1 = vld [vmem:[#allocation3 + $0xd0c] sm:$0xf]  ;;  %v7579_v10 = vor.u32 %v9582_v63, %v7576_v0  ;;  %v2959_v0 = vpop.f32.mrf.mxu2 }
 0x12f   :  { %v7832_v2 = vld [vmem:[#allocation3 + $0xd28] sm:$0xf0]  ;;  %3223 = vmatpush.bf16.msra.mxu3 %v7867_v61  ;;  %3198 = vmatpush.bf16.msra.mxu1 %v7323_v9  ;;  %v9291_v9 = vld [vmem:[#allocation3 + $0x1ec] sm:$0xf0] }
 0x130   :  { %v9446_v11 = vld [vmem:[#allocation3 + $0x6cc] sm:$0xf]  ;;  %v7835_v16 = vor.u32 %v9646_v1, %v7832_v2  ;;  %v6399_v24 = vor.u32 %v9291_v9, %v6398_v6  ;;  %v7070_v0 = vld [vmem:[#allocation3 + $0x710] sm:$0xf] }
 0x131   :  { %v7032_v12 = vld [vmem:[#allocation3 + $0x6e8] sm:$0xf0]  ;;  %3185 = vmatpush.bf16.msra.mxu0 %v7067_v3  ;;  %3211 = vmatpush.bf16.msra.mxu2 %v7579_v10  ;;  %v6654_v10 = vld [vmem:[#allocation3 + $0x3d0] sm:$0xf] }
 0x132   :  { %v9510_v13 = vld [vmem:[#allocation3 + $0x8cc] sm:$0xf]  ;;  %v7035_v25 = vor.u32 %v9446_v11, %v7032_v12  ;;  %v2972_v11 = vpop.f32.mrf.mxu3  ;;  %v6270_v9 = vld [vmem:[#allocation3 + $0xd0] sm:$0xf] }
 0x133   :  { %v7288_v17 = vld [vmem:[#allocation3 + $0x8e8] sm:$0xf0]  ;;  %3224 = vmatpush.bf16.msra.mxu3 %v7835_v16  ;;  %v9419_v16 = vld [vmem:[#allocation3 + $0x5ec] sm:$0xf0] }
 0x134   :  { %v9574_v18 = vld [vmem:[#allocation3 + $0xacc] sm:$0xf]  ;;  %v7291_v26 = vor.u32 %v9510_v13, %v7288_v17  ;;  %v9355_v13 = vld [vmem:[#allocation3 + $0x3ec] sm:$0xf0] }
 0x135   :  { %v7544_v19 = vld [vmem:[#allocation3 + $0xae8] sm:$0xf0]  ;;  %3186 = vmatpush.bf16.msra.mxu0 %v7035_v25  ;;  %v6655_v25 = vor.u32 %v9355_v13, %v6654_v10  ;;  %v9259_v10 = vld [vmem:[#allocation3 + $0xec] sm:$0xf0] }
 0x136   :  { %v9638_v20 = vld [vmem:[#allocation3 + $0xccc] sm:$0xf]  ;;  %v7547_v27 = vor.u32 %v9574_v18, %v7544_v19  ;;  %3199 = vmatpush.bf16.msra.mxu1 %v7291_v26  ;;  %v7166_v19 = vld [vmem:[#allocation3 + $0x7d0] sm:$0xf]  ;;  %v6911_v26 = vor.u32 %v9419_v16, %v6910_v15 }
 0x137   :  { %v7800_v23 = vld [vmem:[#allocation3 + $0xce8] sm:$0xf0]  ;;  %v9323_v15 = vld [vmem:[#allocation3 + $0x2ec] sm:$0xf0] }
 0x138   :  { %v9438_v28 = vld [vmem:[#allocation3 + $0x68c] sm:$0xf]  ;;  %v7803_v8 = vor.u32 %v9638_v20, %v7800_v23  ;;  %3212 = vmatpush.bf16.msra.mxu2 %v7547_v27  ;;  %v9483_v20 = vld [vmem:[#allocation3 + $0x7ec] sm:$0xf0] }
 0x139   :  { %v7000_v29 = vld [vmem:[#allocation3 + $0x6a8] sm:$0xf0]  ;;  %v6366_v27 = vld [vmem:[#allocation3 + $0x190] sm:$0xf] }
 0x13a   :  { %v9502_v30 = vld [vmem:[#allocation3 + $0x88c] sm:$0xf]  ;;  %v7003_v40 = vor.u32 %v9438_v28, %v7000_v29  ;;  %3225 = vmatpush.bf16.msra.mxu3 %v7803_v8  ;;  %v9283_v28 = vld [vmem:[#allocation3 + $0x1ac] sm:$0xf0] }
 0x13b   :  { %v7256_v32 = vld [vmem:[#allocation3 + $0x8a8] sm:$0xf0]  ;;  %v6622_v29 = vld [vmem:[#allocation3 + $0x390] sm:$0xf] }
 0x13c   :  { %v9566_v33 = vld [vmem:[#allocation3 + $0xa8c] sm:$0xf]  ;;  %v7259_v45 = vor.u32 %v9502_v30, %v7256_v32  ;;  %3187 = vmatpush.bf16.msra.mxu0 %v7003_v40  ;;  %v7167_v30 = vor.u32 %v9483_v20, %v7166_v19  ;;  %v6878_v8 = vld [vmem:[#allocation3 + $0x590] sm:$0xf]  ;;  %v6623_v40 = vor.u32 %v9347_v31, %v6622_v29  ;;  %v3009_v29 = vpop.f32.mrf.mxu2 }
 0x13d   :  { %v7512_v34 = vld [vmem:[#allocation3 + $0xaa8] sm:$0xf0]  ;;  %v9411_v32 = vld [vmem:[#allocation3 + $0x5ac] sm:$0xf0] }
 0x13e   :  { %v9630_v36 = vld [vmem:[#allocation3 + $0xc8c] sm:$0xf]  ;;  %v7515_v46 = vor.u32 %v9566_v33, %v7512_v34  ;;  %3200 = vmatpush.bf16.msra.mxu1 %v7259_v45  ;;  %v7134_v33 = vld [vmem:[#allocation3 + $0x790] sm:$0xf]  ;;  %v6879_v43 = vor.u32 %v9411_v32, %v6878_v8 }
 0x13f   :  { %v7768_v37 = vld [vmem:[#allocation3 + $0xca8] sm:$0xf0]  ;;  %v9475_v34 = vld [vmem:[#allocation3 + $0x7ac] sm:$0xf0] }
 0x140   :  { %v9430_v47 = vld [vmem:[#allocation3 + $0x64c] sm:$0xf]  ;;  %v7771_v50 = vor.u32 %v9630_v36, %v7768_v37  ;;  %3213 = vmatpush.bf16.msra.mxu2 %v7515_v46  ;;  %v6367_v36 = vor.u32 %v9283_v28, %v6366_v27  ;;  %v6334_v37 = vld [vmem:[#allocation3 + $0x150] sm:$0xf]  ;;  %v590_v46 = vperm.slane %v10327_v14, 1 }
 0x141   :  { %v6968_v48 = vld [vmem:[#allocation3 + $0x668] sm:$0xf0]  ;;  %v6590_v45 = vld [vmem:[#allocation3 + $0x350] sm:$0xf] }
 0x142   :  { %v9494_v49 = vld [vmem:[#allocation3 + $0x84c] sm:$0xf]  ;;  %v6971_v56 = vor.u32 %v9430_v47, %v6968_v48  ;;  %3226 = vmatpush.bf16.msra.mxu3 %v7771_v50  ;;  %v7135_v47 = vor.u32 %v9475_v34, %v7134_v33  ;;  %v9339_v48 = vld [vmem:[#allocation3 + $0x36c] sm:$0xf0]  ;;  %v3022_v34 = vpop.f32.mrf.mxu3 }
 0x143   :  { %v7224_v51 = vld [vmem:[#allocation3 + $0x868] sm:$0xf0]  ;;  %v9403_v50 = vld [vmem:[#allocation3 + $0x56c] sm:$0xf0] }
 0x144   :  { %v9558_v52 = vld [vmem:[#allocation3 + $0xa4c] sm:$0xf]  ;;  %v7227_v59 = vor.u32 %v9494_v49, %v7224_v51  ;;  %3188 = vmatpush.bf16.msra.mxu0 %v6971_v56  ;;  %v6846_v49 = vld [vmem:[#allocation3 + $0x550] sm:$0xf]  ;;  %v2971_v56 = vadd.f32 %v10339_v39, %v590_v46 }
 0x145   :  { %v7480_v53 = vld [vmem:[#allocation3 + $0xa68] sm:$0xf0]  ;;  %v7102_v51 = vld [vmem:[#allocation3 + $0x750] sm:$0xf] }
 0x146   :  { %v9622_v54 = vld [vmem:[#allocation3 + $0xc4c] sm:$0xf]  ;;  %v7483_v60 = vor.u32 %v9558_v52, %v7480_v53  ;;  %3201 = vmatpush.bf16.msra.mxu1 %v7227_v59  ;;  %v9467_v52 = vld [vmem:[#allocation3 + $0x76c] sm:$0xf0]  ;;  %v6335_v53 = vor.u32 %v9275_v44, %v6334_v37 }
 0x147   :  { %v7736_v55 = vld [vmem:[#allocation3 + $0xc68] sm:$0xf0]  ;;  %v6558_v59 = vld [vmem:[#allocation3 + $0x310] sm:$0xf] }
 0x148   :  { %v9422_v57 = vld [vmem:[#allocation3 + $0x60c] sm:$0xf]  ;;  %v7739_v1 = vor.u32 %v9622_v54, %v7736_v55  ;;  %3214 = vmatpush.bf16.msra.mxu2 %v7483_v60  ;;  %v6591_v54 = vor.u32 %v9339_v48, %v6590_v45  ;;  %v6847_v55 = vor.u32 %v9403_v50, %v6846_v49  ;;  %v7103_v60 = vor.u32 %v9467_v52, %v7102_v51  ;;  %v6526_v39 = vld [vmem:[#allocation3 + $0x2d0] sm:$0xf] }
 0x149   :  { %v6936_v58 = vld [vmem:[#allocation3 + $0x628] sm:$0xf0]  ;;  %v6782_v16 = vld [vmem:[#allocation3 + $0x4d0] sm:$0xf] }
 0x14a   :  { %v9486_v61 = vld [vmem:[#allocation3 + $0x80c] sm:$0xf]  ;;  %v6939_v12 = vor.u32 %v9422_v57, %v6936_v58  ;;  %3227 = vmatpush.bf16.msra.mxu3 %v7739_v1  ;;  %v6302_v57 = vld [vmem:[#allocation3 + $0x110] sm:$0xf] }
 0x14b   :  { %v7192_v62 = vld [vmem:[#allocation3 + $0x828] sm:$0xf0]  ;;  %v9267_v58 = vld [vmem:[#allocation3 + $0x12c] sm:$0xf0] }
 0x14c   :  { %v9550_v63 = vld [vmem:[#allocation3 + $0xa0c] sm:$0xf]  ;;  %v7195_v17 = vor.u32 %v9486_v61, %v7192_v62  ;;  %3189 = vmatpush.bf16.msra.mxu0 %v6939_v12  ;;  %v9331_v61 = vld [vmem:[#allocation3 + $0x32c] sm:$0xf0]  ;;  %v2996_v12 = vpop.f32.mrf.mxu1 }
 0x14d   :  { %v7448_v2 = vld [vmem:[#allocation3 + $0xa28] sm:$0xf0]  ;;  %v6814_v62 = vld [vmem:[#allocation3 + $0x510] sm:$0xf] }
 0x14e   :  { %v9614_v3 = vld [vmem:[#allocation3 + $0xc0c] sm:$0xf]  ;;  %v7451_v18 = vor.u32 %v9550_v63, %v7448_v2  ;;  %3202 = vmatpush.bf16.msra.mxu1 %v7195_v17  ;;  %v9395_v63 = vld [vmem:[#allocation3 + $0x52c] sm:$0xf0]  ;;  %v6303_v2 = vor.u32 %v9267_v58, %v6302_v57 }
 0x14f   :  { %v7704_v4 = vld [vmem:[#allocation3 + $0xc28] sm:$0xf0]  ;;  %3190 = vmatmul.bf16.vlgmr.msra.gmra.mxu0 %v10289_v7  ;;  %v9459_v1 = vld [vmem:[#allocation3 + $0x72c] sm:$0xf0]  ;;  %v6815_v6 = vor.u32 %v9395_v63, %v6814_v62 }
 0x150   :  { %v7707_v23 = vor.u32 %v9614_v3, %v7704_v4  ;;  %3215 = vmatpush.bf16.msra.mxu2 %v7451_v18  ;;  %3234 = vmatpush.bf16.msrb.mxu0 %v6399_v24  ;;  %v2983_v3 = vpop.f32.mrf.mxu0  ;;  %v6559_v4 = vor.u32 %v9331_v61, %v6558_v59  ;;  %v7071_v13 = vor.u32 %v9459_v1, %v7070_v0  ;;  %v9387_v17 = vld [vmem:[#allocation3 + $0x4ec] sm:$0xf0]  ;;  %v3011_v1 = vpop.f32.mrf.mxu2 }
 0x151   :  { %3203 = vmatmul.bf16.vlgmr.msra.gmra.mxu1 %v10307_v41  ;;  %v2984_v11 = vadd.f32 %v2983_v3, %v2971_v56  ;;  %v7038_v18 = vld [vmem:[#allocation3 + $0x6d0] sm:$0xf]  ;;  %v6527_v24 = vor.u32 %v9323_v15, %v6526_v39  ;;  %v6304_v1 = vld [vmem:[#allocation3 + $0x130] sm:$0xf0] }
 0x152   :  { %3228 = vmatpush.bf16.msra.mxu3 %v7707_v23  ;;  %3247 = vmatpush.bf16.msrb.mxu1 %v6655_v25  ;;  %v9451_v19 = vld [vmem:[#allocation3 + $0x6ec] sm:$0xf0]  ;;  %v6271_v23 = vor.u32 %v9259_v10, %v6270_v9  ;;  %v6783_v25 = vor.u32 %v9387_v17, %v6782_v16  ;;  %v3024_v9 = vpop.f32.mrf.mxu3 }
 0x153   :  { %3216 = vmatmul.bf16.vlgmr.msra.gmra.mxu2 %v10309_v42  ;;  %v2997_v20 = vadd.f32 %v2996_v12, %v2984_v11  ;;  %v9251_v27 = vld [vmem:[#allocation3 + $0xac] sm:$0xf0] }
 0x154   :  { %3260 = vmatpush.bf16.msrb.mxu2 %v6911_v26  ;;  %3235 = vmatpush.bf16.msrb.mxu0 %v6367_v36  ;;  %v6238_v26 = vld [vmem:[#allocation3 + $0x90] sm:$0xf]  ;;  %v2998_v50 = vpop.f32.mrf.mxu1 }
 0x155   :  { %3229 = vmatmul.bf16.vlgmr.msra.gmra.mxu3 %v10305_v38  ;;  %v6494_v28 = vld [vmem:[#allocation3 + $0x290] sm:$0xf]  ;;  %v3010_v33 = vadd.f32 %v3009_v29, %v2997_v20  ;;  %v6400_v20 = vld [vmem:[#allocation3 + $0x1f0] sm:$0xf0] }
 0x156   :  { %3273 = vmatpush.bf16.msrb.mxu3 %v7167_v30  ;;  %3248 = vmatpush.bf16.msrb.mxu1 %v6623_v40  ;;  %v7039_v30 = vor.u32 %v9451_v19, %v7038_v18  ;;  %v9315_v31 = vld [vmem:[#allocation3 + $0x2ac] sm:$0xf0]  ;;  %v6239_v40 = vor.u32 %v9251_v27, %v6238_v26  ;;  %v9287_v19 = vld [vmem:[#allocation3 + $0x1d4] sm:$0xf] }
 0x157   :  { %v6750_v8 = vld [vmem:[#allocation3 + $0x490] sm:$0xf]  ;;  %v6495_v45 = vor.u32 %v9315_v31, %v6494_v28 }
 0x158   :  { %3261 = vmatpush.bf16.msrb.mxu2 %v6879_v43  ;;  %3236 = vmatpush.bf16.msrb.mxu0 %v6335_v53  ;;  %v9379_v32 = vld [vmem:[#allocation3 + $0x4ac] sm:$0xf0]  ;;  %v10347_v43 = vadd.f32 %v3022_v34, %v3010_v33  ;;  %v2985_v44 = vpop.f32.mrf.mxu0  ;;  %v9279_v33 = vld [vmem:[#allocation3 + $0x194] sm:$0xf] }
 0x159   :  { %v7006_v36 = vld [vmem:[#allocation3 + $0x690] sm:$0xf]  ;;  %v6751_v46 = vor.u32 %v9379_v32, %v6750_v8  ;;  %v6368_v34 = vld [vmem:[#allocation3 + $0x1b0] sm:$0xf0] }
 0x15a   :  { %3274 = vmatpush.bf16.msrb.mxu3 %v7135_v47  ;;  %3249 = vmatpush.bf16.msrb.mxu1 %v6591_v54  ;;  %v9443_v37 = vld [vmem:[#allocation3 + $0x6ac] sm:$0xf0] }
 0x15b   :  { %v6206_v47 = vld [vmem:[#allocation3 + $0x50] sm:$0xf]  ;;  %v7007_v51 = vor.u32 %v9443_v37, %v7006_v36 }
 0x15c   :  { %3262 = vmatpush.bf16.msrb.mxu2 %v6847_v55  ;;  %3237 = vmatpush.bf16.msrb.mxu0 %v6303_v2  ;;  %v9243_v48 = vld [vmem:[#allocation3 + $0x6c] sm:$0xf0] }
 0x15d   :  { %v6462_v49 = vld [vmem:[#allocation3 + $0x250] sm:$0xf]  ;;  %v6207_v57 = vor.u32 %v9243_v48, %v6206_v47  ;;  %v6371_v47 = vor.u32 %v9279_v33, %v6368_v34  ;;  %v6240_v33 = vld [vmem:[#allocation3 + $0xb0] sm:$0xf0] }
 0x15e   :  { %3275 = vmatpush.bf16.msrb.mxu3 %v7103_v60  ;;  %3250 = vmatpush.bf16.msrb.mxu1 %v6559_v4  ;;  %v9307_v52 = vld [vmem:[#allocation3 + $0x26c] sm:$0xf0] }
 0x15f   :  { %v6718_v53 = vld [vmem:[#allocation3 + $0x450] sm:$0xf]  ;;  %v6463_v60 = vor.u32 %v9307_v52, %v6462_v49  ;;  %v6336_v52 = vld [vmem:[#allocation3 + $0x170] sm:$0xf0] }
 0x160   :  { %3263 = vmatpush.bf16.msrb.mxu2 %v6815_v6  ;;  %3238 = vmatpush.bf16.msrb.mxu0 %v6271_v23  ;;  %v9371_v54 = vld [vmem:[#allocation3 + $0x46c] sm:$0xf0] }
 0x161   :  { %v6974_v55 = vld [vmem:[#allocation3 + $0x650] sm:$0xf]  ;;  %v6719_v61 = vor.u32 %v9371_v54, %v6718_v53 }
 0x162   :  { %3276 = vmatpush.bf16.msrb.mxu3 %v7071_v13  ;;  %3251 = vmatpush.bf16.msrb.mxu1 %v6527_v24  ;;  %v9435_v56 = vld [vmem:[#allocation3 + $0x66c] sm:$0xf0] }
 0x163   :  { %v6174_v58 = vld [vmem:[#allocation3 + $0x10] sm:$0xf]  ;;  %v6975_v2 = vor.u32 %v9435_v56, %v6974_v55 }
 0x164   :  { %3264 = vmatpush.bf16.msrb.mxu2 %v6783_v25  ;;  %3239 = vmatpush.bf16.msrb.mxu0 %v6239_v40  ;;  %v9235_v59 = vld [vmem:[#allocation3 + $0x2c] sm:$0xf0] }
 0x165   :  { %v6430_v62 = vld [vmem:[#allocation3 + $0x210] sm:$0xf]  ;;  %v6175_v12 = vor.u32 %v9235_v59, %v6174_v58 }
 0x166   :  { %3277 = vmatpush.bf16.msrb.mxu3 %v7039_v30  ;;  %3252 = vmatpush.bf16.msrb.mxu1 %v6495_v45  ;;  %v9299_v63 = vld [vmem:[#allocation3 + $0x22c] sm:$0xf0]  ;;  %v6403_v30 = vor.u32 %v9287_v19, %v6400_v20  ;;  %v6272_v19 = vld [vmem:[#allocation3 + $0xf0] sm:$0xf0] }
 0x167   :  { %v6686_v0 = vld [vmem:[#allocation3 + $0x410] sm:$0xf]  ;;  %v6431_v17 = vor.u32 %v9299_v63, %v6430_v62  ;;  %v3035_v63 = vpop.f32.mrf.mxu0 }
 0x168   :  { %3265 = vmatpush.bf16.msrb.mxu2 %v6751_v46  ;;  %v9363_v3 = vld [vmem:[#allocation3 + $0x42c] sm:$0xf0]  ;;  %3240 = vmatpush.bf16.msrb.mxu0 %v6207_v57 }
 0x169   :  { %v6942_v4 = vld [vmem:[#allocation3 + $0x610] sm:$0xf]  ;;  %v6687_v18 = vor.u32 %v9363_v3, %v6686_v0  ;;  %v9263_v0 = vld [vmem:[#allocation3 + $0x114] sm:$0xf] }
 0x16a   :  { %3278 = vmatpush.bf16.msrb.mxu3 %v7007_v51  ;;  %v9427_v6 = vld [vmem:[#allocation3 + $0x62c] sm:$0xf0]  ;;  %3253 = vmatpush.bf16.msrb.mxu1 %v6463_v60  ;;  %v9271_v51 = vld [vmem:[#allocation3 + $0x154] sm:$0xf] }
 0x16b   :  { %v7422_v10 = vld [vmem:[#allocation3 + $0x9d0] sm:$0xf]  ;;  %v6943_v23 = vor.u32 %v9427_v6, %v6942_v4  ;;  %v6339_v59 = vor.u32 %v9271_v51, %v6336_v52  ;;  %v3048_v4 = vpop.f32.mrf.mxu1 }
 0x16c   :  { %v9547_v39 = vld [vmem:[#allocation3 + $0x9ec] sm:$0xf0]  ;;  %3266 = vmatpush.bf16.msrb.mxu2 %v6719_v61  ;;  %3241 = vmatpush.bf16.msrb.mxu0 %v6175_v12  ;;  %v6307_v12 = vor.u32 %v9263_v0, %v6304_v1 }
 0x16d   :  { %v7678_v11 = vld [vmem:[#allocation3 + $0xbd0] sm:$0xf]  ;;  %v7423_v24 = vor.u32 %v9547_v39, %v7422_v10 }
 0x16e   :  { %v9611_v13 = vld [vmem:[#allocation3 + $0xbec] sm:$0xf0]  ;;  %3279 = vmatpush.bf16.msrb.mxu3 %v6975_v2  ;;  %3254 = vmatpush.bf16.msrb.mxu1 %v6431_v17  ;;  %v3036_v2 = vadd.f32 %v3035_v63, %v10347_v43  ;;  %v591_v43 = vperm.slane %v10327_v14, 2 }
 0x16f   :  { %v7934_v15 = vld [vmem:[#allocation3 + $0xdd0] sm:$0xf]  ;;  %v7679_v25 = vor.u32 %v9611_v13, %v7678_v11  ;;  %3242 = vmatmul.bf16.vlgmr.msrb.gmra.mxu0 %v10292_v21  ;;  %v3037_v14 = vpop.f32.mrf.mxu0 }
 0x170   :  { %v9675_v16 = vld [vmem:[#allocation3 + $0xdec] sm:$0xf0]  ;;  %3267 = vmatpush.bf16.msrb.mxu2 %v6687_v18  ;;  %3286 = vmatpush.bf16.msra.mxu0 %v7423_v24  ;;  %v10354_v13 = vadd.f32 %v3048_v4, %v3036_v2  ;;  %v9255_v18 = vld [vmem:[#allocation3 + $0xd4] sm:$0xf] }
 0x171   :  { %v7935_v26 = vor.u32 %v9675_v16, %v7934_v15  ;;  %v7390_v27 = vld [vmem:[#allocation3 + $0x990] sm:$0xf]  ;;  %3255 = vmatmul.bf16.vlgmr.msrb.gmra.mxu1 %v10294_v22  ;;  %v9231_v2 = vld [vmem:[#allocation3 + $0x14] sm:$0xf] }
 0x172   :  { %v9539_v28 = vld [vmem:[#allocation3 + $0x9ac] sm:$0xf0]  ;;  %3280 = vmatpush.bf16.msrb.mxu3 %v6943_v23  ;;  %3299 = vmatpush.bf16.msra.mxu1 %v7679_v25  ;;  %vm3599_vm1 = vcmp.gt.f32.partialorder %v10354_v13, 0.0 }
 0x173   :  { %v7646_v29 = vld [vmem:[#allocation3 + $0xb90] sm:$0xf]  ;;  %v7391_v36 = vor.u32 %v9539_v28, %v7390_v27  ;;  %3268 = vmatmul.bf16.vlgmr.msrb.gmra.mxu2 %v10284_v5  ;;  %v6275_v28 = vor.u32 %v9255_v18, %v6272_v19  ;;  %v9543_v19 = vld [vmem:[#allocation3 + $0x9d4] sm:$0xf] }
 0x174   :  { %v9603_v31 = vld [vmem:[#allocation3 + $0xbac] sm:$0xf0]  ;;  %3312 = vmatpush.bf16.msra.mxu2 %v7935_v26 }
 0x175   :  { %v7902_v8 = vld [vmem:[#allocation3 + $0xd90] sm:$0xf]  ;;  %v7647_v37 = vor.u32 %v9603_v31, %v7646_v29  ;;  %3287 = vmatpush.bf16.msra.mxu0 %v7391_v36  ;;  %3281 = vmatmul.bf16.vlgmr.msrb.gmra.mxu3 %v10289_v7  ;;  %v3074_v36 = vpop.f32.mrf.mxu3 }
 0x176   :  { %v9667_v32 = vld [vmem:[#allocation3 + $0xdac] sm:$0xf0]  ;;  %3325 = vmatpush.bf16.msra.mxu3 %v6403_v30 }
 0x177   :  { %v7903_v40 = vor.u32 %v9667_v32, %v7902_v8  ;;  %v7358_v44 = vld [vmem:[#allocation3 + $0x950] sm:$0xf]  ;;  %3300 = vmatpush.bf16.msra.mxu1 %v7647_v37  ;;  %v3061_v8 = vpop.f32.mrf.mxu2  ;;  %v9247_v32 = vld [vmem:[#allocation3 + $0x94] sm:$0xf] }
 0x178   :  { %v9531_v45 = vld [vmem:[#allocation3 + $0x96c] sm:$0xf0]  ;;  %v3062_v34 = vadd.f32 %v3061_v8, %v591_v43  ;;  %v7424_v43 = vld [vmem:[#allocation3 + $0x9f0] sm:$0xf0] }
 0x179   :  { %v7614_v46 = vld [vmem:[#allocation3 + $0xb50] sm:$0xf]  ;;  %v7359_v53 = vor.u32 %v9531_v45, %v7358_v44  ;;  %3313 = vmatpush.bf16.msra.mxu2 %v7903_v40  ;;  %v3050_v40 = vpop.f32.mrf.mxu1  ;;  %v7136_v8 = vld [vmem:[#allocation3 + $0x7b0] sm:$0xf0] }
 0x17a   :  { %v9595_v48 = vld [vmem:[#allocation3 + $0xb6c] sm:$0xf0]  ;;  %3326 = vmatpush.bf16.msra.mxu3 %v6371_v47  ;;  %v6592_v40 = vld [vmem:[#allocation3 + $0x370] sm:$0xf0] }
 0x17b   :  { %v7870_v49 = vld [vmem:[#allocation3 + $0xd50] sm:$0xf]  ;;  %v7615_v54 = vor.u32 %v9595_v48, %v7614_v46  ;;  %3288 = vmatpush.bf16.msra.mxu0 %v7359_v53 }
 0x17c   :  { %v9659_v50 = vld [vmem:[#allocation3 + $0xd6c] sm:$0xf0] }
 0x17d   :  { %v7871_v55 = vor.u32 %v9659_v50, %v7870_v49  ;;  %v7326_v56 = vld [vmem:[#allocation3 + $0x910] sm:$0xf]  ;;  %3301 = vmatpush.bf16.msra.mxu1 %v7615_v54  ;;  %v10357_v49 = vadd.f32 %v3074_v36, %v3062_v34  ;;  %v6243_v50 = vor.u32 %v9247_v32, %v6240_v33  ;;  %v9239_v54 = vld [vmem:[#allocation3 + $0x54] sm:$0xf] }
 0x17e   :  { %v9523_v57 = vld [vmem:[#allocation3 + $0x92c] sm:$0xf0]  ;;  %3327 = vmatpush.bf16.msra.mxu3 %v6339_v59  ;;  %v9535_v32 = vld [vmem:[#allocation3 + $0x994] sm:$0xf] }
 0x17f   :  { %v7582_v58 = vld [vmem:[#allocation3 + $0xb10] sm:$0xf]  ;;  %v7327_v3 = vor.u32 %v9523_v57, %v7326_v56  ;;  %3314 = vmatpush.bf16.msra.mxu2 %v7871_v55  ;;  %v6208_v55 = vld [vmem:[#allocation3 + $0x70] sm:$0xf0]  ;;  %v3063_v4 = vpop.f32.mrf.mxu2 }
 0x180   :  { %v9587_v60 = vld [vmem:[#allocation3 + $0xb2c] sm:$0xf0]  ;;  %v6211_v0 = vor.u32 %v9239_v54, %v6208_v55  ;;  %v7392_v33 = vld [vmem:[#allocation3 + $0x9b0] sm:$0xf0] }
 0x181   :  { %v7838_v61 = vld [vmem:[#allocation3 + $0xd10] sm:$0xf]  ;;  %v7583_v6 = vor.u32 %v9587_v60, %v7582_v58  ;;  %3289 = vmatpush.bf16.msra.mxu0 %v7327_v3  ;;  %v6176_v3 = vld [vmem:[#allocation3 + $0x30] sm:$0xf0] }
 0x182   :  { %v9651_v62 = vld [vmem:[#allocation3 + $0xd2c] sm:$0xf0]  ;;  %3328 = vmatpush.bf16.msra.mxu3 %v6307_v12  ;;  %v6912_v12 = vld [vmem:[#allocation3 + $0x5f0] sm:$0xf0] }
 0x183   :  { %v7839_v9 = vor.u32 %v9651_v62, %v7838_v61  ;;  %v7294_v10 = vld [vmem:[#allocation3 + $0x8d0] sm:$0xf]  ;;  %3302 = vmatpush.bf16.msra.mxu1 %v7583_v6  ;;  %v9351_v6 = vld [vmem:[#allocation3 + $0x3d4] sm:$0xf] }
 0x184   :  { %v9515_v39 = vld [vmem:[#allocation3 + $0x8ec] sm:$0xf0]  ;;  %v9327_v55 = vld [vmem:[#allocation3 + $0x314] sm:$0xf] }
 0x185   :  { %v7550_v11 = vld [vmem:[#allocation3 + $0xad0] sm:$0xf]  ;;  %v7295_v20 = vor.u32 %v9515_v39, %v7294_v10  ;;  %3315 = vmatpush.bf16.msra.mxu2 %v7839_v9  ;;  %v6656_v9 = vld [vmem:[#allocation3 + $0x3f0] sm:$0xf0]  ;;  %v3076_v39 = vpop.f32.mrf.mxu3 }
 0x186   :  { %v9579_v15 = vld [vmem:[#allocation3 + $0xaec] sm:$0xf0]  ;;  %3329 = vmatpush.bf16.msra.mxu3 %v6275_v28  ;;  %v9415_v10 = vld [vmem:[#allocation3 + $0x5d4] sm:$0xf]  ;;  %v3100_v39 = vpop.f32.mrf.mxu1 }
 0x187   :  { %v7806_v16 = vld [vmem:[#allocation3 + $0xcd0] sm:$0xf]  ;;  %v7551_v23 = vor.u32 %v9579_v15, %v7550_v11  ;;  %3290 = vmatpush.bf16.msra.mxu0 %v7295_v20  ;;  %v9479_v15 = vld [vmem:[#allocation3 + $0x7d4] sm:$0xf]  ;;  %v6179_v20 = vor.u32 %v9231_v2, %v6176_v3 }
 0x188   :  { %v9643_v17 = vld [vmem:[#allocation3 + $0xcec] sm:$0xf0]  ;;  %v9407_v28 = vld [vmem:[#allocation3 + $0x594] sm:$0xf] }
 0x189   :  { %v7807_v24 = vor.u32 %v9643_v17, %v7806_v16  ;;  %v7262_v25 = vld [vmem:[#allocation3 + $0x890] sm:$0xf]  ;;  %3303 = vmatpush.bf16.msra.mxu1 %v7551_v23  ;;  %v7168_v16 = vld [vmem:[#allocation3 + $0x7f0] sm:$0xf0]  ;;  %v6659_v23 = vor.u32 %v9351_v6, %v6656_v9 }
 0x18a   :  { %v9507_v26 = vld [vmem:[#allocation3 + $0x8ac] sm:$0xf0]  ;;  %3330 = vmatpush.bf16.msra.mxu3 %v6243_v50  ;;  %v9527_v50 = vld [vmem:[#allocation3 + $0x954] sm:$0xf] }
 0x18b   :  { %v7518_v27 = vld [vmem:[#allocation3 + $0xa90] sm:$0xf]  ;;  %v7263_v37 = vor.u32 %v9507_v26, %v7262_v25  ;;  %3316 = vmatpush.bf16.msra.mxu2 %v7807_v24  ;;  %v6915_v24 = vor.u32 %v9415_v10, %v6912_v12  ;;  %v7171_v25 = vor.u32 %v9479_v15, %v7168_v16  ;;  %v9343_v26 = vld [vmem:[#allocation3 + $0x394] sm:$0xf] }
 0x18c   :  { %v9571_v29 = vld [vmem:[#allocation3 + $0xaac] sm:$0xf0]  ;;  %v9319_v4 = vld [vmem:[#allocation3 + $0x2d4] sm:$0xf] }
 0x18d   :  { %v7774_v30 = vld [vmem:[#allocation3 + $0xc90] sm:$0xf]  ;;  %v7519_v44 = vor.u32 %v9571_v29, %v7518_v27  ;;  %3291 = vmatpush.bf16.msra.mxu0 %v7263_v37  ;;  %v6624_v27 = vld [vmem:[#allocation3 + $0x3b0] sm:$0xf0]  ;;  %v7427_v29 = vor.u32 %v9543_v19, %v7424_v43 }
 0x18e   :  { %v9635_v31 = vld [vmem:[#allocation3 + $0xcac] sm:$0xf0]  ;;  %3331 = vmatpush.bf16.msra.mxu3 %v6211_v0  ;;  %v6627_v34 = vor.u32 %v9343_v26, %v6624_v27  ;;  %v9335_v37 = vld [vmem:[#allocation3 + $0x354] sm:$0xf]  ;;  %v3113_v27 = vpop.f32.mrf.mxu2 }
 0x18f   :  { %v7775_v45 = vor.u32 %v9635_v31, %v7774_v30  ;;  %v7230_v46 = vld [vmem:[#allocation3 + $0x850] sm:$0xf]  ;;  %3304 = vmatpush.bf16.msra.mxu1 %v7519_v44  ;;  %v6880_v30 = vld [vmem:[#allocation3 + $0x5b0] sm:$0xf0] }
 0x190   :  { %v9499_v47 = vld [vmem:[#allocation3 + $0x86c] sm:$0xf0]  ;;  %v9471_v31 = vld [vmem:[#allocation3 + $0x794] sm:$0xf]  ;;  %v6883_v36 = vor.u32 %v9407_v28, %v6880_v30 }
 0x191   :  { %v7486_v48 = vld [vmem:[#allocation3 + $0xa50] sm:$0xf]  ;;  %v7231_v56 = vor.u32 %v9499_v47, %v7230_v46  ;;  %3317 = vmatpush.bf16.msra.mxu2 %v7775_v45  ;;  %v7139_v14 = vor.u32 %v9471_v31, %v7136_v8  ;;  %v9399_v44 = vld [vmem:[#allocation3 + $0x554] sm:$0xf]  ;;  %v7395_v45 = vor.u32 %v9535_v32, %v7392_v33  ;;  %v3126_v8 = vpop.f32.mrf.mxu3 }
 0x192   :  { %v9563_v51 = vld [vmem:[#allocation3 + $0xa6c] sm:$0xf0]  ;;  %3332 = vmatpush.bf16.msra.mxu3 %v6179_v20  ;;  %v6848_v46 = vld [vmem:[#allocation3 + $0x570] sm:$0xf0] }
 0x193   :  { %v7742_v52 = vld [vmem:[#allocation3 + $0xc50] sm:$0xf]  ;;  %v7487_v59 = vor.u32 %v9563_v51, %v7486_v48  ;;  %3292 = vmatpush.bf16.msra.mxu0 %v7231_v56  ;;  %v9463_v47 = vld [vmem:[#allocation3 + $0x754] sm:$0xf] }
 0x194   :  { %v9627_v53 = vld [vmem:[#allocation3 + $0xc6c] sm:$0xf0]  ;;  %v7104_v48 = vld [vmem:[#allocation3 + $0x770] sm:$0xf0] }
 0x195   :  { %v7198_v57 = vld [vmem:[#allocation3 + $0x810] sm:$0xf]  ;;  %v7743_v60 = vor.u32 %v9627_v53, %v7742_v52  ;;  %3305 = vmatpush.bf16.msra.mxu1 %v7487_v59  ;;  %v7360_v51 = vld [vmem:[#allocation3 + $0x970] sm:$0xf0]  ;;  %v6595_v52 = vor.u32 %v9335_v37, %v6592_v40  ;;  %3333 = vmatmul.bf16.vlgmr.msra.gmra.mxu3 %v10292_v21  ;;  %v6851_v53 = vor.u32 %v9399_v44, %v6848_v46 }
 0x196   :  { %v9491_v58 = vld [vmem:[#allocation3 + $0x82c] sm:$0xf0]  ;;  %3377 = vmatpush.bf16.msrb.mxu3 %v7427_v29  ;;  %v7107_v54 = vor.u32 %v9463_v47, %v7104_v48  ;;  %v6560_v56 = vld [vmem:[#allocation3 + $0x330] sm:$0xf0]  ;;  %v3102_v47 = vpop.f32.mrf.mxu1 }
 0x197   :  { %v7454_v61 = vld [vmem:[#allocation3 + $0xa10] sm:$0xf]  ;;  %v7199_v11 = vor.u32 %v9491_v58, %v7198_v57  ;;  %3318 = vmatpush.bf16.msra.mxu2 %v7743_v60  ;;  %v9391_v57 = vld [vmem:[#allocation3 + $0x514] sm:$0xf]  ;;  %v7363_v58 = vor.u32 %v9527_v50, %v7360_v51  ;;  %v6563_v0 = vor.u32 %v9327_v55, %v6560_v56  ;;  %v9276_v47 = vld [vmem:[#allocation3 + $0x174] sm:$0xf0] }
 0x198   :  { %v9555_v62 = vld [vmem:[#allocation3 + $0xa2c] sm:$0xf0]  ;;  %v6816_v59 = vld [vmem:[#allocation3 + $0x530] sm:$0xf0] }
 0x199   :  { %v7710_v63 = vld [vmem:[#allocation3 + $0xc10] sm:$0xf]  ;;  %v7455_v17 = vor.u32 %v9555_v62, %v7454_v61  ;;  %3293 = vmatpush.bf16.msra.mxu0 %v7199_v11  ;;  %v9455_v60 = vld [vmem:[#allocation3 + $0x714] sm:$0xf]  ;;  %v6819_v2 = vor.u32 %v9391_v57, %v6816_v59 }
 0x19a   :  { %v9619_v1 = vld [vmem:[#allocation3 + $0xc2c] sm:$0xf0]  ;;  %3378 = vmatpush.bf16.msrb.mxu3 %v7395_v45  ;;  %v7072_v61 = vld [vmem:[#allocation3 + $0x730] sm:$0xf0] }
 0x19b   :  { %v7711_v18 = vor.u32 %v9619_v1, %v7710_v63  ;;  %3306 = vmatpush.bf16.msra.mxu1 %v7455_v17  ;;  %v9519_v62 = vld [vmem:[#allocation3 + $0x914] sm:$0xf]  ;;  %v3087_v1 = vpop.f32.mrf.mxu0  ;;  %v7075_v3 = vor.u32 %v9455_v60, %v7072_v61 }
 0x19c   :  { %3294 = vmatmul.bf16.vlgmr.msra.gmra.mxu0 %v10307_v41  ;;  %v7328_v63 = vld [vmem:[#allocation3 + $0x930] sm:$0xf0]  ;;  %v3088_v10 = vadd.f32 %v3087_v1, %v10357_v49 }
 0x19d   :  { %3319 = vmatpush.bf16.msra.mxu2 %v7711_v18  ;;  %3338 = vmatpush.bf16.msrb.mxu0 %v6659_v23  ;;  %v6528_v6 = vld [vmem:[#allocation3 + $0x2f0] sm:$0xf0]  ;;  %v7331_v11 = vor.u32 %v9519_v62, %v7328_v63  ;;  %v3115_v63 = vpop.f32.mrf.mxu2 }
 0x19e   :  { %3307 = vmatmul.bf16.vlgmr.msra.gmra.mxu1 %v10309_v42  ;;  %v9383_v9 = vld [vmem:[#allocation3 + $0x4d4] sm:$0xf]  ;;  %3379 = vmatpush.bf16.msrb.mxu3 %v7363_v58  ;;  %v3101_v19 = vadd.f32 %v3100_v39, %v3088_v10  ;;  %v6531_v43 = vor.u32 %v9319_v4, %v6528_v6  ;;  %v3128_v4 = vpop.f32.mrf.mxu3  ;;  %v9332_v63 = vld [vmem:[#allocation3 + $0x334] sm:$0xf0] }
 0x19f   :  { %3351 = vmatpush.bf16.msrb.mxu1 %v6915_v24  ;;  %v6784_v12 = vld [vmem:[#allocation3 + $0x4f0] sm:$0xf0] }
 0x1a0   :  { %3320 = vmatmul.bf16.vlgmr.msra.gmra.mxu2 %v10305_v38  ;;  %v9447_v15 = vld [vmem:[#allocation3 + $0x6d4] sm:$0xf]  ;;  %v6787_v20 = vor.u32 %v9383_v9, %v6784_v12  ;;  %v3114_v31 = vadd.f32 %v3113_v27, %v3101_v19  ;;  %v6406_v12 = vld [vmem:[#allocation3 + $0x1d8] sm:$0xf] }
 0x1a1   :  { %3364 = vmatpush.bf16.msrb.mxu2 %v7171_v25  ;;  %3339 = vmatpush.bf16.msrb.mxu0 %v6627_v34  ;;  %v7040_v16 = vld [vmem:[#allocation3 + $0x6f0] sm:$0xf0]  ;;  %v9356_v19 = vld [vmem:[#allocation3 + $0x3f4] sm:$0xf0] }
 0x1a2   :  { %v9511_v17 = vld [vmem:[#allocation3 + $0x8d4] sm:$0xf]  ;;  %v7043_v23 = vor.u32 %v9447_v15, %v7040_v16  ;;  %3380 = vmatpush.bf16.msrb.mxu3 %v7331_v11  ;;  %v9292_v15 = vld [vmem:[#allocation3 + $0x1f4] sm:$0xf0] }
 0x1a3   :  { %3352 = vmatpush.bf16.msrb.mxu1 %v6883_v36  ;;  %v7296_v18 = vld [vmem:[#allocation3 + $0x8f0] sm:$0xf0]  ;;  %v10364_v36 = vadd.f32 %v3126_v8, %v3114_v31  ;;  %v6630_v31 = vld [vmem:[#allocation3 + $0x398] sm:$0xf] }
 0x1a4   :  { %v9311_v24 = vld [vmem:[#allocation3 + $0x294] sm:$0xf]  ;;  %v7299_v49 = vor.u32 %v9511_v17, %v7296_v18  ;;  %v6662_v18 = vld [vmem:[#allocation3 + $0x3d8] sm:$0xf] }
 0x1a5   :  { %3365 = vmatpush.bf16.msrb.mxu2 %v7139_v14  ;;  %3340 = vmatpush.bf16.msrb.mxu0 %v6595_v52  ;;  %v6496_v25 = vld [vmem:[#allocation3 + $0x2b0] sm:$0xf0]  ;;  %v3089_v14 = vpop.f32.mrf.mxu0  ;;  %v9348_v8 = vld [vmem:[#allocation3 + $0x3b4] sm:$0xf0] }
 0x1a6   :  { %v9375_v26 = vld [vmem:[#allocation3 + $0x494] sm:$0xf]  ;;  %v6499_v34 = vor.u32 %v9311_v24, %v6496_v25  ;;  %3381 = vmatpush.bf16.msrb.mxu3 %v7299_v49  ;;  %v6407_v24 = vor.u32 %v9292_v15, %v6406_v12  ;;  %v6663_v49 = vor.u32 %v9356_v19, %v6662_v18  ;;  %v6534_v18 = vld [vmem:[#allocation3 + $0x2d8] sm:$0xf] }
 0x1a7   :  { %3353 = vmatpush.bf16.msrb.mxu1 %v6851_v53  ;;  %v6752_v28 = vld [vmem:[#allocation3 + $0x4b0] sm:$0xf0]  ;;  %v9324_v19 = vld [vmem:[#allocation3 + $0x2f4] sm:$0xf0] }
 0x1a8   :  { %v9439_v29 = vld [vmem:[#allocation3 + $0x694] sm:$0xf]  ;;  %v6755_v37 = vor.u32 %v9375_v26, %v6752_v28 }
 0x1a9   :  { %3366 = vmatpush.bf16.msrb.mxu2 %v7107_v54  ;;  %3341 = vmatpush.bf16.msrb.mxu0 %v6563_v0  ;;  %v7008_v30 = vld [vmem:[#allocation3 + $0x6b0] sm:$0xf0] }
 0x1aa   :  { %v9503_v32 = vld [vmem:[#allocation3 + $0x894] sm:$0xf]  ;;  %v7011_v40 = vor.u32 %v9439_v29, %v7008_v30  ;;  %v6374_v29 = vld [vmem:[#allocation3 + $0x198] sm:$0xf] }
 0x1ab   :  { %3354 = vmatpush.bf16.msrb.mxu1 %v6819_v2  ;;  %v7264_v33 = vld [vmem:[#allocation3 + $0x8b0] sm:$0xf0]  ;;  %v9284_v30 = vld [vmem:[#allocation3 + $0x1b4] sm:$0xf0] }
 0x1ac   :  { %v9303_v44 = vld [vmem:[#allocation3 + $0x254] sm:$0xf]  ;;  %v7267_v48 = vor.u32 %v9503_v32, %v7264_v33 }
 0x1ad   :  { %3367 = vmatpush.bf16.msrb.mxu2 %v7075_v3  ;;  %3342 = vmatpush.bf16.msrb.mxu0 %v6531_v43  ;;  %v6464_v45 = vld [vmem:[#allocation3 + $0x270] sm:$0xf0] }
 0x1ae   :  { %v9367_v46 = vld [vmem:[#allocation3 + $0x454] sm:$0xf]  ;;  %v6467_v55 = vor.u32 %v9303_v44, %v6464_v45  ;;  %3382 = vmatpush.bf16.msrb.mxu3 %v7267_v48  ;;  %v6631_v44 = vor.u32 %v9348_v8, %v6630_v31  ;;  %v6598_v48 = vld [vmem:[#allocation3 + $0x358] sm:$0xf]  ;;  %v3178_v31 = vpop.f32.mrf.mxu3 }
 0x1af   :  { %3355 = vmatpush.bf16.msrb.mxu1 %v6787_v20  ;;  %v6720_v50 = vld [vmem:[#allocation3 + $0x470] sm:$0xf0]  ;;  %v6502_v8 = vld [vmem:[#allocation3 + $0x298] sm:$0xf] }
 0x1b0   :  { %v9431_v51 = vld [vmem:[#allocation3 + $0x654] sm:$0xf]  ;;  %v6723_v58 = vor.u32 %v9367_v46, %v6720_v50  ;;  %v6342_v46 = vld [vmem:[#allocation3 + $0x158] sm:$0xf] }
 0x1b1   :  { %3368 = vmatpush.bf16.msrb.mxu2 %v7043_v23  ;;  %v6976_v52 = vld [vmem:[#allocation3 + $0x670] sm:$0xf0]  ;;  %3343 = vmatpush.bf16.msrb.mxu0 %v6499_v34  ;;  %v6375_v34 = vor.u32 %v9284_v30, %v6374_v29  ;;  %v9340_v50 = vld [vmem:[#allocation3 + $0x374] sm:$0xf0]  ;;  %v3165_v30 = vpop.f32.mrf.mxu2 }
 0x1b2   :  { %v9495_v53 = vld [vmem:[#allocation3 + $0x854] sm:$0xf]  ;;  %v6979_v59 = vor.u32 %v9431_v51, %v6976_v52  ;;  %v9252_v29 = vld [vmem:[#allocation3 + $0xb4] sm:$0xf0] }
 0x1b3   :  { %v7232_v54 = vld [vmem:[#allocation3 + $0x870] sm:$0xf0]  ;;  %3356 = vmatpush.bf16.msrb.mxu1 %v6755_v37 }
 0x1b4   :  { %v9295_v56 = vld [vmem:[#allocation3 + $0x214] sm:$0xf]  ;;  %v7235_v0 = vor.u32 %v9495_v53, %v7232_v54  ;;  %v6343_v53 = vor.u32 %v9276_v47, %v6342_v46 }
 0x1b5   :  { %v6432_v57 = vld [vmem:[#allocation3 + $0x230] sm:$0xf0]  ;;  %3369 = vmatpush.bf16.msrb.mxu2 %v7011_v40  ;;  %3344 = vmatpush.bf16.msrb.mxu0 %v6467_v55 }
 0x1b6   :  { %v9359_v60 = vld [vmem:[#allocation3 + $0x414] sm:$0xf]  ;;  %v6435_v39 = vor.u32 %v9295_v56, %v6432_v57  ;;  %3383 = vmatpush.bf16.msrb.mxu3 %v7235_v0  ;;  %v6599_v57 = vor.u32 %v9340_v50, %v6598_v48  ;;  %v10370_v0 = vld [vmem:[#allocation5] sm:$0xff] }
 0x1b7   :  { %v6688_v61 = vld [vmem:[#allocation3 + $0x430] sm:$0xf0]  ;;  %3357 = vmatpush.bf16.msrb.mxu1 %v6723_v58 }
 0x1b8   :  { %v9423_v62 = vld [vmem:[#allocation3 + $0x614] sm:$0xf]  ;;  %v6691_v16 = vor.u32 %v9359_v60, %v6688_v61  ;;  %v9268_v60 = vld [vmem:[#allocation3 + $0x134] sm:$0xf0]  ;;  %v3139_v61 = vpop.f32.mrf.mxu0 }
 0x1b9   :  { %v6944_v1 = vld [vmem:[#allocation3 + $0x630] sm:$0xf0]  ;;  %3370 = vmatpush.bf16.msrb.mxu2 %v6979_v59  ;;  %3345 = vmatpush.bf16.msrb.mxu0 %v6435_v39  ;;  %v6310_v59 = vld [vmem:[#allocation3 + $0x118] sm:$0xf] }
 0x1ba   :  { %v9487_v2 = vld [vmem:[#allocation3 + $0x814] sm:$0xf]  ;;  %v6947_v17 = vor.u32 %v9423_v62, %v6944_v1  ;;  %v6566_v62 = vld [vmem:[#allocation3 + $0x318] sm:$0xf]  ;;  %v592_v1 = vperm.slane %v10370_v0, 3 }
 0x1bb   :  { %v7200_v3 = vld [vmem:[#allocation3 + $0x830] sm:$0xf0]  ;;  %3358 = vmatpush.bf16.msrb.mxu1 %v6691_v16  ;;  %v6567_v12 = vor.u32 %v9332_v63, %v6566_v62  ;;  %v6278_v16 = vld [vmem:[#allocation3 + $0xd8] sm:$0xf] }
 0x1bc   :  { %v9607_v6 = vld [vmem:[#allocation3 + $0xbd4] sm:$0xf]  ;;  %v7203_v43 = vor.u32 %v9487_v2, %v7200_v3  ;;  %3346 = vmatmul.bf16.vlgmr.msrb.gmra.mxu0 %v10294_v22  ;;  %v10374_v2 = vadd.f32 %v3139_v61, %v10364_v36  ;;  %v6182_v63 = vld [vmem:[#allocation3 + $0x18] sm:$0xf] }
 0x1bd   :  { %v7680_v9 = vld [vmem:[#allocation3 + $0xbf0] sm:$0xf0]  ;;  %3371 = vmatpush.bf16.msrb.mxu2 %v6947_v17  ;;  %v9260_v17 = vld [vmem:[#allocation3 + $0xf4] sm:$0xf0] }
 0x1be   :  { %v9671_v10 = vld [vmem:[#allocation3 + $0xdd4] sm:$0xf]  ;;  %v7683_v20 = vor.u32 %v9607_v6, %v7680_v9  ;;  %3384 = vmatpush.bf16.msrb.mxu3 %v7203_v43  ;;  %3359 = vmatmul.bf16.vlgmr.msrb.gmra.mxu1 %v10284_v5  ;;  %v6311_v6 = vor.u32 %v9268_v60, %v6310_v59  ;;  %vm3600_vm2 = vcmp.gt.f32.partialorder %v10374_v2, 0.0 }
 0x1bf   :  { %v7936_v11 = vld [vmem:[#allocation3 + $0xdf0] sm:$0xf0] }
 0x1c0   :  { %v7939_v23 = vor.u32 %v9671_v10, %v7936_v11  ;;  %v9599_v25 = vld [vmem:[#allocation3 + $0xb94] sm:$0xf]  ;;  %3390 = vmatpush.bf16.msra.mxu0 %v7683_v20  ;;  %3372 = vmatmul.bf16.vlgmr.msrb.gmra.mxu2 %v10289_v7  ;;  %v3152_v11 = vpop.f32.mrf.mxu1 }
 0x1c1   :  { %v7648_v26 = vld [vmem:[#allocation3 + $0xbb0] sm:$0xf0]  ;;  %3416 = vmatpush.bf16.msra.mxu2 %v6407_v24  ;;  %3385 = vmatmul.bf16.vlgmr.msrb.gmra.mxu3 %v10307_v41  ;;  %v3153_v43 = vadd.f32 %v3152_v11, %v592_v1  ;;  %v9420_v11 = vld [vmem:[#allocation3 + $0x5f4] sm:$0xf0] }
 0x1c2   :  { %v9663_v27 = vld [vmem:[#allocation3 + $0xd94] sm:$0xf]  ;;  %v7651_v32 = vor.u32 %v9599_v25, %v7648_v26  ;;  %3403 = vmatpush.bf16.msra.mxu1 %v7939_v23  ;;  %3429 = vmatpush.bf16.msra.mxu3 %v6663_v49  ;;  %v6279_v23 = vor.u32 %v9260_v17, %v6278_v16  ;;  %v9484_v16 = vld [vmem:[#allocation3 + $0x7f4] sm:$0xf0] }
 0x1c3   :  { %v7904_v28 = vld [vmem:[#allocation3 + $0xdb0] sm:$0xf0]  ;;  %v7430_v17 = vld [vmem:[#allocation3 + $0x9d8] sm:$0xf] }
 0x1c4   :  { %v7907_v33 = vor.u32 %v9663_v27, %v7904_v28  ;;  %v9591_v14 = vld [vmem:[#allocation3 + $0xb54] sm:$0xf]  ;;  %3391 = vmatpush.bf16.msra.mxu0 %v7651_v32  ;;  %v6535_v27 = vor.u32 %v9324_v19, %v6534_v18  ;;  %v6246_v28 = vld [vmem:[#allocation3 + $0x98] sm:$0xf] }
 0x1c5   :  { %v7616_v37 = vld [vmem:[#allocation3 + $0xb70] sm:$0xf0]  ;;  %3417 = vmatpush.bf16.msra.mxu2 %v6375_v34  ;;  %v9316_v32 = vld [vmem:[#allocation3 + $0x2b4] sm:$0xf0]  ;;  %v3141_v34 = vpop.f32.mrf.mxu0 }
 0x1c6   :  { %v9655_v40 = vld [vmem:[#allocation3 + $0xd54] sm:$0xf]  ;;  %v7619_v51 = vor.u32 %v9591_v14, %v7616_v37  ;;  %3404 = vmatpush.bf16.msra.mxu1 %v7907_v33  ;;  %3430 = vmatpush.bf16.msra.mxu3 %v6631_v44  ;;  %v3166_v33 = vadd.f32 %v3165_v30, %v3153_v43  ;;  %v6503_v50 = vor.u32 %v9316_v32, %v6502_v8  ;;  %v9548_v18 = vld [vmem:[#allocation3 + $0x9f4] sm:$0xf0] }
 0x1c7   :  { %v7872_v45 = vld [vmem:[#allocation3 + $0xd70] sm:$0xf0]  ;;  %v9476_v30 = vld [vmem:[#allocation3 + $0x7b4] sm:$0xf0] }
 0x1c8   :  { %v7875_v52 = vor.u32 %v9655_v40, %v7872_v45  ;;  %v9583_v54 = vld [vmem:[#allocation3 + $0xb14] sm:$0xf]  ;;  %3392 = vmatpush.bf16.msra.mxu0 %v7619_v51  ;;  %v6247_v40 = vor.u32 %v9252_v29, %v6246_v28  ;;  %v10376_v47 = vadd.f32 %v3178_v31, %v3166_v33  ;;  %v3154_v48 = vpop.f32.mrf.mxu1  ;;  %v7142_v28 = vld [vmem:[#allocation3 + $0x798] sm:$0xf] }
 0x1c9   :  { %v7584_v55 = vld [vmem:[#allocation3 + $0xb30] sm:$0xf0]  ;;  %3418 = vmatpush.bf16.msra.mxu2 %v6343_v53  ;;  %v9244_v53 = vld [vmem:[#allocation3 + $0x74] sm:$0xf0] }
 0x1ca   :  { %v9647_v56 = vld [vmem:[#allocation3 + $0xd14] sm:$0xf]  ;;  %v7587_v3 = vor.u32 %v9583_v54, %v7584_v55  ;;  %3405 = vmatpush.bf16.msra.mxu1 %v7875_v52  ;;  %3431 = vmatpush.bf16.msra.mxu3 %v6599_v57  ;;  %v6214_v52 = vld [vmem:[#allocation3 + $0x58] sm:$0xf] }
 0x1cb   :  { %v7840_v58 = vld [vmem:[#allocation3 + $0xd30] sm:$0xf0]  ;;  %v6470_v54 = vld [vmem:[#allocation3 + $0x258] sm:$0xf]  ;;  %v6215_v60 = vor.u32 %v9244_v53, %v6214_v52 }
 0x1cc   :  { %v7843_v4 = vor.u32 %v9647_v56, %v7840_v58  ;;  %v9575_v9 = vld [vmem:[#allocation3 + $0xad4] sm:$0xf]  ;;  %3393 = vmatpush.bf16.msra.mxu0 %v7587_v3  ;;  %v9308_v55 = vld [vmem:[#allocation3 + $0x274] sm:$0xf0] }
 0x1cd   :  { %v7552_v10 = vld [vmem:[#allocation3 + $0xaf0] sm:$0xf0]  ;;  %3419 = vmatpush.bf16.msra.mxu2 %v6311_v6  ;;  %v6471_v1 = vor.u32 %v9308_v55, %v6470_v54  ;;  %v9236_v3 = vld [vmem:[#allocation3 + $0x34] sm:$0xf0] }
 0x1ce   :  { %v9639_v39 = vld [vmem:[#allocation3 + $0xcd4] sm:$0xf]  ;;  %v7555_v36 = vor.u32 %v9575_v9, %v7552_v10  ;;  %3406 = vmatpush.bf16.msra.mxu1 %v7843_v4  ;;  %3432 = vmatpush.bf16.msra.mxu3 %v6567_v12  ;;  %v6438_v4 = vld [vmem:[#allocation3 + $0x218] sm:$0xf]  ;;  %v3167_v9 = vpop.f32.mrf.mxu2  ;;  %v3180_v10 = vpop.f32.mrf.mxu3  ;;  %v6183_v43 = vor.u32 %v9236_v3, %v6182_v63 }
 0x1cf   :  { %v7808_v15 = vld [vmem:[#allocation3 + $0xcf0] sm:$0xf0]  ;;  %v9300_v6 = vld [vmem:[#allocation3 + $0x234] sm:$0xf0] }
 0x1d0   :  { %v7811_v20 = vor.u32 %v9639_v39, %v7808_v15  ;;  %v9567_v24 = vld [vmem:[#allocation3 + $0xa94] sm:$0xf]  ;;  %3394 = vmatpush.bf16.msra.mxu0 %v7555_v36  ;;  %v6918_v39 = vld [vmem:[#allocation3 + $0x5d8] sm:$0xf] }
 0x1d1   :  { %v7520_v25 = vld [vmem:[#allocation3 + $0xab0] sm:$0xf0]  ;;  %3420 = vmatpush.bf16.msra.mxu2 %v6279_v23  ;;  %v7174_v12 = vld [vmem:[#allocation3 + $0x7d8] sm:$0xf]  ;;  %v6439_v23 = vor.u32 %v9300_v6, %v6438_v4  ;;  %v3191_v6 = vpop.f32.mrf.mxu0 }
 0x1d2   :  { %v9631_v26 = vld [vmem:[#allocation3 + $0xc94] sm:$0xf]  ;;  %v7523_v14 = vor.u32 %v9567_v24, %v7520_v25  ;;  %3407 = vmatpush.bf16.msra.mxu1 %v7811_v20  ;;  %3433 = vmatpush.bf16.msra.mxu3 %v6535_v27  ;;  %v7686_v36 = vld [vmem:[#allocation3 + $0xbd8] sm:$0xf]  ;;  %v6919_v24 = vor.u32 %v9420_v11, %v6918_v39  ;;  %v7175_v25 = vor.u32 %v9484_v16, %v7174_v12  ;;  %v3204_v16 = vpop.f32.mrf.mxu1 }
 0x1d3   :  { %v7776_v49 = vld [vmem:[#allocation3 + $0xcb0] sm:$0xf0]  ;;  %v9612_v20 = vld [vmem:[#allocation3 + $0xbf4] sm:$0xf0] }
 0x1d4   :  { %v7779_v37 = vor.u32 %v9631_v26, %v7776_v49  ;;  %v9559_v44 = vld [vmem:[#allocation3 + $0xa54] sm:$0xf]  ;;  %3395 = vmatpush.bf16.msra.mxu0 %v7523_v14  ;;  %v7431_v26 = vor.u32 %v9548_v18, %v7430_v17  ;;  %v6886_v27 = vld [vmem:[#allocation3 + $0x598] sm:$0xf]  ;;  %v7687_v29 = vor.u32 %v9612_v20, %v7686_v36  ;;  %v7143_v14 = vor.u32 %v9476_v30, %v7142_v28 }
 0x1d5   :  { %v7488_v45 = vld [vmem:[#allocation3 + $0xa70] sm:$0xf0]  ;;  %3421 = vmatpush.bf16.msra.mxu2 %v6247_v40  ;;  %v9412_v49 = vld [vmem:[#allocation3 + $0x5b4] sm:$0xf0] }
 0x1d6   :  { %v9623_v46 = vld [vmem:[#allocation3 + $0xc54] sm:$0xf]  ;;  %v7491_v56 = vor.u32 %v9559_v44, %v7488_v45  ;;  %3408 = vmatpush.bf16.msra.mxu1 %v7779_v37  ;;  %3434 = vmatpush.bf16.msra.mxu3 %v6503_v50  ;;  %v7398_v31 = vld [vmem:[#allocation3 + $0x998] sm:$0xf]  ;;  %v6887_v34 = vor.u32 %v9412_v49, %v6886_v27 }
 0x1d7   :  { %v7744_v51 = vld [vmem:[#allocation3 + $0xc70] sm:$0xf0]  ;;  %v9540_v8 = vld [vmem:[#allocation3 + $0x9b4] sm:$0xf0] }
 0x1d8   :  { %v9551_v57 = vld [vmem:[#allocation3 + $0xa14] sm:$0xf]  ;;  %v7747_v59 = vor.u32 %v9623_v46, %v7744_v51  ;;  %3396 = vmatpush.bf16.msra.mxu0 %v7491_v56  ;;  %v7654_v32 = vld [vmem:[#allocation3 + $0xb98] sm:$0xf]  ;;  %v7399_v37 = vor.u32 %v9540_v8, %v7398_v31 }
 0x1d9   :  { %v7456_v58 = vld [vmem:[#allocation3 + $0xa30] sm:$0xf0]  ;;  %3422 = vmatpush.bf16.msra.mxu2 %v6215_v60  ;;  %v9604_v33 = vld [vmem:[#allocation3 + $0xbb4] sm:$0xf0] }
 0x1da   :  { %v9615_v61 = vld [vmem:[#allocation3 + $0xc14] sm:$0xf]  ;;  %v7459_v15 = vor.u32 %v9551_v57, %v7456_v58  ;;  %3409 = vmatpush.bf16.msra.mxu1 %v7747_v59  ;;  %3435 = vmatpush.bf16.msra.mxu3 %v6471_v1  ;;  %v6854_v40 = vld [vmem:[#allocation3 + $0x558] sm:$0xf]  ;;  %v7655_v46 = vor.u32 %v9604_v33, %v7654_v32  ;;  %v3230_v33 = vpop.f32.mrf.mxu3 }
 0x1db   :  { %v7712_v62 = vld [vmem:[#allocation3 + $0xc30] sm:$0xf0]  ;;  %v9404_v44 = vld [vmem:[#allocation3 + $0x574] sm:$0xf0] }
 0x1dc   :  { %v7715_v19 = vor.u32 %v9615_v61, %v7712_v62  ;;  %3397 = vmatpush.bf16.msra.mxu0 %v7459_v15  ;;  %v7110_v45 = vld [vmem:[#allocation3 + $0x758] sm:$0xf]  ;;  %v6855_v54 = vor.u32 %v9404_v44, %v6854_v40  ;;  %v3192_v15 = vadd.f32 %v3191_v6, %v10376_v47  ;;  %v3193_v44 = vpop.f32.mrf.mxu0 }
 0x1dd   :  { %3423 = vmatpush.bf16.msra.mxu2 %v6183_v43  ;;  %v9468_v48 = vld [vmem:[#allocation3 + $0x774] sm:$0xf0] }
 0x1de   :  { %3410 = vmatpush.bf16.msra.mxu1 %v7715_v19  ;;  %3436 = vmatpush.bf16.msra.mxu3 %v6439_v23  ;;  %v7366_v50 = vld [vmem:[#allocation3 + $0x958] sm:$0xf]  ;;  %v7111_v55 = vor.u32 %v9468_v48, %v7110_v45  ;;  %v3205_v23 = vadd.f32 %v3204_v16, %v3192_v15 }
 0x1df   :  { %3398 = vmatmul.bf16.vlgmr.msra.gmra.mxu0 %v10309_v42  ;;  %v9532_v51 = vld [vmem:[#allocation3 + $0x974] sm:$0xf0] }
 0x1e0   :  { %3442 = vmatpush.bf16.msrb.mxu0 %v6919_v24  ;;  %v7622_v52 = vld [vmem:[#allocation3 + $0xb58] sm:$0xf]  ;;  %3424 = vmatmul.bf16.vlgmr.msra.gmra.mxu2 %v10292_v21  ;;  %v7367_v56 = vor.u32 %v9532_v51, %v7366_v50 }
 0x1e1   :  { %3468 = vmatpush.bf16.msrb.mxu2 %v7431_v26  ;;  %3411 = vmatmul.bf16.vlgmr.msra.gmra.mxu1 %v10305_v38  ;;  %v9596_v53 = vld [vmem:[#allocation3 + $0xb74] sm:$0xf0] }
 0x1e2   :  { %3455 = vmatpush.bf16.msrb.mxu1 %v7175_v25  ;;  %3481 = vmatpush.bf16.msrb.mxu3 %v7687_v29  ;;  %v6822_v57 = vld [vmem:[#allocation3 + $0x518] sm:$0xf]  ;;  %v7623_v60 = vor.u32 %v9596_v53, %v7622_v52  ;;  %v3217_v29 = vpop.f32.mrf.mxu2  ;;  %v3206_v52 = vpop.f32.mrf.mxu1 }
 0x1e3   :  { %3437 = vmatmul.bf16.vlgmr.msra.gmra.mxu3 %v10294_v22  ;;  %v9396_v58 = vld [vmem:[#allocation3 + $0x534] sm:$0xf0]  ;;  %v3218_v32 = vadd.f32 %v3217_v29, %v3205_v23  ;;  %v6344_v52 = vld [vmem:[#allocation3 + $0x178] sm:$0xf0] }
 0x1e4   :  { %3443 = vmatpush.bf16.msrb.mxu0 %v6887_v34  ;;  %v7078_v59 = vld [vmem:[#allocation3 + $0x718] sm:$0xf]  ;;  %v6823_v4 = vor.u32 %v9396_v58, %v6822_v57 }
 0x1e5   :  { %3469 = vmatpush.bf16.msrb.mxu2 %v7399_v37  ;;  %v9460_v61 = vld [vmem:[#allocation3 + $0x734] sm:$0xf0]  ;;  %v10383_v40 = vadd.f32 %v3230_v33, %v3218_v32  ;;  %v9344_v32 = vld [vmem:[#allocation3 + $0x39c] sm:$0xf] }
 0x1e6   :  { %3456 = vmatpush.bf16.msrb.mxu1 %v7143_v14  ;;  %3482 = vmatpush.bf16.msrb.mxu3 %v7655_v46  ;;  %v7334_v62 = vld [vmem:[#allocation3 + $0x918] sm:$0xf]  ;;  %v7079_v9 = vor.u32 %v9460_v61, %v7078_v59  ;;  %v6632_v33 = vld [vmem:[#allocation3 + $0x3b8] sm:$0xf0] }
 0x1e7   :  { %v9524_v63 = vld [vmem:[#allocation3 + $0x934] sm:$0xf0]  ;;  %vm3601_vm3 = vcmp.gt.f32.partialorder %v10383_v40, 0.0 }
 0x1e8   :  { %v7590_v1 = vld [vmem:[#allocation3 + $0xb18] sm:$0xf]  ;;  %3444 = vmatpush.bf16.msrb.mxu0 %v6855_v54  ;;  %v7335_v10 = vor.u32 %v9524_v63, %v7334_v62 }
 0x1e9   :  { %v9588_v3 = vld [vmem:[#allocation3 + $0xb34] sm:$0xf0]  ;;  %3470 = vmatpush.bf16.msrb.mxu2 %v7367_v56 }
 0x1ea   :  { %3457 = vmatpush.bf16.msrb.mxu1 %v7111_v55  ;;  %v6790_v39 = vld [vmem:[#allocation3 + $0x4d8] sm:$0xf]  ;;  %3483 = vmatpush.bf16.msrb.mxu3 %v7623_v60  ;;  %v7591_v17 = vor.u32 %v9588_v3, %v7590_v1  ;;  %v3219_v6 = vpop.f32.mrf.mxu2 }
 0x1eb   :  { %v9388_v11 = vld [vmem:[#allocation3 + $0x4f4] sm:$0xf0]  ;;  %v6568_v6 = vld [vmem:[#allocation3 + $0x338] sm:$0xf0] }
 0x1ec   :  { %v7046_v12 = vld [vmem:[#allocation3 + $0x6d8] sm:$0xf]  ;;  %3445 = vmatpush.bf16.msrb.mxu0 %v6823_v4  ;;  %v6791_v24 = vor.u32 %v9388_v11, %v6790_v39 }
 0x1ed   :  { %v9452_v18 = vld [vmem:[#allocation3 + $0x6f4] sm:$0xf0]  ;;  %3471 = vmatpush.bf16.msrb.mxu2 %v7335_v10 }
 0x1ee   :  { %v7302_v19 = vld [vmem:[#allocation3 + $0x8d8] sm:$0xf]  ;;  %3458 = vmatpush.bf16.msrb.mxu1 %v7079_v9  ;;  %v7047_v25 = vor.u32 %v9452_v18, %v7046_v12  ;;  %3484 = vmatpush.bf16.msrb.mxu3 %v7591_v17  ;;  %v3232_v12 = vpop.f32.mrf.mxu3  ;;  %v9288_v17 = vld [vmem:[#allocation3 + $0x1dc] sm:$0xf] }
 0x1ef   :  { %v9516_v43 = vld [vmem:[#allocation3 + $0x8f4] sm:$0xf0]  ;;  %v3256_v12 = vpop.f32.mrf.mxu1 }
 0x1f0   :  { %v7558_v36 = vld [vmem:[#allocation3 + $0xad8] sm:$0xf]  ;;  %v7303_v26 = vor.u32 %v9516_v43, %v7302_v19  ;;  %3446 = vmatpush.bf16.msrb.mxu0 %v6791_v24  ;;  %v6408_v19 = vld [vmem:[#allocation3 + $0x1f8] sm:$0xf0] }
 0x1f1   :  { %v9580_v20 = vld [vmem:[#allocation3 + $0xaf4] sm:$0xf0]  ;;  %v9352_v43 = vld [vmem:[#allocation3 + $0x3dc] sm:$0xf] }
 0x1f2   :  { %v6758_v27 = vld [vmem:[#allocation3 + $0x498] sm:$0xf]  ;;  %v7559_v47 = vor.u32 %v9580_v20, %v7558_v36  ;;  %3459 = vmatpush.bf16.msrb.mxu1 %v7047_v25  ;;  %3472 = vmatpush.bf16.msrb.mxu2 %v7303_v26  ;;  %v6664_v36 = vld [vmem:[#allocation3 + $0x3f8] sm:$0xf0] }
 0x1f3   :  { %v9380_v49 = vld [vmem:[#allocation3 + $0x4b4] sm:$0xf0]  ;;  %v9416_v24 = vld [vmem:[#allocation3 + $0x5dc] sm:$0xf] }
 0x1f4   :  { %v7014_v28 = vld [vmem:[#allocation3 + $0x698] sm:$0xf]  ;;  %v6759_v37 = vor.u32 %v9380_v49, %v6758_v27  ;;  %3485 = vmatpush.bf16.msrb.mxu3 %v7559_v47  ;;  %v6920_v25 = vld [vmem:[#allocation3 + $0x5f8] sm:$0xf0]  ;;  %v6411_v49 = vor.u32 %v9288_v17, %v6408_v19 }
 0x1f5   :  { %v9444_v30 = vld [vmem:[#allocation3 + $0x6b4] sm:$0xf0]  ;;  %v9256_v19 = vld [vmem:[#allocation3 + $0xdc] sm:$0xf] }
 0x1f6   :  { %v7270_v31 = vld [vmem:[#allocation3 + $0x898] sm:$0xf]  ;;  %v7015_v45 = vor.u32 %v9444_v30, %v7014_v28  ;;  %3447 = vmatpush.bf16.msrb.mxu0 %v6759_v37  ;;  %v6667_v28 = vor.u32 %v9352_v43, %v6664_v36  ;;  %v9280_v30 = vld [vmem:[#allocation3 + $0x19c] sm:$0xf] }
 0x1f7   :  { %v9508_v8 = vld [vmem:[#allocation3 + $0x8b4] sm:$0xf0]  ;;  %v6280_v36 = vld [vmem:[#allocation3 + $0xf8] sm:$0xf0] }
 0x1f8   :  { %v7526_v34 = vld [vmem:[#allocation3 + $0xa98] sm:$0xf]  ;;  %v7271_v46 = vor.u32 %v9508_v8, %v7270_v31  ;;  %3460 = vmatpush.bf16.msrb.mxu1 %v7015_v45  ;;  %v6923_v31 = vor.u32 %v9416_v24, %v6920_v25  ;;  %v6376_v8 = vld [vmem:[#allocation3 + $0x1b8] sm:$0xf0]  ;;  %v6635_v45 = vor.u32 %v9344_v32, %v6632_v33 }
 0x1f9   :  { %v9572_v14 = vld [vmem:[#allocation3 + $0xab4] sm:$0xf0]  ;;  %v6379_v44 = vor.u32 %v9280_v30, %v6376_v8  ;;  %v9384_v24 = vld [vmem:[#allocation3 + $0x4dc] sm:$0xf] }
 0x1fa   :  { %v6726_v48 = vld [vmem:[#allocation3 + $0x458] sm:$0xf]  ;;  %v7527_v53 = vor.u32 %v9572_v14, %v7526_v34  ;;  %3473 = vmatpush.bf16.msrb.mxu2 %v7271_v46  ;;  %v9408_v34 = vld [vmem:[#allocation3 + $0x59c] sm:$0xf] }
 0x1fb   :  { %v9372_v50 = vld [vmem:[#allocation3 + $0x474] sm:$0xf0]  ;;  %v6888_v14 = vld [vmem:[#allocation3 + $0x5b8] sm:$0xf0] }
 0x1fc   :  { %v6982_v51 = vld [vmem:[#allocation3 + $0x658] sm:$0xf]  ;;  %v6727_v59 = vor.u32 %v9372_v50, %v6726_v48  ;;  %3486 = vmatpush.bf16.msrb.mxu3 %v7527_v53  ;;  %v9272_v50 = vld [vmem:[#allocation3 + $0x15c] sm:$0xf] }
 0x1fd   :  { %v9436_v54 = vld [vmem:[#allocation3 + $0x674] sm:$0xf0]  ;;  %v9336_v53 = vld [vmem:[#allocation3 + $0x35c] sm:$0xf] }
 0x1fe   :  { %v7238_v55 = vld [vmem:[#allocation3 + $0x858] sm:$0xf]  ;;  %v6983_v62 = vor.u32 %v9436_v54, %v6982_v51  ;;  %3448 = vmatpush.bf16.msrb.mxu0 %v6727_v59  ;;  %v6891_v51 = vor.u32 %v9408_v34, %v6888_v14  ;;  %v6600_v54 = vld [vmem:[#allocation3 + $0x378] sm:$0xf0]  ;;  %v6347_v59 = vor.u32 %v9272_v50, %v6344_v52 }
 0x1ff   :  { %v9500_v56 = vld [vmem:[#allocation3 + $0x874] sm:$0xf0]  ;;  %v6792_v25 = vld [vmem:[#allocation3 + $0x4f8] sm:$0xf0] }
 0x200   :  { %v7494_v57 = vld [vmem:[#allocation3 + $0xa58] sm:$0xf]  ;;  %v7239_v63 = vor.u32 %v9500_v56, %v7238_v55  ;;  %3461 = vmatpush.bf16.msrb.mxu1 %v6983_v62  ;;  %v9400_v55 = vld [vmem:[#allocation3 + $0x55c] sm:$0xf]  ;;  %v6795_v8 = vor.u32 %v9384_v24, %v6792_v25 }
 0x201   :  { %v9564_v58 = vld [vmem:[#allocation3 + $0xa74] sm:$0xf0]  ;;  %v6856_v56 = vld [vmem:[#allocation3 + $0x578] sm:$0xf0] }
 0x202   :  { %v6694_v60 = vld [vmem:[#allocation3 + $0x418] sm:$0xf]  ;;  %v7495_v9 = vor.u32 %v9564_v58, %v7494_v57  ;;  %3474 = vmatpush.bf16.msrb.mxu2 %v7239_v63  ;;  %v9264_v62 = vld [vmem:[#allocation3 + $0x11c] sm:$0xf]  ;;  %v593_v63 = vperm.slane %v10370_v0, 4 }
 0x203   :  { %v9364_v61 = vld [vmem:[#allocation3 + $0x434] sm:$0xf0]  ;;  %v9248_v30 = vld [vmem:[#allocation3 + $0x9c] sm:$0xf] }
 0x204   :  { %v6950_v1 = vld [vmem:[#allocation3 + $0x618] sm:$0xf]  ;;  %v6695_v18 = vor.u32 %v9364_v61, %v6694_v60  ;;  %3487 = vmatpush.bf16.msrb.mxu3 %v7495_v9  ;;  %v6603_v60 = vor.u32 %v9336_v53, %v6600_v54  ;;  %v9392_v9 = vld [vmem:[#allocation3 + $0x51c] sm:$0xf] }
 0x205   :  { %v9428_v3 = vld [vmem:[#allocation3 + $0x634] sm:$0xf0]  ;;  %v6248_v32 = vld [vmem:[#allocation3 + $0xb8] sm:$0xf0] }
 0x206   :  { %v7206_v4 = vld [vmem:[#allocation3 + $0x818] sm:$0xf]  ;;  %v6951_v20 = vor.u32 %v9428_v3, %v6950_v1  ;;  %3449 = vmatpush.bf16.msrb.mxu0 %v6695_v18  ;;  %v6859_v1 = vor.u32 %v9400_v55, %v6856_v56  ;;  %v6312_v3 = vld [vmem:[#allocation3 + $0x138] sm:$0xf0]  ;;  %v6251_v52 = vor.u32 %v9248_v30, %v6248_v32 }
 0x207   :  { %v9492_v10 = vld [vmem:[#allocation3 + $0x834] sm:$0xf0]  ;;  %v9312_v33 = vld [vmem:[#allocation3 + $0x29c] sm:$0xf] }
 0x208   :  { %v7462_v39 = vld [vmem:[#allocation3 + $0xa18] sm:$0xf]  ;;  %v7207_v23 = vor.u32 %v9492_v10, %v7206_v4  ;;  %3462 = vmatpush.bf16.msrb.mxu1 %v6951_v20  ;;  %v9328_v4 = vld [vmem:[#allocation3 + $0x31c] sm:$0xf] }
 0x209   :  { %v9556_v11 = vld [vmem:[#allocation3 + $0xa34] sm:$0xf0]  ;;  %3450 = vmatmul.bf16.vlgmr.msrb.gmra.mxu0 %v10284_v5  ;;  %v6824_v10 = vld [vmem:[#allocation3 + $0x538] sm:$0xf0] }
 0x20a   :  { %v7942_v15 = vld [vmem:[#allocation3 + $0xdd8] sm:$0xf]  ;;  %v7463_v26 = vor.u32 %v9556_v11, %v7462_v39  ;;  %3475 = vmatpush.bf16.msrb.mxu2 %v7207_v23  ;;  %v3243_v11 = vpop.f32.mrf.mxu0  ;;  %v6827_v0 = vor.u32 %v9392_v9, %v6824_v10  ;;  %v9320_v20 = vld [vmem:[#allocation3 + $0x2dc] sm:$0xf] }
 0x20b   :  { %v9676_v16 = vld [vmem:[#allocation3 + $0xdf4] sm:$0xf0]  ;;  %3463 = vmatmul.bf16.vlgmr.msrb.gmra.mxu1 %v10289_v7  ;;  %v3244_v43 = vadd.f32 %v3243_v11, %v593_v63  ;;  %v6536_v23 = vld [vmem:[#allocation3 + $0x2f8] sm:$0xf0] }
 0x20c   :  { %v7943_v27 = vor.u32 %v9676_v16, %v7942_v15  ;;  %v7910_v29 = vld [vmem:[#allocation3 + $0xd98] sm:$0xf]  ;;  %3488 = vmatpush.bf16.msrb.mxu3 %v7463_v26  ;;  %3507 = vmatpush.bf16.msra.mxu1 %v6411_v49  ;;  %v6315_v15 = vor.u32 %v9264_v62, %v6312_v3  ;;  %v6571_v16 = vor.u32 %v9328_v4, %v6568_v6  ;;  %v6504_v34 = vld [vmem:[#allocation3 + $0x2b8] sm:$0xf0] }
 0x20d   :  { %v9668_v47 = vld [vmem:[#allocation3 + $0xdb4] sm:$0xf0]  ;;  %3476 = vmatmul.bf16.vlgmr.msrb.gmra.mxu2 %v10307_v41  ;;  %v3257_v26 = vadd.f32 %v3256_v12, %v3244_v43  ;;  %v6283_v49 = vor.u32 %v9256_v19, %v6280_v36  ;;  %v6507_v53 = vor.u32 %v9312_v33, %v6504_v34  ;;  %v9240_v56 = vld [vmem:[#allocation3 + $0x5c] sm:$0xf] }
 0x20e   :  { %3494 = vmatpush.bf16.msra.mxu0 %v7943_v27  ;;  %v7911_v37 = vor.u32 %v9668_v47, %v7910_v29  ;;  %3520 = vmatpush.bf16.msra.mxu2 %v6667_v28  ;;  %v7878_v46 = vld [vmem:[#allocation3 + $0xd58] sm:$0xf]  ;;  %v6539_v28 = vor.u32 %v9320_v20, %v6536_v23  ;;  %v6728_v62 = vld [vmem:[#allocation3 + $0x478] sm:$0xf0] }
 0x20f   :  { %v9660_v48 = vld [vmem:[#allocation3 + $0xd74] sm:$0xf0]  ;;  %3489 = vmatmul.bf16.vlgmr.msrb.gmra.mxu3 %v10309_v42  ;;  %v9232_v9 = vld [vmem:[#allocation3 + $0x1c] sm:$0xf] }
 0x210   :  { %3533 = vmatpush.bf16.msra.mxu3 %v6923_v31  ;;  %v7879_v57 = vor.u32 %v9660_v48, %v7878_v46  ;;  %v7846_v58 = vld [vmem:[#allocation3 + $0xd18] sm:$0xf]  ;;  %3508 = vmatpush.bf16.msra.mxu1 %v6379_v44  ;;  %v3269_v31 = vpop.f32.mrf.mxu2  ;;  %v6760_v44 = vld [vmem:[#allocation3 + $0x4b8] sm:$0xf0] }
 0x211   :  { %v9652_v61 = vld [vmem:[#allocation3 + $0xd34] sm:$0xf0]  ;;  %v3270_v14 = vadd.f32 %v3269_v31, %v3257_v26  ;;  %v6184_v10 = vld [vmem:[#allocation3 + $0x38] sm:$0xf0] }
 0x212   :  { %3495 = vmatpush.bf16.msra.mxu0 %v7911_v37  ;;  %3521 = vmatpush.bf16.msra.mxu2 %v6635_v45  ;;  %v7847_v39 = vor.u32 %v9652_v61, %v7846_v58  ;;  %v7814_v17 = vld [vmem:[#allocation3 + $0xcd8] sm:$0xf]  ;;  %v9376_v37 = vld [vmem:[#allocation3 + $0x49c] sm:$0xf]  ;;  %v3282_v45 = vpop.f32.mrf.mxu3  ;;  %v3245_v48 = vpop.f32.mrf.mxu0  ;;  %v6187_v25 = vor.u32 %v9232_v9, %v6184_v10 }
 0x213   :  { %v9644_v18 = vld [vmem:[#allocation3 + $0xcf4] sm:$0xf0]  ;;  %v10390_v50 = vadd.f32 %v3282_v45, %v3270_v14  ;;  %v6216_v58 = vld [vmem:[#allocation3 + $0x78] sm:$0xf0] }
 0x214   :  { %3534 = vmatpush.bf16.msra.mxu3 %v6891_v51  ;;  %3509 = vmatpush.bf16.msra.mxu1 %v6347_v59  ;;  %v7815_v27 = vor.u32 %v9644_v18, %v7814_v17  ;;  %v7782_v29 = vld [vmem:[#allocation3 + $0xc98] sm:$0xf]  ;;  %v3258_v51 = vpop.f32.mrf.mxu1  ;;  %v9304_v59 = vld [vmem:[#allocation3 + $0x25c] sm:$0xf]  ;;  %v6219_v4 = vor.u32 %v9240_v56, %v6216_v58 }
 0x215   :  { %v9636_v47 = vld [vmem:[#allocation3 + $0xcb4] sm:$0xf0]  ;;  %v9368_v61 = vld [vmem:[#allocation3 + $0x45c] sm:$0xf] }
 0x216   :  { %3496 = vmatpush.bf16.msra.mxu0 %v7879_v57  ;;  %3522 = vmatpush.bf16.msra.mxu2 %v6603_v60  ;;  %v7783_v46 = vor.u32 %v9636_v47, %v7782_v29  ;;  %v7750_v54 = vld [vmem:[#allocation3 + $0xc58] sm:$0xf]  ;;  %v6763_v57 = vor.u32 %v9376_v37, %v6760_v44  ;;  %v6472_v60 = vld [vmem:[#allocation3 + $0x278] sm:$0xf0]  ;;  %v6731_v12 = vor.u32 %v9368_v61, %v6728_v62 }
 0x217   :  { %v9628_v55 = vld [vmem:[#allocation3 + $0xc74] sm:$0xf0]  ;;  %v6475_v6 = vor.u32 %v9304_v59, %v6472_v60  ;;  %v6696_v17 = vld [vmem:[#allocation3 + $0x438] sm:$0xf0] }
 0x218   :  { %3535 = vmatpush.bf16.msra.mxu3 %v6859_v1  ;;  %3510 = vmatpush.bf16.msra.mxu1 %v6315_v15  ;;  %v7751_v63 = vor.u32 %v9628_v55, %v7750_v54  ;;  %v7718_v1 = vld [vmem:[#allocation3 + $0xc18] sm:$0xf]  ;;  %v3271_v11 = vpop.f32.mrf.mxu2  ;;  %v6440_v15 = vld [vmem:[#allocation3 + $0x238] sm:$0xf0] }
 0x219   :  { %v9620_v3 = vld [vmem:[#allocation3 + $0xc34] sm:$0xf0]  ;;  %v9480_v18 = vld [vmem:[#allocation3 + $0x7dc] sm:$0xf] }
 0x21a   :  { %3497 = vmatpush.bf16.msra.mxu0 %v7847_v39  ;;  %3523 = vmatpush.bf16.msra.mxu2 %v6571_v16  ;;  %v9296_v39 = vld [vmem:[#allocation3 + $0x21c] sm:$0xf]  ;;  %v7719_v36 = vor.u32 %v9620_v3, %v7718_v1 }
 0x21b   :  { %v9360_v16 = vld [vmem:[#allocation3 + $0x41c] sm:$0xf]  ;;  %v6443_v26 = vor.u32 %v9296_v39, %v6440_v15 }
 0x21c   :  { %3536 = vmatpush.bf16.msra.mxu3 %v6827_v0  ;;  %3511 = vmatpush.bf16.msra.mxu1 %v6283_v49  ;;  %v7176_v19 = vld [vmem:[#allocation3 + $0x7f8] sm:$0xf0]  ;;  %v3284_v0 = vpop.f32.mrf.mxu3  ;;  %v3308_v15 = vpop.f32.mrf.mxu1 }
 0x21d   :  { %v9544_v43 = vld [vmem:[#allocation3 + $0x9dc] sm:$0xf]  ;;  %v7179_v29 = vor.u32 %v9480_v18, %v7176_v19 }
 0x21e   :  { %3498 = vmatpush.bf16.msra.mxu0 %v7815_v27  ;;  %3524 = vmatpush.bf16.msra.mxu2 %v6539_v28  ;;  %v7432_v20 = vld [vmem:[#allocation3 + $0x9f8] sm:$0xf0]  ;;  %v6699_v28 = vor.u32 %v9360_v16, %v6696_v17 }
 0x21f   :  { %v9608_v23 = vld [vmem:[#allocation3 + $0xbdc] sm:$0xf]  ;;  %v7435_v47 = vor.u32 %v9544_v43, %v7432_v20 }
 0x220   :  { %3537 = vmatpush.bf16.msra.mxu3 %v6795_v8  ;;  %3512 = vmatpush.bf16.msra.mxu1 %v6251_v52  ;;  %v7688_v24 = vld [vmem:[#allocation3 + $0xbf8] sm:$0xf0] }
 0x221   :  { %v9672_v27 = vld [vmem:[#allocation3 + $0xddc] sm:$0xf]  ;;  %v7691_v30 = vor.u32 %v9608_v23, %v7688_v24 }
 0x222   :  { %3499 = vmatpush.bf16.msra.mxu0 %v7783_v46  ;;  %3525 = vmatpush.bf16.msra.mxu2 %v6507_v53  ;;  %v7944_v49 = vld [vmem:[#allocation3 + $0xdf8] sm:$0xf0] }
 0x223   :  { %v9472_v31 = vld [vmem:[#allocation3 + $0x79c] sm:$0xf]  ;;  %v7947_v33 = vor.u32 %v9672_v27, %v7944_v49 }
 0x224   :  { %3538 = vmatpush.bf16.msra.mxu3 %v6763_v57  ;;  %3513 = vmatpush.bf16.msra.mxu1 %v6219_v4  ;;  %v7144_v8 = vld [vmem:[#allocation3 + $0x7b8] sm:$0xf0] }
 0x225   :  { %v9536_v32 = vld [vmem:[#allocation3 + $0x99c] sm:$0xf]  ;;  %v7147_v46 = vor.u32 %v9472_v31, %v7144_v8  ;;  %v3321_v31 = vpop.f32.mrf.mxu2 }
 0x226   :  { %3500 = vmatpush.bf16.msra.mxu0 %v7751_v63  ;;  %3526 = vmatpush.bf16.msra.mxu2 %v6475_v6  ;;  %v7400_v34 = vld [vmem:[#allocation3 + $0x9b8] sm:$0xf0] }
 0x227   :  { %v9600_v14 = vld [vmem:[#allocation3 + $0xb9c] sm:$0xf]  ;;  %v7403_v48 = vor.u32 %v9536_v32, %v7400_v34 }
 0x228   :  { %3539 = vmatpush.bf16.msra.mxu3 %v6731_v12  ;;  %v7656_v37 = vld [vmem:[#allocation3 + $0xbb8] sm:$0xf0]  ;;  %3514 = vmatpush.bf16.msra.mxu1 %v6187_v25  ;;  %v3295_v12 = vpop.f32.mrf.mxu0 }
 0x229   :  { %v9664_v44 = vld [vmem:[#allocation3 + $0xd9c] sm:$0xf]  ;;  %v7659_v51 = vor.u32 %v9600_v14, %v7656_v37  ;;  %v3296_v43 = vadd.f32 %v3295_v12, %v10390_v50 }
 0x22a   :  { %3501 = vmatpush.bf16.msra.mxu0 %v7719_v36  ;;  %3527 = vmatpush.bf16.msra.mxu2 %v6443_v26  ;;  %v7912_v45 = vld [vmem:[#allocation3 + $0xdb8] sm:$0xf0] }
 0x22b   :  { %v9464_v52 = vld [vmem:[#allocation3 + $0x75c] sm:$0xf]  ;;  %v7915_v55 = vor.u32 %v9664_v44, %v7912_v45  ;;  %3515 = vmatmul.bf16.vlgmr.msra.gmra.mxu1 %v10292_v21  ;;  %v3309_v26 = vadd.f32 %v3308_v15, %v3296_v43  ;;  %v10399_v44 = vpop.f32.mrf.mxu3  ;;  %v8062_v15 = vld [vmem:[#allocation7 + $0xe0] sm:$0xf] }
 0x22c   :  { %3540 = vmatpush.bf16.msra.mxu3 %v6699_v28  ;;  %3559 = vmatpush.bf16.msrb.mxu1 %v7435_v47  ;;  %v7112_v53 = vld [vmem:[#allocation3 + $0x778] sm:$0xf0]  ;;  %v8318_v43 = vld [vmem:[#allocation7 + $0x2e0] sm:$0xf] }
 0x22d   :  { %v9528_v54 = vld [vmem:[#allocation3 + $0x95c] sm:$0xf]  ;;  %3502 = vmatmul.bf16.vlgmr.msra.gmra.mxu0 %v10305_v38  ;;  %3528 = vmatmul.bf16.vlgmr.msra.gmra.mxu2 %v10294_v22  ;;  %v7115_v61 = vor.u32 %v9464_v52, %v7112_v53  ;;  %v10397_v34 = vadd.f32 %v3321_v31, %v3309_v26  ;;  %v9735_v31 = vld [vmem:[#allocation7 + $0x1cc] sm:$0xf0] }
 0x22e   :  { %3546 = vmatpush.bf16.msrb.mxu0 %v7179_v29  ;;  %3572 = vmatpush.bf16.msrb.mxu2 %v7691_v30  ;;  %v7368_v56 = vld [vmem:[#allocation3 + $0x978] sm:$0xf0] }
 0x22f   :  { %v9592_v57 = vld [vmem:[#allocation3 + $0xb5c] sm:$0xf]  ;;  %3541 = vmatmul.bf16.vlgmr.msra.gmra.mxu3 %v10284_v5  ;;  %v7371_v62 = vor.u32 %v9528_v54, %v7368_v56  ;;  %vm3602_vm4 = vcmp.gt.f32.partialorder %v10397_v34, 0.0 }
 0x230   :  { %3585 = vmatpush.bf16.msrb.mxu3 %v7947_v33  ;;  %v7624_v58 = vld [vmem:[#allocation3 + $0xb78] sm:$0xf0]  ;;  %3560 = vmatpush.bf16.msrb.mxu1 %v7403_v48  ;;  %v3310_v48 = vpop.f32.mrf.mxu1 }
 0x231   :  { %v9656_v59 = vld [vmem:[#allocation3 + $0xd5c] sm:$0xf]  ;;  %v7627_v63 = vor.u32 %v9592_v57, %v7624_v58  ;;  %v9699_v48 = vld [vmem:[#allocation7 + $0xac] sm:$0xf0] }
 0x232   :  { %v7880_v60 = vld [vmem:[#allocation3 + $0xd78] sm:$0xf0]  ;;  %3547 = vmatpush.bf16.msrb.mxu0 %v7147_v46  ;;  %3573 = vmatpush.bf16.msrb.mxu2 %v7659_v51  ;;  %v3297_v46 = vpop.f32.mrf.mxu0 }
 0x233   :  { %v9456_v1 = vld [vmem:[#allocation3 + $0x71c] sm:$0xf]  ;;  %v7883_v6 = vor.u32 %v9656_v59, %v7880_v60  ;;  %v8030_v46 = vld [vmem:[#allocation7 + $0xa0] sm:$0xf] }
 0x234   :  { %v7080_v3 = vld [vmem:[#allocation3 + $0x738] sm:$0xf0]  ;;  %3586 = vmatpush.bf16.msrb.mxu3 %v7915_v55  ;;  %3561 = vmatpush.bf16.msrb.mxu1 %v7371_v62 }
 0x235   :  { %v9520_v4 = vld [vmem:[#allocation3 + $0x91c] sm:$0xf]  ;;  %v7083_v5 = vor.u32 %v9456_v1, %v7080_v3 }
 0x236   :  { %v7336_v9 = vld [vmem:[#allocation3 + $0x938] sm:$0xf0]  ;;  %3548 = vmatpush.bf16.msrb.mxu0 %v7115_v61  ;;  %3574 = vmatpush.bf16.msrb.mxu2 %v7627_v63 }
 0x237   :  { %v9584_v10 = vld [vmem:[#allocation3 + $0xb1c] sm:$0xf]  ;;  %v7339_v21 = vor.u32 %v9520_v4, %v7336_v9 }
 0x238   :  { %v7592_v22 = vld [vmem:[#allocation3 + $0xb38] sm:$0xf0]  ;;  %3587 = vmatpush.bf16.msrb.mxu3 %v7883_v6 }
 0x239   :  { %v9648_v39 = vld [vmem:[#allocation3 + $0xd1c] sm:$0xf]  ;;  %v7595_v16 = vor.u32 %v9584_v10, %v7592_v22  ;;  %3562 = vmatpush.bf16.msrb.mxu1 %v7339_v21  ;;  %v3323_v22 = vpop.f32.mrf.mxu2  ;;  %v9707_v21 = vld [vmem:[#allocation7 + $0xec] sm:$0xf0] }
 0x23a   :  { %v7848_v11 = vld [vmem:[#allocation3 + $0xd38] sm:$0xf0]  ;;  %3549 = vmatpush.bf16.msrb.mxu0 %v7083_v5  ;;  %v8063_v26 = vor.u32 %v9707_v21, %v8062_v15  ;;  %v7998_v22 = vld [vmem:[#allocation7 + $0x60] sm:$0xf]  ;;  %v9723_v15 = vld [vmem:[#allocation7 + $0x16c] sm:$0xf0] }
 0x23b   :  { %v9448_v17 = vld [vmem:[#allocation3 + $0x6dc] sm:$0xf]  ;;  %v7851_v0 = vor.u32 %v9648_v39, %v7848_v11  ;;  %3575 = vmatpush.bf16.msrb.mxu2 %v7595_v16  ;;  %v8190_v16 = vld [vmem:[#allocation7 + $0x1e0] sm:$0xf] }
 0x23c   :  { %v7048_v18 = vld [vmem:[#allocation3 + $0x6f8] sm:$0xf0]  ;;  %v8254_v21 = vld [vmem:[#allocation7 + $0x260] sm:$0xf] }
 0x23d   :  { %v9512_v19 = vld [vmem:[#allocation3 + $0x8dc] sm:$0xf]  ;;  %v7051_v27 = vor.u32 %v9448_v17, %v7048_v18  ;;  %3588 = vmatpush.bf16.msrb.mxu3 %v7851_v0  ;;  %v3336_v17 = vpop.f32.mrf.mxu3  ;;  %v9771_v0 = vld [vmem:[#allocation7 + $0x2ec] sm:$0xf0] }
 0x23e   :  { %v7304_v36 = vld [vmem:[#allocation3 + $0x8f8] sm:$0xf0]  ;;  %v8382_v17 = vld [vmem:[#allocation7 + $0x360] sm:$0xf] }
 0x23f   :  { %v9576_v20 = vld [vmem:[#allocation3 + $0xadc] sm:$0xf]  ;;  %v7307_v49 = vor.u32 %v9512_v19, %v7304_v36  ;;  %3550 = vmatpush.bf16.msrb.mxu0 %v7051_v27  ;;  %v9739_v19 = vld [vmem:[#allocation7 + $0x1ec] sm:$0xf0] }
 0x240   :  { %v7560_v23 = vld [vmem:[#allocation3 + $0xaf8] sm:$0xf0]  ;;  %v8191_v27 = vor.u32 %v9739_v19, %v8190_v16  ;;  %v9755_v16 = vld [vmem:[#allocation7 + $0x26c] sm:$0xf0] }
 0x241   :  { %v9640_v24 = vld [vmem:[#allocation3 + $0xcdc] sm:$0xf]  ;;  %v7563_v28 = vor.u32 %v9576_v20, %v7560_v23  ;;  %3563 = vmatpush.bf16.msrb.mxu1 %v7307_v49  ;;  %v8446_v23 = vld [vmem:[#allocation7 + $0x3e0] sm:$0xf]  ;;  %v8319_v49 = vor.u32 %v9771_v0, %v8318_v43  ;;  %v8255_v0 = vor.u32 %v9755_v16, %v8254_v21  ;;  %v9867_v21 = vld [vmem:[#allocation7 + $0x5ec] sm:$0xf0] }
 0x242   :  { %v7816_v25 = vld [vmem:[#allocation3 + $0xcf8] sm:$0xf0] }
 0x243   :  { %v9440_v29 = vld [vmem:[#allocation3 + $0x69c] sm:$0xf]  ;;  %v7819_v50 = vor.u32 %v9640_v24, %v7816_v25  ;;  %3576 = vmatpush.bf16.msrb.mxu2 %v7563_v28  ;;  %v9803_v24 = vld [vmem:[#allocation7 + $0x3ec] sm:$0xf0]  ;;  %v8046_v28 = vld [vmem:[#allocation7 + $0xc0] sm:$0xf] }
 0x244   :  { %v7016_v47 = vld [vmem:[#allocation3 + $0x6b8] sm:$0xf0] }
 0x245   :  { %v9504_v30 = vld [vmem:[#allocation3 + $0x89c] sm:$0xf]  ;;  %v7019_v45 = vor.u32 %v9440_v29, %v7016_v47  ;;  %3589 = vmatpush.bf16.msrb.mxu3 %v7819_v50  ;;  %v9703_v29 = vld [vmem:[#allocation7 + $0xcc] sm:$0xf0]  ;;  %v8174_v47 = vld [vmem:[#allocation7 + $0x1c0] sm:$0xf] }
 0x246   :  { %v7272_v8 = vld [vmem:[#allocation3 + $0x8b8] sm:$0xf0]  ;;  %v8302_v50 = vld [vmem:[#allocation7 + $0x2c0] sm:$0xf] }
 0x247   :  { %v9568_v32 = vld [vmem:[#allocation3 + $0xa9c] sm:$0xf]  ;;  %v7275_v51 = vor.u32 %v9504_v30, %v7272_v8  ;;  %3551 = vmatpush.bf16.msrb.mxu0 %v7019_v45  ;;  %v8447_v30 = vor.u32 %v9803_v24, %v8446_v23  ;;  %v9767_v8 = vld [vmem:[#allocation7 + $0x2cc] sm:$0xf0]  ;;  %v8110_v23 = vld [vmem:[#allocation7 + $0x140] sm:$0xf]  ;;  %v10409_v24 = vpop.f32.mrf.mxu2 }
 0x248   :  { %v7528_v33 = vld [vmem:[#allocation3 + $0xab8] sm:$0xf0]  ;;  %v8303_v45 = vor.u32 %v9767_v8, %v8302_v50 }
 0x249   :  { %v9632_v14 = vld [vmem:[#allocation3 + $0xc9c] sm:$0xf]  ;;  %v7531_v52 = vor.u32 %v9568_v32, %v7528_v33  ;;  %3564 = vmatpush.bf16.msrb.mxu1 %v7275_v51  ;;  %v8430_v32 = vld [vmem:[#allocation7 + $0x3c0] sm:$0xf]  ;;  %v9799_v33 = vld [vmem:[#allocation7 + $0x3cc] sm:$0xf0] }
 0x24a   :  { %v7784_v37 = vld [vmem:[#allocation3 + $0xcb8] sm:$0xf0]  ;;  %v8158_v51 = vld [vmem:[#allocation7 + $0x1a0] sm:$0xf] }
 0x24b   :  { %v9432_v53 = vld [vmem:[#allocation3 + $0x65c] sm:$0xf]  ;;  %v7787_v56 = vor.u32 %v9632_v14, %v7784_v37  ;;  %3577 = vmatpush.bf16.msrb.mxu2 %v7531_v52  ;;  %v8047_v14 = vor.u32 %v9703_v29, %v8046_v28  ;;  %v8175_v37 = vor.u32 %v9735_v31, %v8174_v47  ;;  %v8431_v52 = vor.u32 %v9799_v33, %v8430_v32  ;;  %v10411_v28 = vpop.f32.mrf.mxu3  ;;  %v8366_v29 = vld [vmem:[#allocation7 + $0x340] sm:$0xf]  ;;  %v9783_v47 = vld [vmem:[#allocation7 + $0x34c] sm:$0xf0] }
 0x24c   :  { %v6984_v54 = vld [vmem:[#allocation3 + $0x678] sm:$0xf0]  ;;  %v7966_v33 = vld [vmem:[#allocation7 + $0x20] sm:$0xf] }
 0x24d   :  { %v9496_v55 = vld [vmem:[#allocation3 + $0x85c] sm:$0xf]  ;;  %v6987_v62 = vor.u32 %v9432_v53, %v6984_v54  ;;  %3590 = vmatpush.bf16.msrb.mxu3 %v7787_v56  ;;  %v9731_v53 = vld [vmem:[#allocation7 + $0x1ac] sm:$0xf0]  ;;  %v8286_v54 = vld [vmem:[#allocation7 + $0x2a0] sm:$0xf] }
 0x24e   :  { %v7240_v57 = vld [vmem:[#allocation3 + $0x878] sm:$0xf0]  ;;  %v8414_v56 = vld [vmem:[#allocation7 + $0x3a0] sm:$0xf] }
 0x24f   :  { %v9560_v58 = vld [vmem:[#allocation3 + $0xa5c] sm:$0xf]  ;;  %v7243_v3 = vor.u32 %v9496_v55, %v7240_v57  ;;  %3552 = vmatpush.bf16.msrb.mxu0 %v6987_v62  ;;  %v9763_v55 = vld [vmem:[#allocation7 + $0x2ac] sm:$0xf0]  ;;  %v8142_v62 = vld [vmem:[#allocation7 + $0x180] sm:$0xf] }
 0x250   :  { %v7496_v59 = vld [vmem:[#allocation3 + $0xa78] sm:$0xf0]  ;;  %v9795_v57 = vld [vmem:[#allocation7 + $0x3ac] sm:$0xf0] }
 0x251   :  { %v9624_v60 = vld [vmem:[#allocation3 + $0xc5c] sm:$0xf]  ;;  %v7499_v4 = vor.u32 %v9560_v58, %v7496_v59  ;;  %3565 = vmatpush.bf16.msrb.mxu1 %v7243_v3  ;;  %v8031_v58 = vor.u32 %v9699_v48, %v8030_v46  ;;  %v8159_v59 = vor.u32 %v9731_v53, %v8158_v51  ;;  %v8270_v3 = vld [vmem:[#allocation7 + $0x280] sm:$0xf]  ;;  %v8367_v46 = vor.u32 %v9783_v47, %v8366_v29  ;;  %v9715_v48 = vld [vmem:[#allocation7 + $0x12c] sm:$0xf0] }
 0x252   :  { %v7752_v61 = vld [vmem:[#allocation3 + $0xc78] sm:$0xf0]  ;;  %v8222_v51 = vld [vmem:[#allocation7 + $0x220] sm:$0xf]  ;;  %v3607_v53 = vmul.f32 0.2, %v10354_v13 }
 0x253   :  { %v9424_v63 = vld [vmem:[#allocation3 + $0x61c] sm:$0xf]  ;;  %v7755_v39 = vor.u32 %v9624_v60, %v7752_v61  ;;  %3578 = vmatpush.bf16.msrb.mxu2 %v7499_v4  ;;  %v8287_v60 = vor.u32 %v9763_v55, %v8286_v54  ;;  %v8014_v61 = vld [vmem:[#allocation7 + $0x80] sm:$0xf]  ;;  %v9779_v55 = vld [vmem:[#allocation7 + $0x32c] sm:$0xf0] }
 0x254   :  { %v6952_v1 = vld [vmem:[#allocation3 + $0x638] sm:$0xf0]  ;;  %v8398_v4 = vld [vmem:[#allocation7 + $0x380] sm:$0xf]  ;;  %v9863_v47 = vld [vmem:[#allocation7 + $0x5cc] sm:$0xf0] }
 0x255   :  { %v9488_v6 = vld [vmem:[#allocation3 + $0x81c] sm:$0xf]  ;;  %v6955_v18 = vor.u32 %v9424_v63, %v6952_v1  ;;  %3591 = vmatpush.bf16.msrb.mxu3 %v7755_v39  ;;  %v8415_v63 = vor.u32 %v9795_v57, %v8414_v56  ;;  %v9727_v1 = vld [vmem:[#allocation7 + $0x18c] sm:$0xf0]  ;;  %v8350_v54 = vld [vmem:[#allocation7 + $0x320] sm:$0xf] }
 0x256   :  { %v7208_v9 = vld [vmem:[#allocation3 + $0x838] sm:$0xf0]  ;;  %v9691_v39 = vld [vmem:[#allocation7 + $0x6c] sm:$0xf0]  ;;  %v3608_v56 = vmul.f32 0.2, %v10374_v2 }
 0x257   :  { %v9552_v10 = vld [vmem:[#allocation3 + $0xa1c] sm:$0xf]  ;;  %v7211_v36 = vor.u32 %v9488_v6, %v7208_v9  ;;  %3553 = vmatpush.bf16.msrb.mxu0 %v6955_v18  ;;  %v10405_v9 = vpop.f32.mrf.mxu0  ;;  %v9787_v18 = vld [vmem:[#allocation7 + $0x36c] sm:$0xf0]  ;;  %v7999_v19 = vor.u32 %v9691_v39, %v7998_v22  ;;  %v10419_v57 = vld [vmem:[#allocation5] sm:$0xff] }
 0x258   :  { %v7464_v11 = vld [vmem:[#allocation3 + $0xa38] sm:$0xf0]  ;;  %v8574_v22 = vld [vmem:[#allocation7 + $0x4e0] sm:$0xf]  ;;  %v9835_v39 = vld [vmem:[#allocation7 + $0x4ec] sm:$0xf0] }
 0x259   :  { %v9616_v5 = vld [vmem:[#allocation3 + $0xc1c] sm:$0xf]  ;;  %v7467_v20 = vor.u32 %v9552_v10, %v7464_v11  ;;  %3566 = vmatpush.bf16.msrb.mxu1 %v7211_v36  ;;  %v8126_v11 = vld [vmem:[#allocation7 + $0x160] sm:$0xf] }
 0x25a   :  { %v7720_v12 = vld [vmem:[#allocation3 + $0xc38] sm:$0xf0]  ;;  %3554 = vmatmul.bf16.vlgmr.msrb.gmra.mxu0 %v10289_v7  ;;  %v9695_v7 = vld [vmem:[#allocation7 + $0x8c] sm:$0xf0]  ;;  %v8127_v43 = vor.u32 %v9723_v15, %v8126_v11  ;;  %v7982_v36 = vld [vmem:[#allocation7 + $0x40] sm:$0xf] }
 0x25b   :  { %v7723_v25 = vor.u32 %v9616_v5, %v7720_v12  ;;  %3579 = vmatpush.bf16.msrb.mxu2 %v7467_v20  ;;  %5176 = vmatpush.bf16.msra.mxu0 %v8063_v26  ;;  %v8015_v6 = vor.u32 %v9695_v7, %v8014_v61  ;;  %v10407_v5 = vpop.f32.mrf.mxu1  ;;  %v9687_v20 = vld [vmem:[#allocation7 + $0x4c] sm:$0xf0]  ;;  %v3609_v11 = vmul.f32 0.2, %v10383_v40  ;;  %v8702_v15 = vld [vmem:[#allocation7 + $0x5e0] sm:$0xf] }
 0x25c   :  { %3567 = vmatmul.bf16.vlgmr.msrb.gmra.mxu1 %v10307_v41  ;;  %v9759_v41 = vld [vmem:[#allocation7 + $0x28c] sm:$0xf0]  ;;  %v7983_v31 = vor.u32 %v9687_v20, %v7982_v36  ;;  %v3615_v20 = vsel %vm3599_vm1, %v10354_v13, %v3607_v53  ;;  %v8686_v29 = vld [vmem:[#allocation7 + $0x5c0] sm:$0xf]  ;;  %vm6146_vm1 = vcmask 7168  }
 0x25d   :  { %3592 = vmatpush.bf16.msrb.mxu3 %v7723_v25  ;;  %5189 = vmatpush.bf16.msra.mxu1 %v8191_v27  ;;  %v8271_v10 = vor.u32 %v9759_v41, %v8270_v3  ;;  %v8383_v25 = vor.u32 %v9787_v18, %v8382_v17  ;;  %v9719_v26 = vld [vmem:[#allocation7 + $0x14c] sm:$0xf0]  ;;  %v8238_v27 = vld [vmem:[#allocation7 + $0x240] sm:$0xf]  ;;  %v3375_v3 = vpop.f32.mrf.mxu2  ;;  %v8351_v41 = vor.u32 %v9779_v55, %v8350_v54 }
 0x25e   :  { %3580 = vmatmul.bf16.vlgmr.msrb.gmra.mxu2 %v10309_v42  ;;  %v9791_v42 = vld [vmem:[#allocation7 + $0x38c] sm:$0xf0]  ;;  %v8111_v8 = vor.u32 %v9719_v26, %v8110_v23  ;;  %v3616_v23 = vsel %vm3600_vm2, %v10374_v2, %v3608_v56  ;;  %v8703_v26 = vor.u32 %v9867_v21, %v8702_v15  ;;  %v8526_v55 = vld [vmem:[#allocation7 + $0x480] sm:$0xf] }
 0x25f   :  { %5202 = vmatpush.bf16.msra.mxu2 %v8319_v49  ;;  %5177 = vmatpush.bf16.msra.mxu0 %v8047_v14  ;;  %v8399_v12 = vor.u32 %v9791_v42, %v8398_v4  ;;  %v9751_v49 = vld [vmem:[#allocation7 + $0x24c] sm:$0xf0]  ;;  %v3349_v50 = vpop.f32.mrf.mxu0  ;;  %v8206_v4 = vld [vmem:[#allocation7 + $0x200] sm:$0xf]  ;;  %v10441_v2 = vpack.c.bf16 %v3616_v23, %v3616_v23 }
 0x260   :  { %3593 = vmatmul.bf16.vlgmr.msrb.gmra.mxu3 %v10305_v38  ;;  %v8143_v38 = vor.u32 %v9727_v1, %v8142_v62  ;;  %v8239_v32 = vor.u32 %v9751_v49, %v8238_v27  ;;  %v9683_v14 = vld [vmem:[#allocation7 + $0x2c] sm:$0xf0]  ;;  %v8558_v27 = vld [vmem:[#allocation7 + $0x4c0] sm:$0xf] }
 0x261   :  { %5215 = vmatpush.bf16.msra.mxu3 %v8447_v30  ;;  %5190 = vmatpush.bf16.msra.mxu1 %v8175_v37  ;;  %v3606_v30 = vmul.f32 0.2, %v10337_v35  ;;  %v8094_v37 = vld [vmem:[#allocation7 + $0x120] sm:$0xf]  ;;  %v9679_v62 = vld [vmem:[#allocation7 + $0xc] sm:$0xf0] }
 0x262   :  { %v8095_v61 = vor.u32 %v9715_v48, %v8094_v37  ;;  %v9711_v1 = vld [vmem:[#allocation7 + $0x10c] sm:$0xf0]  ;;  %v8814_v50 = vld [vmem:[#allocation7 + $0x6c0] sm:$0xf] }
 0x263   :  { %5203 = vmatpush.bf16.msra.mxu2 %v8303_v45  ;;  %5178 = vmatpush.bf16.msra.mxu0 %v8031_v58  ;;  %v3362_v45 = vpop.f32.mrf.mxu1  ;;  %v594_v58 = vperm.slane %v10419_v57, 5  ;;  %v9743_v42 = vld [vmem:[#allocation7 + $0x20c] sm:$0xf0]  ;;  %v3614_v18 = vsel %vm3598_vm0, %v10337_v35, %v3606_v30  ;;  %v3617_v35 = vsel %vm3601_vm3, %v10383_v40, %v3609_v11  ;;  %v8494_v15 = vld [vmem:[#allocation7 + $0x440] sm:$0xf] }
 0x264   :  { %v8207_v17 = vor.u32 %v9743_v42, %v8206_v4  ;;  %v9899_v36 = vld [vmem:[#allocation7 + $0x6ec] sm:$0xf0]  ;;  %v10437_v30 = vpack.c.bf16 %v3614_v18, %v3614_v18  ;;  %v8670_v45 = vld [vmem:[#allocation7 + $0x5a0] sm:$0xf] }
 0x265   :  { %5216 = vmatpush.bf16.msra.mxu3 %v8431_v52  ;;  %5191 = vmatpush.bf16.msra.mxu1 %v8159_v59  ;;  %v9747_v52 = vld [vmem:[#allocation7 + $0x22c] sm:$0xf0]  ;;  %v7967_v59 = vor.u32 %v9683_v14, %v7966_v33  ;;  %v8687_v33 = vor.u32 %v9863_v47, %v8686_v29  ;;  %v8542_v14 = vld [vmem:[#allocation7 + $0x4a0] sm:$0xf]  ;;  %v3610_v29 = vmul.f32 0.2, %v10397_v34 }
 0x266   :  { %v8223_v7 = vor.u32 %v9747_v52, %v8222_v51  ;;  %v9831_v49 = vld [vmem:[#allocation7 + $0x4cc] sm:$0xf0]  ;;  %v8798_v52 = vld [vmem:[#allocation7 + $0x6a0] sm:$0xf] }
 0x267   :  { %5204 = vmatpush.bf16.msra.mxu2 %v8287_v60  ;;  %5179 = vmatpush.bf16.msra.mxu0 %v8015_v6  ;;  %v7950_v60 = vld [vmem:[#allocation7] sm:$0xf]  ;;  %v9827_v37 = vld [vmem:[#allocation7 + $0x4ac] sm:$0xf0] }
 0x268   :  { %v8334_v6 = vld [vmem:[#allocation7 + $0x300] sm:$0xf]  ;;  %v8543_v51 = vor.u32 %v9827_v37, %v8542_v14  ;;  %v9823_v56 = vld [vmem:[#allocation7 + $0x48c] sm:$0xf0] }
 0x269   :  { %5217 = vmatpush.bf16.msra.mxu3 %v8415_v63  ;;  %5192 = vmatpush.bf16.msra.mxu1 %v8143_v38  ;;  %v8078_v63 = vld [vmem:[#allocation7 + $0x100] sm:$0xf]  ;;  %v3388_v38 = vpop.f32.mrf.mxu3  ;;  %v9815_v21 = vld [vmem:[#allocation7 + $0x44c] sm:$0xf0] }
 0x26a   :  { %v8079_v16 = vor.u32 %v9711_v1, %v8078_v63  ;;  %v8782_v63 = vld [vmem:[#allocation7 + $0x680] sm:$0xf]  ;;  %v9887_v1 = vld [vmem:[#allocation7 + $0x68c] sm:$0xf0] }
 0x26b   :  { %5205 = vmatpush.bf16.msra.mxu2 %v8271_v10  ;;  %5180 = vmatpush.bf16.msra.mxu0 %v7999_v19  ;;  %v9775_v10 = vld [vmem:[#allocation7 + $0x30c] sm:$0xf0]  ;;  %v8510_v4 = vld [vmem:[#allocation7 + $0x460] sm:$0xf]  ;;  %v8783_v38 = vor.u32 %v9887_v1, %v8782_v63  ;;  %v9701_v1 = vld [vmem:[#allocation7 + $0xc4] sm:$0xf] }
 0x26c   :  { %v8335_v19 = vor.u32 %v9775_v10, %v8334_v6  ;;  %v8638_v42 = vld [vmem:[#allocation7 + $0x560] sm:$0xf]  ;;  %v9851_v6 = vld [vmem:[#allocation7 + $0x56c] sm:$0xf0] }
 0x26d   :  { %5218 = vmatpush.bf16.msra.mxu3 %v8399_v12  ;;  %5193 = vmatpush.bf16.msra.mxu1 %v8127_v43  ;;  %v7951_v12 = vor.u32 %v9679_v62, %v7950_v60  ;;  %v8575_v43 = vor.u32 %v9835_v39, %v8574_v22  ;;  %v3399_v60 = vpop.f32.mrf.mxu0  ;;  %v3412_v62 = vpop.f32.mrf.mxu1  ;;  %v8766_v22 = vld [vmem:[#allocation7 + $0x660] sm:$0xf]  ;;  %v9883_v39 = vld [vmem:[#allocation7 + $0x66c] sm:$0xf0] }
 0x26e   :  { %v9879_v23 = vld [vmem:[#allocation7 + $0x64c] sm:$0xf0]  ;;  %v8590_v37 = vld [vmem:[#allocation7 + $0x500] sm:$0xf] }
 0x26f   :  { %5206 = vmatpush.bf16.msra.mxu2 %v8255_v0  ;;  %5181 = vmatpush.bf16.msra.mxu0 %v7983_v31  ;;  %v8830_v0 = vld [vmem:[#allocation7 + $0x6e0] sm:$0xf]  ;;  %v10439_v31 = vpack.c.bf16 %v3615_v20, %v3615_v20 }
 0x270   :  { %v8831_v13 = vor.u32 %v9899_v36, %v8830_v0  ;;  %v8495_v36 = vor.u32 %v9815_v21, %v8494_v15  ;;  %v8750_v20 = vld [vmem:[#allocation7 + $0x640] sm:$0xf] }
 0x271   :  { %5219 = vmatpush.bf16.msra.mxu3 %v8383_v25  ;;  %5194 = vmatpush.bf16.msra.mxu1 %v8111_v8  ;;  %v3335_v25 = vadd.f32 %v10399_v44, %v594_v58  ;;  %v8559_v44 = vor.u32 %v9831_v49, %v8558_v27  ;;  %v9895_v8 = vld [vmem:[#allocation7 + $0x6cc] sm:$0xf0]  ;;  %v8654_v58 = vld [vmem:[#allocation7 + $0x580] sm:$0xf] }
 0x272   :  { %v8815_v48 = vor.u32 %v9895_v8, %v8814_v50  ;;  %v9811_v27 = vld [vmem:[#allocation7 + $0x42c] sm:$0xf0]  ;;  %v8606_v49 = vld [vmem:[#allocation7 + $0x520] sm:$0xf] }
 0x273   :  { %5207 = vmatpush.bf16.msra.mxu2 %v8239_v32  ;;  %5182 = vmatpush.bf16.msra.mxu0 %v7967_v59  ;;  %v10443_v32 = vpack.c.bf16 %v3617_v35, %v3617_v35  ;;  %v3348_v40 = vadd.f32 %v10405_v9, %v3335_v25  ;;  %v9891_v9 = vld [vmem:[#allocation7 + $0x6ac] sm:$0xf0] }
 0x274   :  { %v9855_v59 = vld [vmem:[#allocation7 + $0x58c] sm:$0xf0] }
 0x275   :  { %5220 = vmatpush.bf16.msra.mxu3 %v8367_v46  ;;  %5195 = vmatpush.bf16.msra.mxu1 %v8095_v61  ;;  %v9859_v46 = vld [vmem:[#allocation7 + $0x5ac] sm:$0xf0]  ;;  %v3361_v53 = vadd.f32 %v10407_v5, %v3348_v40  ;;  %v8799_v61 = vor.u32 %v9891_v9, %v8798_v52  ;;  %v3401_v0 = vpop.f32.mrf.mxu0  ;;  %v3414_v25 = vpop.f32.mrf.mxu1  ;;  %v8734_v40 = vld [vmem:[#allocation7 + $0x620] sm:$0xf] }
 0x276   :  { %v8671_v54 = vor.u32 %v9859_v46, %v8670_v45  ;;  %v9819_v5 = vld [vmem:[#allocation7 + $0x46c] sm:$0xf0]  ;;  %v9705_v46 = vld [vmem:[#allocation7 + $0xe4] sm:$0xf]  ;;  %v8958_v52 = vld [vmem:[#allocation7 + $0x7e0] sm:$0xf] }
 0x277   :  { %5208 = vmatpush.bf16.msra.mxu2 %v8223_v7  ;;  %5183 = vmatpush.bf16.msra.mxu0 %v7951_v12  ;;  %v8527_v7 = vor.u32 %v9823_v56, %v8526_v55  ;;  %v3374_v3 = vadd.f32 %v10409_v24, %v3361_v53  ;;  %v8511_v10 = vor.u32 %v9819_v5, %v8510_v4  ;;  %v9847_v24 = vld [vmem:[#allocation7 + $0x54c] sm:$0xf0]  ;;  %v8192_v55 = vld [vmem:[#allocation7 + $0x1f0] sm:$0xf0]  ;;  %v9729_v25 = vld [vmem:[#allocation7 + $0x1a4] sm:$0xf] }
 0x278   :  { %v8639_v12 = vor.u32 %v9851_v6, %v8638_v42  ;;  %v9843_v35 = vld [vmem:[#allocation7 + $0x52c] sm:$0xf0]  ;;  %v3618_v4 = vsel %vm3602_vm4, %v10397_v34, %v3610_v29  ;;  %v8048_v42 = vld [vmem:[#allocation7 + $0xd0] sm:$0xf0]  ;;  %v8942_v6 = vld [vmem:[#allocation7 + $0x7c0] sm:$0xf] }
 0x279   :  { %5221 = vmatpush.bf16.msra.mxu3 %v8351_v41  ;;  %5196 = vmatpush.bf16.msra.mxu1 %v8079_v16  ;;  %v8655_v41 = vor.u32 %v9855_v59, %v8654_v58  ;;  %v3387_v11 = vadd.f32 %v10411_v28, %v3374_v3  ;;  %v8622_v16 = vld [vmem:[#allocation7 + $0x540] sm:$0xf]  ;;  %v9807_v8 = vld [vmem:[#allocation7 + $0x40c] sm:$0xf0]  ;;  %v8607_v14 = vor.u32 %v9843_v35, %v8606_v49  ;;  %v9769_v3 = vld [vmem:[#allocation7 + $0x2e4] sm:$0xf] }
 0x27a   :  { %5184 = vmatmul.bf16.vlgmr.msra.gmra.mxu0 %v10437_v30  ;;  %v8623_v28 = vor.u32 %v9847_v24, %v8622_v16  ;;  %v9839_v45 = vld [vmem:[#allocation7 + $0x50c] sm:$0xf0]  ;;  %v10463_v21 = vpack.c.bf16 %v3618_v4, %v3618_v4  ;;  %v8051_v16 = vor.u32 %v9701_v1, %v8048_v42  ;;  %v9697_v24 = vld [vmem:[#allocation7 + $0xa4] sm:$0xf]  ;;  %v7984_v4 = vld [vmem:[#allocation7 + $0x50] sm:$0xf0] }
 0x27b   :  { %5209 = vmatpush.bf16.msra.mxu2 %v8207_v17  ;;  %5228 = vmatpush.bf16.msrb.mxu0 %v8575_v43  ;;  %v10453_v17 = vpop.f32.mrf.mxu2  ;;  %v3400_v18 = vadd.f32 %v3399_v60, %v3387_v11  ;;  %v10455_v43 = vpop.f32.mrf.mxu3  ;;  %v9931_v9 = vld [vmem:[#allocation7 + $0x7ec] sm:$0xf0]  ;;  %v9765_v34 = vld [vmem:[#allocation7 + $0x2c4] sm:$0xf] }
 0x27c   :  { %5197 = vmatmul.bf16.vlgmr.msra.gmra.mxu1 %v10439_v31  ;;  %v8959_v59 = vor.u32 %v9931_v9, %v8958_v52  ;;  %v9693_v35 = vld [vmem:[#allocation7 + $0x84] sm:$0xf]  ;;  %v8000_v9 = vld [vmem:[#allocation7 + $0x70] sm:$0xf0]  ;;  %v9911_v42 = vld [vmem:[#allocation7 + $0x74c] sm:$0xf0] }
 0x27d   :  { %5222 = vmatpush.bf16.msra.mxu3 %v8335_v19  ;;  %5241 = vmatpush.bf16.msrb.mxu1 %v8703_v26  ;;  %v8767_v19 = vor.u32 %v9883_v39, %v8766_v22  ;;  %v8478_v26 = vld [vmem:[#allocation7 + $0x420] sm:$0xf]  ;;  %v3413_v47 = vadd.f32 %v3412_v62, %v3400_v18  ;;  %v8591_v62 = vor.u32 %v9839_v45, %v8590_v37  ;;  %v9733_v22 = vld [vmem:[#allocation7 + $0x1c4] sm:$0xf]  ;;  %v8176_v39 = vld [vmem:[#allocation7 + $0x1d0] sm:$0xf0] }
 0x27e   :  { %5210 = vmatmul.bf16.vlgmr.msra.gmra.mxu2 %v10441_v2  ;;  %v8479_v50 = vor.u32 %v9811_v27, %v8478_v26  ;;  %v8304_v18 = vld [vmem:[#allocation7 + $0x2d0] sm:$0xf0]  ;;  %v8179_v0 = vor.u32 %v9733_v22, %v8176_v39  ;;  %v9761_v29 = vld [vmem:[#allocation7 + $0x2a4] sm:$0xf] }
 0x27f   :  { %5254 = vmatpush.bf16.msrb.mxu2 %v8831_v13  ;;  %5229 = vmatpush.bf16.msrb.mxu0 %v8559_v44  ;;  %v8462_v13 = vld [vmem:[#allocation7 + $0x400] sm:$0xf]  ;;  %v8751_v44 = vor.u32 %v9879_v23, %v8750_v20  ;;  %v3611_v53 = vmul.f32 0.2, %v3413_v47  ;;  %vm3603_vm5 = vcmp.gt.f32.partialorder %v3413_v47, 0.0  ;;  %v8307_v27 = vor.u32 %v9765_v34, %v8304_v18 }
 0x280   :  { %5223 = vmatmul.bf16.vlgmr.msra.gmra.mxu3 %v10443_v32  ;;  %v8463_v60 = vor.u32 %v9807_v8, %v8462_v13  ;;  %v8926_v20 = vld [vmem:[#allocation7 + $0x7a0] sm:$0xf]  ;;  %v9923_v23 = vld [vmem:[#allocation7 + $0x7ac] sm:$0xf0]  ;;  %v9753_v1 = vld [vmem:[#allocation7 + $0x264] sm:$0xf] }
 0x281   :  { %5242 = vmatpush.bf16.msrb.mxu1 %v8687_v33  ;;  %v9875_v33 = vld [vmem:[#allocation7 + $0x62c] sm:$0xf0]  ;;  %5267 = vmatpush.bf16.msrb.mxu3 %v8959_v59  ;;  %v8927_v26 = vor.u32 %v9923_v23, %v8926_v20  ;;  %v8862_v20 = vld [vmem:[#allocation7 + $0x720] sm:$0xf] }
 0x282   :  { %v8735_v56 = vor.u32 %v9875_v33, %v8734_v40  ;;  %v9919_v8 = vld [vmem:[#allocation7 + $0x78c] sm:$0xf0]  ;;  %v9725_v40 = vld [vmem:[#allocation7 + $0x184] sm:$0xf]  ;;  %v8144_v33 = vld [vmem:[#allocation7 + $0x190] sm:$0xf0] }
 0x283   :  { %5255 = vmatpush.bf16.msrb.mxu2 %v8815_v48  ;;  %5230 = vmatpush.bf16.msrb.mxu0 %v8543_v51  ;;  %v8064_v48 = vld [vmem:[#allocation7 + $0xf0] sm:$0xf0]  ;;  %v3427_v51 = vpop.f32.mrf.mxu2  ;;  %v3440_v58 = vpop.f32.mrf.mxu3  ;;  %v8147_v52 = vor.u32 %v9725_v40, %v8144_v33  ;;  %v9907_v23 = vld [vmem:[#allocation7 + $0x72c] sm:$0xf0]  ;;  %v9833_v33 = vld [vmem:[#allocation7 + $0x4e4] sm:$0xf] }
 0x284   :  { %v8067_v63 = vor.u32 %v9705_v46, %v8064_v48  ;;  %v9689_v46 = vld [vmem:[#allocation7 + $0x64] sm:$0xf]  ;;  %v8272_v51 = vld [vmem:[#allocation7 + $0x290] sm:$0xf0] }
 0x285   :  { %5243 = vmatpush.bf16.msrb.mxu1 %v8671_v54  ;;  %v9737_v54 = vld [vmem:[#allocation7 + $0x1e4] sm:$0xf]  ;;  %v8128_v58 = vld [vmem:[#allocation7 + $0x170] sm:$0xf0] }
 0x286   :  { %v8195_v5 = vor.u32 %v9737_v54, %v8192_v55  ;;  %v9757_v48 = vld [vmem:[#allocation7 + $0x284] sm:$0xf]  ;;  %v8894_v54 = vld [vmem:[#allocation7 + $0x760] sm:$0xf]  ;;  %v9915_v55 = vld [vmem:[#allocation7 + $0x76c] sm:$0xf0] }
 0x287   :  { %5256 = vmatpush.bf16.msrb.mxu2 %v8799_v61  ;;  %5231 = vmatpush.bf16.msrb.mxu0 %v8527_v7  ;;  %v8718_v61 = vld [vmem:[#allocation7 + $0x600] sm:$0xf]  ;;  %v9871_v7 = vld [vmem:[#allocation7 + $0x60c] sm:$0xf0] }
 0x288   :  { %v8719_v11 = vor.u32 %v9871_v7, %v8718_v61  ;;  %v10471_v59 = vpop.f32.mrf.mxu1  ;;  %v595_v61 = vperm.slane %v10419_v57, 6  ;;  %v8275_v7 = vor.u32 %v9757_v48, %v8272_v51  ;;  %v9801_v51 = vld [vmem:[#allocation7 + $0x3e4] sm:$0xf] }
 0x289   :  { %5244 = vmatpush.bf16.msrb.mxu1 %v8655_v41  ;;  %v8320_v41 = vld [vmem:[#allocation7 + $0x2f0] sm:$0xf0] }
 0x28a   :  { %v8323_v15 = vor.u32 %v9769_v3, %v8320_v41  ;;  %v8256_v3 = vld [vmem:[#allocation7 + $0x270] sm:$0xf0]  ;;  %v3426_v34 = vadd.f32 %v10453_v17, %v595_v61  ;;  %v9745_v17 = vld [vmem:[#allocation7 + $0x224] sm:$0xf] }
 0x28b   :  { %5257 = vmatpush.bf16.msrb.mxu2 %v8783_v38  ;;  %5232 = vmatpush.bf16.msrb.mxu0 %v8511_v10  ;;  %v9927_v38 = vld [vmem:[#allocation7 + $0x7cc] sm:$0xf0]  ;;  %v3619_v10 = vsel %vm3603_vm5, %v3413_v47, %v3611_v53  ;;  %v8288_v47 = vld [vmem:[#allocation7 + $0x2b0] sm:$0xf0]  ;;  %v10469_v53 = vpop.f32.mrf.mxu0 }
 0x28c   :  { %v8291_v37 = vor.u32 %v9761_v29, %v8288_v47  ;;  %v8208_v61 = vld [vmem:[#allocation7 + $0x210] sm:$0xf0] }
 0x28d   :  { %5245 = vmatpush.bf16.msrb.mxu1 %v8639_v12  ;;  %v8943_v12 = vor.u32 %v9927_v38, %v8942_v6  ;;  %v9717_v6 = vld [vmem:[#allocation7 + $0x144] sm:$0xf]  ;;  %v8112_v38 = vld [vmem:[#allocation7 + $0x150] sm:$0xf0] }
 0x28e   :  { %v8115_v18 = vor.u32 %v9717_v6, %v8112_v38  ;;  %v8688_v6 = vld [vmem:[#allocation7 + $0x5d0] sm:$0xf0] }
 0x28f   :  { %5258 = vmatpush.bf16.msrb.mxu2 %v8767_v19  ;;  %5233 = vmatpush.bf16.msrb.mxu0 %v8495_v36  ;;  %v10465_v19 = vpack.c.bf16 %v3619_v10, %v3619_v10  ;;  %v8032_v36 = vld [vmem:[#allocation7 + $0xb0] sm:$0xf0] }
 0x290   :  { %5268 = vmatpush.bf16.msrb.mxu3 %v8943_v12  ;;  %v8035_v49 = vor.u32 %v9697_v24, %v8032_v36  ;;  %v10474_v10 = vpop.f32.mrf.mxu2  ;;  %v8240_v24 = vld [vmem:[#allocation7 + $0x250] sm:$0xf0] }
 0x291   :  { %5246 = vmatpush.bf16.msrb.mxu1 %v8623_v28  ;;  %v8160_v28 = vld [vmem:[#allocation7 + $0x1b0] sm:$0xf0] }
 0x292   :  { %v8163_v13 = vor.u32 %v9729_v25, %v8160_v28  ;;  %v10476_v39 = vpop.f32.mrf.mxu3  ;;  %v9713_v25 = vld [vmem:[#allocation7 + $0x124] sm:$0xf]  ;;  %v8096_v28 = vld [vmem:[#allocation7 + $0x130] sm:$0xf0] }
 0x293   :  { %5259 = vmatpush.bf16.msrb.mxu2 %v8751_v44  ;;  %5234 = vmatpush.bf16.msrb.mxu0 %v8479_v50  ;;  %v8016_v44 = vld [vmem:[#allocation7 + $0x90] sm:$0xf0]  ;;  %v8910_v50 = vld [vmem:[#allocation7 + $0x780] sm:$0xf]  ;;  %v3453_v36 = vpop.f32.mrf.mxu0  ;;  %v8099_v40 = vor.u32 %v9713_v25, %v8096_v28 }
 0x294   :  { %5269 = vmatpush.bf16.msrb.mxu3 %v8927_v26  ;;  %v8019_v45 = vor.u32 %v9693_v35, %v8016_v44  ;;  %v3466_v26 = vpop.f32.mrf.mxu1  ;;  %v7952_v35 = vld [vmem:[#allocation7 + $0x10] sm:$0xf0] }
 0x295   :  { %5247 = vmatpush.bf16.msrb.mxu1 %v8607_v14  ;;  %v8911_v14 = vor.u32 %v9919_v8, %v8910_v50  ;;  %v8080_v44 = vld [vmem:[#allocation7 + $0x110] sm:$0xf0]  ;;  %v3439_v8 = vadd.f32 %v10455_v43, %v3426_v34  ;;  %v9741_v43 = vld [vmem:[#allocation7 + $0x204] sm:$0xf] }
 0x296   :  { %v8224_v50 = vld [vmem:[#allocation7 + $0x230] sm:$0xf0]  ;;  %v8211_v38 = vor.u32 %v9741_v43, %v8208_v61  ;;  %v9789_v26 = vld [vmem:[#allocation7 + $0x384] sm:$0xf] }
 0x297   :  { %5260 = vmatpush.bf16.msrb.mxu2 %v8735_v56  ;;  %5235 = vmatpush.bf16.msrb.mxu0 %v8463_v60  ;;  %v9721_v56 = vld [vmem:[#allocation7 + $0x164] sm:$0xf]  ;;  %v8895_v60 = vor.u32 %v9915_v55, %v8894_v54  ;;  %v8704_v54 = vld [vmem:[#allocation7 + $0x5f0] sm:$0xf0]  ;;  %v8227_v55 = vor.u32 %v9745_v17, %v8224_v50 }
 0x298   :  { %5270 = vmatpush.bf16.msrb.mxu3 %v8911_v14  ;;  %v8131_v41 = vor.u32 %v9721_v56, %v8128_v58  ;;  %v8846_v14 = vld [vmem:[#allocation7 + $0x700] sm:$0xf]  ;;  %v8416_v34 = vld [vmem:[#allocation7 + $0x3b0] sm:$0xf0]  ;;  %v9845_v61 = vld [vmem:[#allocation7 + $0x544] sm:$0xf] }
 0x299   :  { %5248 = vmatpush.bf16.msrb.mxu1 %v8591_v62  ;;  %v8003_v62 = vor.u32 %v9689_v46, %v8000_v9  ;;  %v3479_v46 = vpop.f32.mrf.mxu2  ;;  %v9865_v9 = vld [vmem:[#allocation7 + $0x5e4] sm:$0xf]  ;;  %v8528_v28 = vld [vmem:[#allocation7 + $0x490] sm:$0xf0] }
 0x29a   :  { %5236 = vmatmul.bf16.vlgmr.msrb.gmra.mxu0 %v10463_v21  ;;  %v3492_v56 = vpop.f32.mrf.mxu3  ;;  %v8512_v50 = vld [vmem:[#allocation7 + $0x470] sm:$0xf0]  ;;  %v9897_v46 = vld [vmem:[#allocation7 + $0x6e4] sm:$0xf] }
 0x29b   :  { %5280 = vmatpush.bf16.msra.mxu0 %v8067_v63  ;;  %5261 = vmatpush.bf16.msrb.mxu2 %v8719_v11  ;;  %v9685_v63 = vld [vmem:[#allocation7 + $0x44] sm:$0xf]  ;;  %v8259_v11 = vor.u32 %v9753_v1, %v8256_v3  ;;  %v8707_v3 = vor.u32 %v9865_v9, %v8704_v54 }
 0x29c   :  { %5249 = vmatmul.bf16.vlgmr.msrb.gmra.mxu1 %v10465_v19  ;;  %5271 = vmatpush.bf16.msrb.mxu3 %v8895_v60  ;;  %v7987_v12 = vor.u32 %v9685_v63, %v7984_v4  ;;  %v9829_v1 = vld [vmem:[#allocation7 + $0x4c4] sm:$0xf] }
 0x29d   :  { %5293 = vmatpush.bf16.msra.mxu1 %v8195_v5  ;;  %v8878_v5 = vld [vmem:[#allocation7 + $0x740] sm:$0xf]  ;;  %v9797_v4 = vld [vmem:[#allocation7 + $0x3c4] sm:$0xf] }
 0x29e   :  { %v8879_v22 = vor.u32 %v9911_v42, %v8878_v5  ;;  %v8432_v5 = vld [vmem:[#allocation7 + $0x3d0] sm:$0xf0]  ;;  %v9861_v42 = vld [vmem:[#allocation7 + $0x5c4] sm:$0xf] }
 0x29f   :  { %5306 = vmatpush.bf16.msra.mxu2 %v8323_v15  ;;  %5281 = vmatpush.bf16.msra.mxu0 %v8051_v16  ;;  %v9681_v15 = vld [vmem:[#allocation7 + $0x24] sm:$0xf] }
 0x2a0   :  { %v9749_v16 = vld [vmem:[#allocation7 + $0x244] sm:$0xf]  ;;  %5272 = vmatpush.bf16.msrb.mxu3 %v8879_v22  ;;  %v8435_v22 = vor.u32 %v9797_v4, %v8432_v5 }
 0x2a1   :  { %5294 = vmatpush.bf16.msra.mxu1 %v8179_v0  ;;  %v7968_v0 = vld [vmem:[#allocation7 + $0x30] sm:$0xf0]  ;;  %v8243_v29 = vor.u32 %v9749_v16, %v8240_v24  ;;  %v9793_v24 = vld [vmem:[#allocation7 + $0x3a4] sm:$0xf] }
 0x2a2   :  { %v7971_v47 = vor.u32 %v9681_v15, %v7968_v0  ;;  %v8691_v15 = vor.u32 %v9861_v42, %v8688_v6  ;;  %v8544_v16 = vld [vmem:[#allocation7 + $0x4b0] sm:$0xf0]  ;;  %v8419_v36 = vor.u32 %v9793_v24, %v8416_v34  ;;  %v9813_v9 = vld [vmem:[#allocation7 + $0x444] sm:$0xf] }
 0x2a3   :  { %5307 = vmatpush.bf16.msra.mxu2 %v8307_v27  ;;  %5282 = vmatpush.bf16.msra.mxu0 %v8035_v49  ;;  %v8863_v27 = vor.u32 %v9907_v23, %v8862_v20  ;;  %v9677_v49 = vld [vmem:[#allocation7 + $0x4] sm:$0xf]  ;;  %v8672_v0 = vld [vmem:[#allocation7 + $0x5b0] sm:$0xf0] }
 0x2a4   :  { %v7955_v60 = vor.u32 %v9677_v49, %v7952_v35  ;;  %v9821_v23 = vld [vmem:[#allocation7 + $0x484] sm:$0xf]  ;;  %v8656_v35 = vld [vmem:[#allocation7 + $0x590] sm:$0xf0] }
 0x2a5   :  { %5295 = vmatpush.bf16.msra.mxu1 %v8163_v13  ;;  %v9709_v13 = vld [vmem:[#allocation7 + $0x104] sm:$0xf]  ;;  %5273 = vmatpush.bf16.msrb.mxu3 %v8863_v27  ;;  %v8400_v27 = vld [vmem:[#allocation7 + $0x390] sm:$0xf0] }
 0x2a6   :  { %v9853_v49 = vld [vmem:[#allocation7 + $0x584] sm:$0xf] }
 0x2a7   :  { %5308 = vmatpush.bf16.msra.mxu2 %v8291_v37  ;;  %5283 = vmatpush.bf16.msra.mxu0 %v8019_v45  ;;  %v9903_v37 = vld [vmem:[#allocation7 + $0x70c] sm:$0xf0]  ;;  %v8576_v45 = vld [vmem:[#allocation7 + $0x4f0] sm:$0xf0]  ;;  %v9781_v56 = vld [vmem:[#allocation7 + $0x344] sm:$0xf] }
 0x2a8   :  { %v8847_v48 = vor.u32 %v9903_v37, %v8846_v14  ;;  %v8579_v63 = vor.u32 %v9833_v33, %v8576_v45  ;;  %v9849_v14 = vld [vmem:[#allocation7 + $0x564] sm:$0xf]  ;;  %v8640_v37 = vld [vmem:[#allocation7 + $0x570] sm:$0xf0] }
 0x2a9   :  { %5296 = vmatpush.bf16.msra.mxu1 %v8147_v52  ;;  %v8448_v52 = vld [vmem:[#allocation7 + $0x3f0] sm:$0xf0]  ;;  %v8643_v54 = vor.u32 %v9849_v14, %v8640_v37  ;;  %v9809_v42 = vld [vmem:[#allocation7 + $0x424] sm:$0xf] }
 0x2aa   :  { %v8451_v58 = vor.u32 %v9801_v51, %v8448_v52  ;;  %5274 = vmatpush.bf16.msrb.mxu3 %v8847_v48  ;;  %v3503_v17 = vpop.f32.mrf.mxu0  ;;  %v8832_v48 = vld [vmem:[#allocation7 + $0x6f0] sm:$0xf0]  ;;  %v10486_v51 = vpop.f32.mrf.mxu1  ;;  %v9889_v34 = vld [vmem:[#allocation7 + $0x6a4] sm:$0xf] }
 0x2ab   :  { %5309 = vmatpush.bf16.msra.mxu2 %v8275_v7  ;;  %5284 = vmatpush.bf16.msra.mxu0 %v8003_v62  ;;  %v3452_v7 = vadd.f32 %v10469_v53, %v3439_v8  ;;  %v8083_v62 = vor.u32 %v9709_v13, %v8080_v44  ;;  %v8531_v13 = vor.u32 %v9821_v23, %v8528_v28  ;;  %v9817_v44 = vld [vmem:[#allocation7 + $0x464] sm:$0xf]  ;;  %v8592_v28 = vld [vmem:[#allocation7 + $0x510] sm:$0xf0] }
 0x2ac   :  { %v9785_v8 = vld [vmem:[#allocation7 + $0x364] sm:$0xf]  ;;  %v8515_v52 = vor.u32 %v9817_v44, %v8512_v50  ;;  %v8835_v43 = vor.u32 %v9897_v46, %v8832_v48  ;;  %v9740_v44 = vld [vmem:[#allocation7 + $0x1f4] sm:$0xf0]  ;;  %v8054_v48 = vld [vmem:[#allocation7 + $0xc8] sm:$0xf] }
 0x2ad   :  { %5297 = vmatpush.bf16.msra.mxu1 %v8131_v41  ;;  %v8560_v41 = vld [vmem:[#allocation7 + $0x4d0] sm:$0xf0]  ;;  %v9837_v23 = vld [vmem:[#allocation7 + $0x504] sm:$0xf] }
 0x2ae   :  { %5319 = vmatpush.bf16.msra.mxu3 %v8451_v58  ;;  %v8563_v53 = vor.u32 %v9829_v1, %v8560_v41  ;;  %v8368_v58 = vld [vmem:[#allocation7 + $0x350] sm:$0xf0]  ;;  %v9893_v1 = vld [vmem:[#allocation7 + $0x6c4] sm:$0xf]  ;;  %v8595_v14 = vor.u32 %v9837_v23, %v8592_v28  ;;  %v9724_v23 = vld [vmem:[#allocation7 + $0x174] sm:$0xf0] }
 0x2af   :  { %5310 = vmatpush.bf16.msra.mxu2 %v8259_v11  ;;  %5285 = vmatpush.bf16.msra.mxu0 %v7987_v12  ;;  %v3465_v11 = vadd.f32 %v10471_v59, %v3452_v7  ;;  %v9825_v12 = vld [vmem:[#allocation7 + $0x4a4] sm:$0xf]  ;;  %v8624_v7 = vld [vmem:[#allocation7 + $0x550] sm:$0xf0] }
 0x2b0   :  { %v8547_v20 = vor.u32 %v9825_v12, %v8544_v16  ;;  %v10490_v4 = vpop.f32.mrf.mxu2  ;;  %v8627_v6 = vor.u32 %v9845_v61, %v8624_v7  ;;  %v8608_v16 = vld [vmem:[#allocation7 + $0x530] sm:$0xf0]  ;;  %v8166_v61 = vld [vmem:[#allocation7 + $0x1a8] sm:$0xf] }
 0x2b1   :  { %5298 = vmatpush.bf16.msra.mxu1 %v8115_v18  ;;  %v9857_v18 = vld [vmem:[#allocation7 + $0x5a4] sm:$0xf]  ;;  %v3478_v59 = vadd.f32 %v10474_v10, %v3465_v11  ;;  %v8659_v10 = vor.u32 %v9853_v49, %v8656_v35  ;;  %v8070_v35 = vld [vmem:[#allocation7 + $0xe8] sm:$0xf]  ;;  %v8720_v28 = vld [vmem:[#allocation7 + $0x610] sm:$0xf0] }
 0x2b2   :  { %5320 = vmatpush.bf16.msra.mxu3 %v8435_v22  ;;  %v8675_v25 = vor.u32 %v9857_v18, %v8672_v0  ;;  %v10492_v5 = vpop.f32.mrf.mxu3  ;;  %v3505_v22 = vpop.f32.mrf.mxu0  ;;  %v9777_v11 = vld [vmem:[#allocation7 + $0x324] sm:$0xf]  ;;  %v8800_v18 = vld [vmem:[#allocation7 + $0x6b0] sm:$0xf0] }
 0x2b3   :  { %5311 = vmatpush.bf16.msra.mxu2 %v8243_v29  ;;  %5286 = vmatpush.bf16.msra.mxu0 %v7971_v47  ;;  %v8403_v29 = vor.u32 %v9789_v26, %v8400_v27  ;;  %v3491_v47 = vadd.f32 %v10476_v39, %v3478_v59  ;;  %v3518_v0 = vpop.f32.mrf.mxu1  ;;  %v9805_v59 = vld [vmem:[#allocation7 + $0x404] sm:$0xf]  ;;  %v8336_v27 = vld [vmem:[#allocation7 + $0x310] sm:$0xf0]  ;;  %v8803_v49 = vor.u32 %v9889_v34, %v8800_v18  ;;  %v9696_v22 = vld [vmem:[#allocation7 + $0x94] sm:$0xf0] }
 0x2b4   :  { %v9773_v26 = vld [vmem:[#allocation7 + $0x304] sm:$0xf]  ;;  %v8006_v18 = vld [vmem:[#allocation7 + $0x68] sm:$0xf]  ;;  %v9692_v0 = vld [vmem:[#allocation7 + $0x74] sm:$0xf0] }
 0x2b5   :  { %5299 = vmatpush.bf16.msra.mxu1 %v8099_v40  ;;  %v8384_v40 = vld [vmem:[#allocation7 + $0x370] sm:$0xf0]  ;;  %v3504_v33 = vadd.f32 %v3503_v17, %v3491_v47  ;;  %v8198_v47 = vld [vmem:[#allocation7 + $0x1e8] sm:$0xf]  ;;  %v9885_v17 = vld [vmem:[#allocation7 + $0x684] sm:$0xf] }
 0x2b6   :  { %5321 = vmatpush.bf16.msra.mxu3 %v8419_v36  ;;  %v8387_v45 = vor.u32 %v9785_v8, %v8384_v40 }
 0x2b7   :  { %5312 = vmatpush.bf16.msra.mxu2 %v8227_v55  ;;  %5287 = vmatpush.bf16.msra.mxu0 %v7955_v60  ;;  %vm3604_vm6 = vcmp.gt.f32.partialorder %v3504_v33, 0.0  ;;  %v3612_v39 = vmul.f32 0.2, %v3504_v33  ;;  %v8496_v55 = vld [vmem:[#allocation7 + $0x450] sm:$0xf0] }
 0x2b8   :  { %v8499_v41 = vor.u32 %v9813_v9, %v8496_v55  ;;  %v3531_v8 = vpop.f32.mrf.mxu2  ;;  %v9736_v9 = vld [vmem:[#allocation7 + $0x1d4] sm:$0xf0]  ;;  %v8768_v55 = vld [vmem:[#allocation7 + $0x670] sm:$0xf0] }
 0x2b9   :  { %5300 = vmatpush.bf16.msra.mxu1 %v8083_v62  ;;  %v3620_v60 = vsel %vm3604_vm6, %v3504_v33, %v3612_v39  ;;  %v8371_v62 = vor.u32 %v9781_v56, %v8368_v58  ;;  %v596_v33 = vperm.slane %v10419_v57, 7  ;;  %v9704_v39 = vld [vmem:[#allocation7 + $0xd4] sm:$0xf0] }
 0x2ba   :  { %5288 = vmatmul.bf16.vlgmr.msra.gmra.mxu0 %v10437_v30  ;;  %5322 = vmatpush.bf16.msra.mxu3 %v8403_v29  ;;  %v9708_v29 = vld [vmem:[#allocation7 + $0xf4] sm:$0xf0]  ;;  %v3544_v40 = vpop.f32.mrf.mxu3  ;;  %v8055_v56 = vor.u32 %v9704_v39, %v8054_v48 }
 0x2bb   :  { %5332 = vmatpush.bf16.msrb.mxu0 %v8579_v63  ;;  %5313 = vmatpush.bf16.msra.mxu2 %v8211_v38  ;;  %v10488_v63 = vpack.c.bf16 %v3620_v60, %v3620_v60  ;;  %v8480_v38 = vld [vmem:[#allocation7 + $0x430] sm:$0xf0]  ;;  %v8071_v37 = vor.u32 %v9708_v29, %v8070_v35  ;;  %v8038_v60 = vld [vmem:[#allocation7 + $0xa8] sm:$0xf]  ;;  %v3517_v7 = vadd.f32 %v10486_v51, %v596_v33  ;;  %v9768_v8 = vld [vmem:[#allocation7 + $0x2d4] sm:$0xf0] }
 0x2bc   :  { %5301 = vmatmul.bf16.vlgmr.msra.gmra.mxu1 %v10439_v31  ;;  %v8483_v36 = vor.u32 %v9809_v42, %v8480_v38  ;;  %v8022_v38 = vld [vmem:[#allocation7 + $0x88] sm:$0xf]  ;;  %v8007_v35 = vor.u32 %v9692_v0, %v8006_v18 }
 0x2bd   :  { %5345 = vmatpush.bf16.msrb.mxu1 %v8707_v3  ;;  %v8816_v3 = vld [vmem:[#allocation7 + $0x6d0] sm:$0xf0]  ;;  %5262 = vmatmul.bf16.vlgmr.msrb.gmra.mxu2 %v10488_v63  ;;  %v3530_v51 = vadd.f32 %v10490_v4, %v3517_v7  ;;  %v8326_v4 = vld [vmem:[#allocation7 + $0x2e8] sm:$0xf] }
 0x2be   :  { %5323 = vmatpush.bf16.msra.mxu3 %v8387_v45  ;;  %v8819_v12 = vor.u32 %v9893_v1, %v8816_v3  ;;  %v8199_v45 = vor.u32 %v9740_v44, %v8198_v47  ;;  %v9877_v1 = vld [vmem:[#allocation7 + $0x644] sm:$0xf]  ;;  %v8752_v3 = vld [vmem:[#allocation7 + $0x650] sm:$0xf0]  ;;  %v9688_v44 = vld [vmem:[#allocation7 + $0x54] sm:$0xf0] }
 0x2bf   :  { %5333 = vmatpush.bf16.msrb.mxu0 %v8563_v53  ;;  %v8352_v53 = vld [vmem:[#allocation7 + $0x330] sm:$0xf0]  ;;  %5358 = vmatpush.bf16.msrb.mxu2 %v8835_v43  ;;  %v9700_v43 = vld [vmem:[#allocation7 + $0xb4] sm:$0xf0] }
 0x2c0   :  { %v8355_v24 = vor.u32 %v9777_v11, %v8352_v53  ;;  %v8150_v11 = vld [vmem:[#allocation7 + $0x188] sm:$0xf]  ;;  %v9728_v53 = vld [vmem:[#allocation7 + $0x194] sm:$0xf0] }
 0x2c1   :  { %5346 = vmatpush.bf16.msrb.mxu1 %v8691_v15  ;;  %v9841_v15 = vld [vmem:[#allocation7 + $0x524] sm:$0xf] }
 0x2c2   :  { %5324 = vmatpush.bf16.msra.mxu3 %v8371_v62  ;;  %v9732_v62 = vld [vmem:[#allocation7 + $0x1b4] sm:$0xf0] }
 0x2c3   :  { %5334 = vmatpush.bf16.msrb.mxu0 %v8547_v20  ;;  %v8464_v20 = vld [vmem:[#allocation7 + $0x410] sm:$0xf0]  ;;  %5359 = vmatpush.bf16.msrb.mxu2 %v8819_v12  ;;  %v8167_v42 = vor.u32 %v9732_v62, %v8166_v61  ;;  %v9873_v12 = vld [vmem:[#allocation7 + $0x624] sm:$0xf]  ;;  %v7958_v62 = vld [vmem:[#allocation7 + $0x8] sm:$0xf] }
 0x2c4   :  { %v8467_v50 = vor.u32 %v9805_v59, %v8464_v20  ;;  %v3543_v59 = vadd.f32 %v10492_v5, %v3530_v51  ;;  %v8310_v5 = vld [vmem:[#allocation7 + $0x2c8] sm:$0xf] }
 0x2c5   :  { %5347 = vmatpush.bf16.msrb.mxu1 %v8675_v25  ;;  %v8611_v25 = vor.u32 %v9841_v15, %v8608_v16  ;;  %v8736_v15 = vld [vmem:[#allocation7 + $0x630] sm:$0xf0]  ;;  %v8023_v16 = vor.u32 %v9696_v22, %v8022_v38  ;;  %v9836_v38 = vld [vmem:[#allocation7 + $0x4f4] sm:$0xf0]  ;;  %v8710_v51 = vld [vmem:[#allocation7 + $0x5e8] sm:$0xf] }
 0x2c6   :  { %5325 = vmatpush.bf16.msra.mxu3 %v8355_v24  ;;  %v8151_v24 = vor.u32 %v9728_v53, %v8150_v11  ;;  %v8739_v34 = vor.u32 %v9873_v12, %v8736_v15  ;;  %v9868_v53 = vld [vmem:[#allocation7 + $0x5f4] sm:$0xf0]  ;;  %v8278_v12 = vld [vmem:[#allocation7 + $0x288] sm:$0xf] }
 0x2c7   :  { %5335 = vmatpush.bf16.msrb.mxu0 %v8531_v13  ;;  %v8339_v13 = vor.u32 %v9773_v26, %v8336_v27  ;;  %5360 = vmatpush.bf16.msrb.mxu2 %v8803_v49  ;;  %v9772_v27 = vld [vmem:[#allocation7 + $0x2f4] sm:$0xf0] }
 0x2c8   :  { %v9760_v15 = vld [vmem:[#allocation7 + $0x294] sm:$0xf0] }
 0x2c9   :  { %5348 = vmatpush.bf16.msrb.mxu1 %v8659_v10  ;;  %v8784_v10 = vld [vmem:[#allocation7 + $0x690] sm:$0xf0] }
 0x2ca   :  { %v8787_v46 = vor.u32 %v9885_v17, %v8784_v10  ;;  %5326 = vmatpush.bf16.msra.mxu3 %v8339_v13  ;;  %v7990_v13 = vld [vmem:[#allocation7 + $0x48] sm:$0xf]  ;;  %v8327_v17 = vor.u32 %v9772_v27, %v8326_v4  ;;  %v9832_v27 = vld [vmem:[#allocation7 + $0x4d4] sm:$0xf0] }
 0x2cb   :  { %5336 = vmatpush.bf16.msrb.mxu0 %v8515_v52  ;;  %v8182_v52 = vld [vmem:[#allocation7 + $0x1c8] sm:$0xf]  ;;  %v7991_v33 = vor.u32 %v9688_v44, %v7990_v13 }
 0x2cc   :  { %5361 = vmatpush.bf16.msrb.mxu2 %v8787_v46  ;;  %v8183_v57 = vor.u32 %v9736_v9, %v8182_v52  ;;  %v8118_v10 = vld [vmem:[#allocation7 + $0x148] sm:$0xf]  ;;  %v9684_v46 = vld [vmem:[#allocation7 + $0x34] sm:$0xf0]  ;;  %v8311_v9 = vor.u32 %v9768_v8, %v8310_v5 }
 0x2cd   :  { %5349 = vmatpush.bf16.msrb.mxu1 %v8643_v54  ;;  %v9881_v54 = vld [vmem:[#allocation7 + $0x664] sm:$0xf]  ;;  %5314 = vmatmul.bf16.vlgmr.msra.gmra.mxu2 %v10441_v2  ;;  %v8566_v4 = vld [vmem:[#allocation7 + $0x4c8] sm:$0xf] }
 0x2ce   :  { %v8771_v58 = vor.u32 %v9881_v54, %v8768_v55  ;;  %v8102_v54 = vld [vmem:[#allocation7 + $0x128] sm:$0xf]  ;;  %v9716_v55 = vld [vmem:[#allocation7 + $0x134] sm:$0xf0]  ;;  %v8567_v44 = vor.u32 %v9832_v27, %v8566_v4 }
 0x2cf   :  { %5337 = vmatpush.bf16.msrb.mxu0 %v8499_v41  ;;  %v8039_v41 = vor.u32 %v9700_v43, %v8038_v60  ;;  %v8294_v60 = vld [vmem:[#allocation7 + $0x2a8] sm:$0xf]  ;;  %v9764_v43 = vld [vmem:[#allocation7 + $0x2b4] sm:$0xf0] }
 0x2d0   :  { %5362 = vmatpush.bf16.msrb.mxu2 %v8771_v58  ;;  %v8960_v58 = vld [vmem:[#allocation7 + $0x7f0] sm:$0xf0]  ;;  %v8295_v11 = vor.u32 %v9764_v43, %v8294_v60  ;;  %v8550_v8 = vld [vmem:[#allocation7 + $0x4a8] sm:$0xf]  ;;  %v9856_v60 = vld [vmem:[#allocation7 + $0x594] sm:$0xf0] }
 0x2d1   :  { %5350 = vmatpush.bf16.msrb.mxu1 %v8627_v6  ;;  %v8755_v6 = vor.u32 %v9877_v1, %v8752_v3  ;;  %v9680_v1 = vld [vmem:[#allocation7 + $0x14] sm:$0xf0]  ;;  %v8086_v3 = vld [vmem:[#allocation7 + $0x108] sm:$0xf] }
 0x2d2   :  { %v8230_v43 = vld [vmem:[#allocation7 + $0x228] sm:$0xf]  ;;  %v9816_v27 = vld [vmem:[#allocation7 + $0x454] sm:$0xf0] }
 0x2d3   :  { %5338 = vmatpush.bf16.msrb.mxu0 %v8483_v36  ;;  %v8134_v36 = vld [vmem:[#allocation7 + $0x168] sm:$0xf] }
 0x2d4   :  { %5363 = vmatpush.bf16.msrb.mxu2 %v8755_v6  ;;  %v8135_v29 = vor.u32 %v9724_v23, %v8134_v36  ;;  %v8582_v6 = vld [vmem:[#allocation7 + $0x4e8] sm:$0xf]  ;;  %v8944_v23 = vld [vmem:[#allocation7 + $0x7d0] sm:$0xf0] }
 0x2d5   :  { %5351 = vmatpush.bf16.msrb.mxu1 %v8611_v25  ;;  %v9869_v25 = vld [vmem:[#allocation7 + $0x604] sm:$0xf]  ;;  %v8502_v4 = vld [vmem:[#allocation7 + $0x448] sm:$0xf] }
 0x2d6   :  { %v8723_v47 = vor.u32 %v9869_v25, %v8720_v28  ;;  %v8711_v28 = vor.u32 %v9868_v53, %v8710_v51  ;;  %v9852_v53 = vld [vmem:[#allocation7 + $0x574] sm:$0xf0] }
 0x2d7   :  { %5339 = vmatpush.bf16.msrb.mxu0 %v8467_v50  ;;  %v3555_v20 = vpop.f32.mrf.mxu0  ;;  %v9720_v50 = vld [vmem:[#allocation7 + $0x154] sm:$0xf0] }
 0x2d8   :  { %v3556_v49 = vadd.f32 %v3555_v20, %v3543_v59  ;;  %5364 = vmatpush.bf16.msrb.mxu2 %v8739_v34  ;;  %v7959_v34 = vor.u32 %v9680_v1, %v7958_v62  ;;  %v8583_v59 = vor.u32 %v9836_v38, %v8582_v6  ;;  %v9925_v20 = vld [vmem:[#allocation7 + $0x7c4] sm:$0xf]  ;;  %v8518_v38 = vld [vmem:[#allocation7 + $0x468] sm:$0xf] }
 0x2d9   :  { %5352 = vmatpush.bf16.msrb.mxu1 %v8595_v14  ;;  %v3568_v26 = vpop.f32.mrf.mxu1  ;;  %v8947_v13 = vor.u32 %v9925_v20, %v8944_v23  ;;  %v9909_v20 = vld [vmem:[#allocation7 + $0x744] sm:$0xf]  ;;  %v8880_v23 = vld [vmem:[#allocation7 + $0x750] sm:$0xf0] }
 0x2da   :  { %5340 = vmatmul.bf16.vlgmr.msrb.gmra.mxu0 %v10463_v21  ;;  %v3569_v40 = vadd.f32 %v3568_v26, %v3556_v49  ;;  %v8279_v26 = vor.u32 %v9760_v15, %v8278_v12  ;;  %v8694_v49 = vld [vmem:[#allocation7 + $0x5c8] sm:$0xf]  ;;  %v9744_v15 = vld [vmem:[#allocation7 + $0x214] sm:$0xf0] }
 0x2db   :  { %5384 = vmatpush.bf16.msra.mxu0 %v8071_v37  ;;  %v8119_v37 = vor.u32 %v9720_v50, %v8118_v10  ;;  %v8928_v10 = vld [vmem:[#allocation7 + $0x7b0] sm:$0xf0]  ;;  %v8214_v12 = vld [vmem:[#allocation7 + $0x208] sm:$0xf] }
 0x2dc   :  { %5353 = vmatmul.bf16.vlgmr.msrb.gmra.mxu1 %v10465_v19  ;;  %5365 = vmatpush.bf16.msrb.mxu2 %v8723_v47  ;;  %v9756_v47 = vld [vmem:[#allocation7 + $0x274] sm:$0xf0] }
 0x2dd   :  { %5397 = vmatpush.bf16.msra.mxu1 %v8199_v45  ;;  %v7974_v45 = vld [vmem:[#allocation7 + $0x28] sm:$0xf] }
 0x2de   :  { %v7975_v7 = vor.u32 %v9684_v46, %v7974_v45  ;;  %v9752_v45 = vld [vmem:[#allocation7 + $0x254] sm:$0xf0] }
 0x2df   :  { %5385 = vmatpush.bf16.msra.mxu0 %v8055_v56  ;;  %v3557_v52 = vpop.f32.mrf.mxu0  ;;  %5366 = vmatmul.bf16.vlgmr.msrb.gmra.mxu2 %v10488_v63 }
 0x2e0   :  { %5410 = vmatpush.bf16.msra.mxu2 %v8327_v17  ;;  %v9921_v17 = vld [vmem:[#allocation7 + $0x7a4] sm:$0xf]  ;;  %v8912_v52 = vld [vmem:[#allocation7 + $0x790] sm:$0xf0] }
 0x2e1   :  { %5398 = vmatpush.bf16.msra.mxu1 %v8183_v57  ;;  %v3581_v14 = vpop.f32.mrf.mxu2  ;;  %v3570_v56 = vpop.f32.mrf.mxu1  ;;  %v9929_v57 = vld [vmem:[#allocation7 + $0x7e4] sm:$0xf]  ;;  %v8931_v46 = vor.u32 %v9921_v17, %v8928_v10  ;;  %v8503_v17 = vor.u32 %v9816_v27, %v8502_v4  ;;  %v9734_v27 = vld [vmem:[#allocation7 + $0x1cc] sm:$0xf] }
 0x2e2   :  { %v3582_v48 = vadd.f32 %v3581_v14, %v3569_v40  ;;  %v9828_v40 = vld [vmem:[#allocation7 + $0x4b4] sm:$0xf0]  ;;  %v8534_v56 = vld [vmem:[#allocation7 + $0x488] sm:$0xf]  ;;  %v9905_v10 = vld [vmem:[#allocation7 + $0x724] sm:$0xf] }
 0x2e3   :  { %5386 = vmatpush.bf16.msra.mxu0 %v8039_v41  ;;  %v3594_v39 = vpop.f32.mrf.mxu3  ;;  %v8103_v41 = vor.u32 %v9716_v55, %v8102_v54  ;;  %v9860_v14 = vld [vmem:[#allocation7 + $0x5b4] sm:$0xf0] }
 0x2e4   :  { %v3595_v61 = vadd.f32 %v3594_v39, %v3582_v48  ;;  %5411 = vmatpush.bf16.msra.mxu2 %v8311_v9  ;;  %v8551_v48 = vor.u32 %v9828_v40, %v8550_v8  ;;  %v9917_v39 = vld [vmem:[#allocation7 + $0x784] sm:$0xf]  ;;  %v10508_v9 = vld [vmem:[#allocation8] sm:$0xf]  ;;  %v8486_v40 = vld [vmem:[#allocation7 + $0x428] sm:$0xf] }
 0x2e5   :  { %5399 = vmatpush.bf16.msra.mxu1 %v8167_v42  ;;  %v9712_v42 = vld [vmem:[#allocation7 + $0x114] sm:$0xf0]  ;;  %v3888_v62 = vperm.slane %v10508_v9, 0 }
 0x2e6   :  { %vm3605_vm7 = vcmp.gt.f32.partialorder %v3595_v61, 0.0  ;;  %v3613_v22 = vmul.f32 0.2, %v3595_v61  ;;  %v8087_v36 = vor.u32 %v9712_v42, %v8086_v3  ;;  %v9913_v3 = vld [vmem:[#allocation7 + $0x764] sm:$0xf] }
 0x2e7   :  { %5387 = vmatpush.bf16.msra.mxu0 %v8023_v16 }
 0x2e8   :  { %v3621_v16 = vsel %vm3605_vm7, %v3595_v61, %v3613_v22  ;;  %5412 = vmatpush.bf16.msra.mxu2 %v8295_v11  ;;  %v9748_v61 = vld [vmem:[#allocation7 + $0x234] sm:$0xf0]  ;;  %v8646_v11 = vld [vmem:[#allocation7 + $0x568] sm:$0xf] }
 0x2e9   :  { %5400 = vmatpush.bf16.msra.mxu1 %v8151_v24  ;;  %v8963_v24 = vor.u32 %v9929_v57, %v8960_v58  ;;  %v10503_v18 = vpack.c.bf16 %v3621_v16, %v3621_v16  ;;  %v3583_v0 = vpop.f32.mrf.mxu2  ;;  %v9824_v57 = vld [vmem:[#allocation7 + $0x494] sm:$0xf0]  ;;  %v8662_v58 = vld [vmem:[#allocation7 + $0x588] sm:$0xf]  ;;  %v8231_v6 = vor.u32 %v9748_v61, %v8230_v43  ;;  %v8848_v43 = vld [vmem:[#allocation7 + $0x710] sm:$0xf0] }
 0x2ea   :  { %v8535_v1 = vor.u32 %v9824_v57, %v8534_v56  ;;  %v8663_v42 = vor.u32 %v9856_v60, %v8662_v58  ;;  %v9820_v22 = vld [vmem:[#allocation7 + $0x474] sm:$0xf0]  ;;  %v8838_v0 = vld [vmem:[#allocation7 + $0x6e8] sm:$0xf] }
 0x2eb   :  { %5388 = vmatpush.bf16.msra.mxu0 %v8007_v35  ;;  %v3596_v25 = vpop.f32.mrf.mxu3  ;;  %5275 = vmatmul.bf16.vlgmr.msrb.gmra.mxu3 %v10503_v18  ;;  %v9864_v35 = vld [vmem:[#allocation7 + $0x5d4] sm:$0xf0]  ;;  %v8806_v56 = vld [vmem:[#allocation7 + $0x6a8] sm:$0xf] }
 0x2ec   :  { %5371 = vmatpush.bf16.msrb.mxu3 %v8963_v24  ;;  %5413 = vmatpush.bf16.msra.mxu2 %v8279_v26  ;;  %v8695_v50 = vor.u32 %v9864_v35, %v8694_v49  ;;  %v8215_v26 = vor.u32 %v9744_v15, %v8214_v12  ;;  %v8630_v35 = vld [vmem:[#allocation7 + $0x548] sm:$0xf]  ;;  %v9892_v57 = vld [vmem:[#allocation7 + $0x6b4] sm:$0xf0] }
 0x2ed   :  { %5401 = vmatpush.bf16.msra.mxu1 %v8135_v29  ;;  %v8262_v29 = vld [vmem:[#allocation7 + $0x268] sm:$0xf] }
 0x2ee   :  { %v8263_v5 = vor.u32 %v9756_v47, %v8262_v29  ;;  %v9848_v29 = vld [vmem:[#allocation7 + $0x554] sm:$0xf0]  ;;  %v8883_v47 = vor.u32 %v9909_v20, %v8880_v23  ;;  %v8454_v61 = vld [vmem:[#allocation7 + $0x3e8] sm:$0xf] }
 0x2ef   :  { %5389 = vmatpush.bf16.msra.mxu0 %v7991_v33  ;;  %v8678_v33 = vld [vmem:[#allocation7 + $0x5a8] sm:$0xf]  ;;  %v8631_v8 = vor.u32 %v9848_v29, %v8630_v35  ;;  %v9800_v20 = vld [vmem:[#allocation7 + $0x3d4] sm:$0xf0] }
 0x2f0   :  { %5372 = vmatpush.bf16.msrb.mxu3 %v8947_v13  ;;  %5414 = vmatpush.bf16.msra.mxu2 %v8263_v5  ;;  %v8679_v54 = vor.u32 %v9860_v14, %v8678_v33  ;;  %v8822_v13 = vld [vmem:[#allocation7 + $0x6c8] sm:$0xf]  ;;  %v9812_v33 = vld [vmem:[#allocation7 + $0x434] sm:$0xf0] }
 0x2f1   :  { %5402 = vmatpush.bf16.msra.mxu1 %v8119_v37  ;;  %v8246_v37 = vld [vmem:[#allocation7 + $0x248] sm:$0xf]  ;;  %v8487_v60 = vor.u32 %v9812_v33, %v8486_v40  ;;  %v9730_v40 = vld [vmem:[#allocation7 + $0x1ac] sm:$0xf]  ;;  %v8168_v33 = vld [vmem:[#allocation7 + $0x1b8] sm:$0xf0] }
 0x2f2   :  { %v8247_v55 = vor.u32 %v9752_v45, %v8246_v37  ;;  %v8774_v29 = vld [vmem:[#allocation7 + $0x668] sm:$0xf] }
 0x2f3   :  { %5390 = vmatpush.bf16.msra.mxu0 %v7975_v7  ;;  %v8915_v7 = vor.u32 %v9917_v39, %v8912_v52  ;;  %v9844_v39 = vld [vmem:[#allocation7 + $0x534] sm:$0xf0] }
 0x2f4   :  { %5373 = vmatpush.bf16.msrb.mxu3 %v8931_v46  ;;  %5415 = vmatpush.bf16.msra.mxu2 %v8247_v55  ;;  %v9901_v55 = vld [vmem:[#allocation7 + $0x704] sm:$0xf] }
 0x2f5   :  { %5403 = vmatpush.bf16.msra.mxu1 %v8103_v41  ;;  %v8896_v41 = vld [vmem:[#allocation7 + $0x770] sm:$0xf0] }
 0x2f7   :  { %5391 = vmatpush.bf16.msra.mxu0 %v7959_v34  ;;  %v5185_v51 = vpop.f32.mrf.mxu0  ;;  %v8899_v34 = vor.u32 %v9913_v3, %v8896_v41  ;;  %v9808_v3 = vld [vmem:[#allocation7 + $0x414] sm:$0xf0]  ;;  %v8598_v41 = vld [vmem:[#allocation7 + $0x508] sm:$0xf] }
 0x2f8   :  { %5374 = vmatpush.bf16.msrb.mxu3 %v8915_v7  ;;  %v5186_v16 = vadd.f32 %v5185_v51, %v3888_v62  ;;  %5416 = vmatpush.bf16.msra.mxu2 %v8231_v6  ;;  %v9804_v7 = vld [vmem:[#allocation7 + $0x3f4] sm:$0xf0]  ;;  %v9738_v51 = vld [vmem:[#allocation7 + $0x1ec] sm:$0xf] }
 0x2f9   :  { %5404 = vmatpush.bf16.msra.mxu1 %v8087_v36  ;;  %v5198_v24 = vpop.f32.mrf.mxu1  ;;  %v9900_v36 = vld [vmem:[#allocation7 + $0x6f4] sm:$0xf0]  ;;  %v8455_v12 = vor.u32 %v9804_v7, %v8454_v61  ;;  %v8742_v61 = vld [vmem:[#allocation7 + $0x628] sm:$0xf] }
 0x2fa   :  { %5392 = vmatmul.bf16.vlgmr.msra.gmra.mxu0 %v10437_v30  ;;  %v5199_v25 = vadd.f32 %v5198_v24, %v5186_v16  ;;  %v8839_v49 = vor.u32 %v9900_v36, %v8838_v0  ;;  %v9840_v6 = vld [vmem:[#allocation7 + $0x514] sm:$0xf0]  ;;  %v8790_v16 = vld [vmem:[#allocation7 + $0x688] sm:$0xf] }
 0x2fb   :  { %5436 = vmatpush.bf16.msrb.mxu0 %v8583_v59  ;;  %v8519_v59 = vor.u32 %v9820_v22, %v8518_v38  ;;  %5327 = vmatmul.bf16.vlgmr.msra.gmra.mxu3 %v10443_v32  ;;  %v9706_v38 = vld [vmem:[#allocation7 + $0xec] sm:$0xf]  ;;  %v8072_v22 = vld [vmem:[#allocation7 + $0xf8] sm:$0xf0]  ;;  %v9888_v24 = vld [vmem:[#allocation7 + $0x694] sm:$0xf0]  ;;  %v8599_v0 = vor.u32 %v9840_v6, %v8598_v41 }
 0x2fc   :  { %5405 = vmatmul.bf16.vlgmr.msra.gmra.mxu1 %v10439_v31  ;;  %5375 = vmatpush.bf16.msrb.mxu3 %v8899_v34  ;;  %v8075_v36 = vor.u32 %v9706_v38, %v8072_v22  ;;  %v8791_v4 = vor.u32 %v9888_v24, %v8790_v16  ;;  %v9876_v7 = vld [vmem:[#allocation7 + $0x634] sm:$0xf0]  ;;  %v8008_v6 = vld [vmem:[#allocation7 + $0x78] sm:$0xf0]  ;;  %v9722_v22 = vld [vmem:[#allocation7 + $0x16c] sm:$0xf] }
 0x2fd   :  { %5449 = vmatpush.bf16.msrb.mxu1 %v8711_v28  ;;  %v8647_v28 = vor.u32 %v9852_v53, %v8646_v11  ;;  %5417 = vmatpush.bf16.msra.mxu2 %v8215_v26  ;;  %v8851_v11 = vor.u32 %v9901_v55, %v8848_v43  ;;  %v8200_v53 = vld [vmem:[#allocation7 + $0x1f8] sm:$0xf0]  ;;  %v8743_v38 = vor.u32 %v9876_v7, %v8742_v61  ;;  %v9872_v16 = vld [vmem:[#allocation7 + $0x614] sm:$0xf0]  ;;  %v9710_v61 = vld [vmem:[#allocation7 + $0x10c] sm:$0xf] }
 0x2fe   :  { %v8056_v26 = vld [vmem:[#allocation7 + $0xd8] sm:$0xf0] }
 0x2ff   :  { %5437 = vmatpush.bf16.msrb.mxu0 %v8567_v44  ;;  %v9896_v44 = vld [vmem:[#allocation7 + $0x6d4] sm:$0xf0]  ;;  %v5187_v45 = vpop.f32.mrf.mxu0  ;;  %v8024_v55 = vld [vmem:[#allocation7 + $0x98] sm:$0xf0] }
 0x300   :  { %v8823_v46 = vor.u32 %v9896_v44, %v8822_v13  ;;  %5376 = vmatpush.bf16.msrb.mxu3 %v8883_v47  ;;  %5418 = vmatmul.bf16.vlgmr.msra.gmra.mxu2 %v10441_v2  ;;  %v9884_v47 = vld [vmem:[#allocation7 + $0x674] sm:$0xf0]  ;;  %v8422_v44 = vld [vmem:[#allocation7 + $0x3a8] sm:$0xf]  ;;  %v8088_v7 = vld [vmem:[#allocation7 + $0x118] sm:$0xf0] }
 0x301   :  { %5450 = vmatpush.bf16.msrb.mxu1 %v8695_v50  ;;  %v8864_v50 = vld [vmem:[#allocation7 + $0x730] sm:$0xf0]  ;;  %v5211_v5 = vpop.f32.mrf.mxu2  ;;  %5462 = vmatpush.bf16.msrb.mxu2 %v8839_v49  ;;  %v5200_v52 = vpop.f32.mrf.mxu1  ;;  %v8184_v49 = vld [vmem:[#allocation7 + $0x1d8] sm:$0xf0]  ;;  %v9880_v45 = vld [vmem:[#allocation7 + $0x654] sm:$0xf0] }
 0x302   :  { %v5212_v14 = vadd.f32 %v5211_v5, %v5199_v25  ;;  %v8203_v25 = vor.u32 %v9738_v51, %v8200_v53  ;;  %v8040_v5 = vld [vmem:[#allocation7 + $0xb8] sm:$0xf0]  ;;  %v8171_v52 = vor.u32 %v9730_v40, %v8168_v33 }
 0x303   :  { %5438 = vmatpush.bf16.msrb.mxu0 %v8551_v48  ;;  %v5224_v37 = vpop.f32.mrf.mxu3  ;;  %v8614_v48 = vld [vmem:[#allocation7 + $0x528] sm:$0xf]  ;;  %v8104_v40 = vld [vmem:[#allocation7 + $0x138] sm:$0xf0] }
 0x304   :  { %v10512_v58 = vadd.f32 %v5224_v37, %v5212_v14  ;;  %v8615_v62 = vor.u32 %v9844_v39, %v8614_v48  ;;  %v8758_v37 = vld [vmem:[#allocation7 + $0x648] sm:$0xf]  ;;  %v9792_v39 = vld [vmem:[#allocation7 + $0x394] sm:$0xf0] }
 0x305   :  { %5451 = vmatpush.bf16.msrb.mxu1 %v8679_v54  ;;  %v8867_v54 = vor.u32 %v9905_v10, %v8864_v50  ;;  %5463 = vmatpush.bf16.msrb.mxu2 %v8823_v46  ;;  %v8187_v10 = vor.u32 %v9734_v27, %v8184_v49  ;;  %v9698_v50 = vld [vmem:[#allocation7 + $0xac] sm:$0xf]  ;;  %v8406_v48 = vld [vmem:[#allocation7 + $0x388] sm:$0xf]  ;;  %v8120_v49 = vld [vmem:[#allocation7 + $0x158] sm:$0xf0] }
 0x306   :  { %v8043_v46 = vor.u32 %v9698_v50, %v8040_v5  ;;  %v8407_v43 = vor.u32 %v9792_v39, %v8406_v48  ;;  %v9718_v27 = vld [vmem:[#allocation7 + $0x14c] sm:$0xf]  ;;  %v7976_v5 = vld [vmem:[#allocation7 + $0x38] sm:$0xf0]  ;;  %v8966_v48 = vld [vmem:[#allocation7 + $0x7e8] sm:$0xf] }
 0x307   :  { %5439 = vmatpush.bf16.msrb.mxu0 %v8535_v1  ;;  %v8470_v1 = vld [vmem:[#allocation7 + $0x408] sm:$0xf]  ;;  %5377 = vmatpush.bf16.msrb.mxu3 %v8867_v54  ;;  %v9694_v54 = vld [vmem:[#allocation7 + $0x8c] sm:$0xf] }
 0x308   :  { %v8471_v15 = vor.u32 %v9808_v3, %v8470_v1  ;;  %v8390_v1 = vld [vmem:[#allocation7 + $0x368] sm:$0xf]  ;;  %v9788_v3 = vld [vmem:[#allocation7 + $0x374] sm:$0xf0]  ;;  %v9682_v50 = vld [vmem:[#allocation7 + $0x2c] sm:$0xf] }
 0x309   :  { %5452 = vmatpush.bf16.msrb.mxu1 %v8663_v42  ;;  %v8807_v42 = vor.u32 %v9892_v57, %v8806_v56  ;;  %v5213_v34 = vpop.f32.mrf.mxu2  ;;  %v8759_v56 = vor.u32 %v9880_v45, %v8758_v37  ;;  %v9726_v57 = vld [vmem:[#allocation7 + $0x18c] sm:$0xf]  ;;  %v8391_v53 = vor.u32 %v9788_v3, %v8390_v1  ;;  %v8342_v45 = vld [vmem:[#allocation7 + $0x308] sm:$0xf]  ;;  %v8584_v1 = vld [vmem:[#allocation7 + $0x4f8] sm:$0xf0] }
 0x30b   :  { %5440 = vmatpush.bf16.msrb.mxu0 %v8519_v59  ;;  %v8438_v59 = vld [vmem:[#allocation7 + $0x3c8] sm:$0xf]  ;;  %v5226_v23 = vpop.f32.mrf.mxu3  ;;  %5464 = vmatpush.bf16.msrb.mxu2 %v8807_v42  ;;  %v9690_v42 = vld [vmem:[#allocation7 + $0x6c] sm:$0xf] }
 0x30c   :  { %5378 = vmatpush.bf16.msrb.mxu3 %v8851_v11  ;;  %v8439_v35 = vor.u32 %v9800_v20, %v8438_v59  ;;  %v8136_v11 = vld [vmem:[#allocation7 + $0x178] sm:$0xf0]  ;;  %v9770_v59 = vld [vmem:[#allocation7 + $0x2ec] sm:$0xf] }
 0x30d   :  { %5453 = vmatpush.bf16.msrb.mxu1 %v8647_v28  ;;  %v9702_v28 = vld [vmem:[#allocation7 + $0xcc] sm:$0xf]  ;;  %v8328_v20 = vld [vmem:[#allocation7 + $0x2f8] sm:$0xf0]  ;;  %v8139_v23 = vor.u32 %v9722_v22, %v8136_v11 }
 0x30e   :  { %v8059_v13 = vor.u32 %v9702_v28, %v8056_v26  ;;  %v7992_v28 = vld [vmem:[#allocation7 + $0x58] sm:$0xf0]  ;;  %v9758_v11 = vld [vmem:[#allocation7 + $0x28c] sm:$0xf] }
 0x30f   :  { %5441 = vmatpush.bf16.msrb.mxu0 %v8503_v17  ;;  %v9796_v17 = vld [vmem:[#allocation7 + $0x3b4] sm:$0xf0]  ;;  %5379 = vmatmul.bf16.vlgmr.msrb.gmra.mxu3 %v10503_v18 }
 0x310   :  { %5423 = vmatpush.bf16.msra.mxu3 %v8455_v12  ;;  %5465 = vmatpush.bf16.msrb.mxu2 %v8791_v4  ;;  %v8423_v14 = vor.u32 %v9796_v17, %v8422_v44  ;;  %v8374_v12 = vld [vmem:[#allocation7 + $0x348] sm:$0xf]  ;;  %v9766_v44 = vld [vmem:[#allocation7 + $0x2cc] sm:$0xf]  ;;  %v8312_v17 = vld [vmem:[#allocation7 + $0x2d8] sm:$0xf0] }
 0x311   :  { %5454 = vmatpush.bf16.msrb.mxu1 %v8631_v8  ;;  %v8775_v8 = vor.u32 %v9884_v47, %v8774_v29  ;;  %v8331_v29 = vor.u32 %v9770_v59, %v8328_v20  ;;  %v8315_v37 = vor.u32 %v9766_v44, %v8312_v17  ;;  %v9862_v59 = vld [vmem:[#allocation7 + $0x5cc] sm:$0xf]  ;;  %v8696_v20 = vld [vmem:[#allocation7 + $0x5d8] sm:$0xf0] }
 0x312   :  { %v8680_v44 = vld [vmem:[#allocation7 + $0x5b8] sm:$0xf0] }
 0x313   :  { %5442 = vmatpush.bf16.msrb.mxu0 %v8487_v60  ;;  %v8152_v60 = vld [vmem:[#allocation7 + $0x198] sm:$0xf0] }
 0x314   :  { %5424 = vmatpush.bf16.msra.mxu3 %v8439_v35  ;;  %5466 = vmatpush.bf16.msrb.mxu2 %v8775_v8  ;;  %v8155_v41 = vor.u32 %v9726_v57, %v8152_v60  ;;  %v9714_v8 = vld [vmem:[#allocation7 + $0x12c] sm:$0xf] }
 0x315   :  { %5455 = vmatpush.bf16.msrb.mxu1 %v8615_v62  ;;  %v8027_v62 = vor.u32 %v9694_v54, %v8024_v55  ;;  %v9932_v54 = vld [vmem:[#allocation7 + $0x7f4] sm:$0xf0]  ;;  %v9762_v55 = vld [vmem:[#allocation7 + $0x2ac] sm:$0xf]  ;;  %v8107_v57 = vor.u32 %v9714_v8, %v8104_v40  ;;  %v8918_v8 = vld [vmem:[#allocation7 + $0x788] sm:$0xf] }
 0x316   :  { %v9678_v60 = vld [vmem:[#allocation7 + $0xc] sm:$0xf]  ;;  %v9920_v40 = vld [vmem:[#allocation7 + $0x794] sm:$0xf0] }
 0x317   :  { %5443 = vmatpush.bf16.msrb.mxu0 %v8471_v15  ;;  %v5237_v51 = vpop.f32.mrf.mxu0  ;;  %v8726_v15 = vld [vmem:[#allocation7 + $0x608] sm:$0xf] }
 0x318   :  { %5425 = vmatpush.bf16.msra.mxu3 %v8423_v14  ;;  %5467 = vmatpush.bf16.msrb.mxu2 %v8759_v56  ;;  %v5238_v24 = vadd.f32 %v5237_v51, %v10512_v58  ;;  %v8727_v4 = vor.u32 %v9872_v16, %v8726_v15  ;;  %v8358_v58 = vld [vmem:[#allocation7 + $0x328] sm:$0xf]  ;;  %v8296_v56 = vld [vmem:[#allocation7 + $0x2b8] sm:$0xf0]  ;;  %v9928_v16 = vld [vmem:[#allocation7 + $0x7d4] sm:$0xf0] }
 0x319   :  { %5456 = vmatpush.bf16.msrb.mxu1 %v8599_v0  ;;  %v5250_v34 = vpop.f32.mrf.mxu1  ;;  %v8011_v0 = vor.u32 %v9690_v42, %v8008_v6  ;;  %v9866_v42 = vld [vmem:[#allocation7 + $0x5ec] sm:$0xf]  ;;  %v8712_v6 = vld [vmem:[#allocation7 + $0x5f8] sm:$0xf0]  ;;  %v8950_v15 = vld [vmem:[#allocation7 + $0x7c8] sm:$0xf] }
 0x31a   :  { %5444 = vmatmul.bf16.vlgmr.msrb.gmra.mxu0 %v10463_v21  ;;  %v10519_v26 = vadd.f32 %v5250_v34, %v5238_v24  ;;  %v8280_v51 = vld [vmem:[#allocation7 + $0x298] sm:$0xf0]  ;;  %v8715_v24 = vor.u32 %v9866_v42, %v8712_v6  ;;  %v9830_v34 = vld [vmem:[#allocation7 + $0x4cc] sm:$0xf] }
 0x31b   :  { %5488 = vmatpush.bf16.msra.mxu0 %v8075_v36  ;;  %v9784_v36 = vld [vmem:[#allocation7 + $0x354] sm:$0xf0]  ;;  %v9742_v42 = vld [vmem:[#allocation7 + $0x20c] sm:$0xf]  ;;  %v8216_v6 = vld [vmem:[#allocation7 + $0x218] sm:$0xf0] }
 0x31c   :  { %5457 = vmatmul.bf16.vlgmr.msrb.gmra.mxu1 %v10465_v19  ;;  %5426 = vmatpush.bf16.msra.mxu3 %v8407_v43  ;;  %v8375_v35 = vor.u32 %v9784_v36, %v8374_v12  ;;  %v7960_v43 = vld [vmem:[#allocation7 + $0x18] sm:$0xf0]  ;;  %v8283_v36 = vor.u32 %v9758_v11, %v8280_v51  ;;  %v9912_v11 = vld [vmem:[#allocation7 + $0x754] sm:$0xf0]  ;;  %v9898_v51 = vld [vmem:[#allocation7 + $0x6ec] sm:$0xf] }
 0x31d   :  { %5501 = vmatpush.bf16.msra.mxu1 %v8203_v25  ;;  %v9686_v25 = vld [vmem:[#allocation7 + $0x4c] sm:$0xf]  ;;  %5468 = vmatpush.bf16.msrb.mxu2 %v8743_v38  ;;  %v8967_v38 = vor.u32 %v9932_v54, %v8966_v48  ;;  %v7963_v22 = vor.u32 %v9678_v60, %v7960_v43  ;;  %v8919_v48 = vor.u32 %v9920_v40, %v8918_v8  ;;  %v8520_v43 = vld [vmem:[#allocation7 + $0x478] sm:$0xf0] }
 0x31e   :  { %v7995_v47 = vor.u32 %v9686_v25, %v7992_v28  ;;  %v9754_v25 = vld [vmem:[#allocation7 + $0x26c] sm:$0xf]  ;;  %v8264_v28 = vld [vmem:[#allocation7 + $0x278] sm:$0xf0] }
 0x31f   :  { %5489 = vmatpush.bf16.msra.mxu0 %v8059_v13  ;;  %v9780_v13 = vld [vmem:[#allocation7 + $0x334] sm:$0xf0]  ;;  %v5239_v33 = vpop.f32.mrf.mxu0  ;;  %v9818_v60 = vld [vmem:[#allocation7 + $0x46c] sm:$0xf] }
 0x320   :  { %5427 = vmatpush.bf16.msra.mxu3 %v8391_v53  ;;  %v8359_v14 = vor.u32 %v9780_v13, %v8358_v58  ;;  %v8091_v53 = vor.u32 %v9710_v61, %v8088_v7  ;;  %v8552_v58 = vld [vmem:[#allocation7 + $0x4b8] sm:$0xf0]  ;;  %v9858_v13 = vld [vmem:[#allocation7 + $0x5ac] sm:$0xf] }
 0x321   :  { %5502 = vmatpush.bf16.msra.mxu1 %v8187_v10  ;;  %v8123_v10 = vor.u32 %v9718_v27, %v8120_v49  ;;  %5469 = vmatpush.bf16.msrb.mxu2 %v8727_v4  ;;  %v5252_v39 = vpop.f32.mrf.mxu1  ;;  %v8934_v27 = vld [vmem:[#allocation7 + $0x7a8] sm:$0xf]  ;;  %v9924_v49 = vld [vmem:[#allocation7 + $0x7b4] sm:$0xf0]  ;;  %v8683_v33 = vor.u32 %v9858_v13, %v8680_v44  ;;  %v9850_v7 = vld [vmem:[#allocation7 + $0x56c] sm:$0xf] }
 0x322   :  { %v8935_v17 = vor.u32 %v9924_v49, %v8934_v27  ;;  %v9746_v39 = vld [vmem:[#allocation7 + $0x22c] sm:$0xf]  ;;  %v8824_v27 = vld [vmem:[#allocation7 + $0x6d8] sm:$0xf0] }
 0x323   :  { %5490 = vmatpush.bf16.msra.mxu0 %v8043_v46  ;;  %v9776_v46 = vld [vmem:[#allocation7 + $0x314] sm:$0xf0] }
 0x324   :  { %5428 = vmatpush.bf16.msra.mxu3 %v8375_v35  ;;  %5470 = vmatmul.bf16.vlgmr.msrb.gmra.mxu2 %v10488_v63  ;;  %v8343_v3 = vor.u32 %v9776_v46, %v8342_v45  ;;  %v8699_v35 = vor.u32 %v9862_v59, %v8696_v20  ;;  %v9854_v45 = vld [vmem:[#allocation7 + $0x58c] sm:$0xf]  ;;  %v8664_v46 = vld [vmem:[#allocation7 + $0x598] sm:$0xf0] }
 0x325   :  { %5503 = vmatpush.bf16.msra.mxu1 %v8171_v52  ;;  %5514 = vmatpush.bf16.msra.mxu2 %v8331_v29  ;;  %v7979_v52 = vor.u32 %v9682_v50, %v7976_v5  ;;  %v9826_v29 = vld [vmem:[#allocation7 + $0x4ac] sm:$0xf]  ;;  %v8248_v50 = vld [vmem:[#allocation7 + $0x258] sm:$0xf0] }
 0x326   :  { %v8555_v5 = vor.u32 %v9826_v29, %v8552_v58  ;;  %v8488_v29 = vld [vmem:[#allocation7 + $0x438] sm:$0xf0]  ;;  %v9842_v58 = vld [vmem:[#allocation7 + $0x52c] sm:$0xf] }
 0x327   :  { %5491 = vmatpush.bf16.msra.mxu0 %v8027_v62  ;;  %v9834_v62 = vld [vmem:[#allocation7 + $0x4ec] sm:$0xf] }
 0x328   :  { %5429 = vmatpush.bf16.msra.mxu3 %v8359_v14  ;;  %v8587_v12 = vor.u32 %v9834_v62, %v8584_v1  ;;  %v9822_v14 = vld [vmem:[#allocation7 + $0x48c] sm:$0xf]  ;;  %v8648_v62 = vld [vmem:[#allocation7 + $0x578] sm:$0xf0] }
 0x329   :  { %5504 = vmatpush.bf16.msra.mxu1 %v8155_v41  ;;  %5515 = vmatpush.bf16.msra.mxu2 %v8315_v37  ;;  %v8299_v41 = vor.u32 %v9762_v55, %v8296_v56  ;;  %v8536_v37 = vld [vmem:[#allocation7 + $0x498] sm:$0xf0]  ;;  %v8902_v55 = vld [vmem:[#allocation7 + $0x768] sm:$0xf]  ;;  %v9916_v56 = vld [vmem:[#allocation7 + $0x774] sm:$0xf0] }
 0x32a   :  { %v8539_v54 = vor.u32 %v9822_v14, %v8536_v37  ;;  %v9890_v14 = vld [vmem:[#allocation7 + $0x6ac] sm:$0xf]  ;;  %v8808_v37 = vld [vmem:[#allocation7 + $0x6b8] sm:$0xf0] }
 0x32b   :  { %5492 = vmatpush.bf16.msra.mxu0 %v8011_v0  ;;  %v8568_v0 = vld [vmem:[#allocation7 + $0x4d8] sm:$0xf0] }
 0x32c   :  { %5430 = vmatpush.bf16.msra.mxu3 %v8343_v3  ;;  %v8571_v4 = vor.u32 %v9830_v34, %v8568_v0  ;;  %v8903_v3 = vor.u32 %v9916_v56, %v8902_v55  ;;  %v8219_v34 = vor.u32 %v9742_v42, %v8216_v6  ;;  %v9846_v0 = vld [vmem:[#allocation7 + $0x54c] sm:$0xf]  ;;  %v8811_v55 = vor.u32 %v9890_v14, %v8808_v37 }
 0x32d   :  { %5505 = vmatpush.bf16.msra.mxu1 %v8139_v23  ;;  %5516 = vmatpush.bf16.msra.mxu2 %v8299_v41  ;;  %v8951_v23 = vor.u32 %v9928_v16, %v8950_v15  ;;  %v8886_v41 = vld [vmem:[#allocation7 + $0x748] sm:$0xf]  ;;  %v9814_v15 = vld [vmem:[#allocation7 + $0x44c] sm:$0xf]  ;;  %v8504_v16 = vld [vmem:[#allocation7 + $0x458] sm:$0xf0] }
 0x32e   :  { %v8887_v59 = vor.u32 %v9912_v11, %v8886_v41  ;;  %v9882_v6 = vld [vmem:[#allocation7 + $0x66c] sm:$0xf] }
 0x32f   :  { %5493 = vmatpush.bf16.msra.mxu0 %v7995_v47  ;;  %5431 = vmatmul.bf16.vlgmr.msra.gmra.mxu3 %v10443_v32  ;;  %v8267_v47 = vor.u32 %v9754_v25, %v8264_v28  ;;  %v8507_v25 = vor.u32 %v9814_v15, %v8504_v16  ;;  %v9908_v28 = vld [vmem:[#allocation7 + $0x734] sm:$0xf0]  ;;  %v9782_v14 = vld [vmem:[#allocation7 + $0x34c] sm:$0xf] }
 0x330   :  { %5475 = vmatpush.bf16.msrb.mxu3 %v8967_v38  ;;  %v9870_v37 = vld [vmem:[#allocation7 + $0x60c] sm:$0xf] }
 0x331   :  { %5506 = vmatpush.bf16.msra.mxu1 %v8123_v10  ;;  %5517 = vmatpush.bf16.msra.mxu2 %v8283_v36  ;;  %v9750_v10 = vld [vmem:[#allocation7 + $0x24c] sm:$0xf]  ;;  %v8632_v36 = vld [vmem:[#allocation7 + $0x558] sm:$0xf0] }
 0x332   :  { %v8635_v49 = vor.u32 %v9846_v0, %v8632_v36  ;;  %v9878_v0 = vld [vmem:[#allocation7 + $0x64c] sm:$0xf]  ;;  %v8760_v36 = vld [vmem:[#allocation7 + $0x658] sm:$0xf0] }
 0x333   :  { %5494 = vmatpush.bf16.msra.mxu0 %v7979_v52  ;;  %v8232_v52 = vld [vmem:[#allocation7 + $0x238] sm:$0xf0] }
 0x334   :  { %5476 = vmatpush.bf16.msrb.mxu3 %v8951_v23  ;;  %v8235_v61 = vor.u32 %v9746_v39, %v8232_v52  ;;  %v8870_v23 = vld [vmem:[#allocation7 + $0x728] sm:$0xf]  ;;  %v8600_v39 = vld [vmem:[#allocation7 + $0x518] sm:$0xf0]  ;;  %v9030_v52 = vld [vmem:[#allocation10 + $0x70] sm:$0xf] }
 0x335   :  { %5507 = vmatpush.bf16.msra.mxu1 %v8107_v57  ;;  %5518 = vmatpush.bf16.msra.mxu2 %v8267_v47  ;;  %v8667_v57 = vor.u32 %v9854_v45, %v8664_v46  ;;  %v8616_v47 = vld [vmem:[#allocation7 + $0x538] sm:$0xf0]  ;;  %v8871_v44 = vor.u32 %v9908_v28, %v8870_v23  ;;  %v9806_v45 = vld [vmem:[#allocation7 + $0x40c] sm:$0xf]  ;;  %v9094_v23 = vld [vmem:[#allocation10 + $0xf0] sm:$0xf] }
 0x336   :  { %v8472_v46 = vld [vmem:[#allocation7 + $0x418] sm:$0xf0]  ;;  %v9006_v28 = vld [vmem:[#allocation10 + $0x40] sm:$0xf] }
 0x337   :  { %5495 = vmatpush.bf16.msra.mxu0 %v7963_v22  ;;  %v5289_v1 = vpop.f32.mrf.mxu0 }
 0x338   :  { %5477 = vmatpush.bf16.msrb.mxu3 %v8935_v17 }
 0x339   :  { %5508 = vmatpush.bf16.msra.mxu1 %v8091_v53  ;;  %v5302_v22 = vpop.f32.mrf.mxu1  ;;  %v8840_v53 = vld [vmem:[#allocation7 + $0x6f8] sm:$0xf0] }
 0x33a   :  { %5496 = vmatmul.bf16.vlgmr.msra.gmra.mxu0 %v10437_v30  ;;  %v8251_v30 = vor.u32 %v9750_v10, %v8248_v50  ;;  %v8843_v20 = vor.u32 %v9898_v51, %v8840_v53  ;;  %v8854_v10 = vld [vmem:[#allocation7 + $0x708] sm:$0xf]  ;;  %v9904_v50 = vld [vmem:[#allocation7 + $0x714] sm:$0xf0]  ;;  %v9014_v51 = vld [vmem:[#allocation10 + $0x50] sm:$0xf] }
 0x33b   :  { %5540 = vmatpush.bf16.msrb.mxu0 %v8587_v12  ;;  %v8651_v12 = vor.u32 %v9850_v7, %v8648_v62  ;;  %v9798_v7 = vld [vmem:[#allocation7 + $0x3cc] sm:$0xf]  ;;  %v9944_v53 = vld [vmem:[#allocation10 + $0x54] sm:$0xf0] }
 0x33c   :  { %5509 = vmatmul.bf16.vlgmr.msra.gmra.mxu1 %v10439_v31  ;;  %v3889_v31 = vperm.slane %v10508_v9, 1  ;;  %5519 = vmatpush.bf16.msra.mxu2 %v8251_v30  ;;  %v8523_v9 = vor.u32 %v9818_v60, %v8520_v43  ;;  %v8619_v30 = vor.u32 %v9842_v58, %v8616_v47  ;;  %v9886_v60 = vld [vmem:[#allocation7 + $0x68c] sm:$0xf]  ;;  %v8792_v43 = vld [vmem:[#allocation7 + $0x698] sm:$0xf0] }
 0x33d   :  { %5553 = vmatpush.bf16.msrb.mxu1 %v8715_v24  ;;  %5478 = vmatpush.bf16.msrb.mxu3 %v8919_v48  ;;  %v9838_v48 = vld [vmem:[#allocation7 + $0x50c] sm:$0xf]  ;;  %v8795_v41 = vor.u32 %v9886_v60, %v8792_v43  ;;  %v8392_v58 = vld [vmem:[#allocation7 + $0x378] sm:$0xf0] }
 0x33e   :  { %v5290_v38 = vadd.f32 %v5289_v1, %v3889_v31  ;;  %v9948_v31 = vld [vmem:[#allocation10 + $0x74] sm:$0xf0]  ;;  %v9022_v1 = vld [vmem:[#allocation10 + $0x60] sm:$0xf]  ;;  %v9778_v60 = vld [vmem:[#allocation7 + $0x32c] sm:$0xf] }
 0x33f   :  { %5541 = vmatpush.bf16.msrb.mxu0 %v8571_v4  ;;  %v9894_v4 = vld [vmem:[#allocation7 + $0x6cc] sm:$0xf]  ;;  %v5291_v13 = vpop.f32.mrf.mxu0  ;;  %v9031_v62 = vor.u32 %v9948_v31, %v9030_v52  ;;  %v9960_v52 = vld [vmem:[#allocation10 + $0xd4] sm:$0xf0]  ;;  %v8990_v31 = vld [vmem:[#allocation10 + $0x20] sm:$0xf] }
 0x340   :  { %v10526_v24 = vadd.f32 %v5302_v22, %v5290_v38  ;;  %5520 = vmatpush.bf16.msra.mxu2 %v8235_v61  ;;  %v8827_v17 = vor.u32 %v9894_v4, %v8824_v27  ;;  %v8603_v61 = vor.u32 %v9838_v48, %v8600_v39  ;;  %v8776_v38 = vld [vmem:[#allocation7 + $0x678] sm:$0xf0]  ;;  %v9794_v22 = vld [vmem:[#allocation7 + $0x3ac] sm:$0xf]  ;;  %v10532_v15 = vpop.f32.mrf.mxu2  ;;  %v9086_v13 = vld [vmem:[#allocation10 + $0xe0] sm:$0xf] }
 0x341   :  { %5554 = vmatpush.bf16.msrb.mxu1 %v8699_v35  ;;  %5479 = vmatpush.bf16.msrb.mxu3 %v8903_v3  ;;  %v9810_v35 = vld [vmem:[#allocation7 + $0x42c] sm:$0xf]  ;;  %v5304_v8 = vpop.f32.mrf.mxu1  ;;  %v9078_v39 = vld [vmem:[#allocation10 + $0xd0] sm:$0xf]  ;;  %v8360_v43 = vld [vmem:[#allocation7 + $0x338] sm:$0xf0] }
 0x342   :  { %v8491_v40 = vor.u32 %v9810_v35, %v8488_v29  ;;  %v9946_v3 = vld [vmem:[#allocation10 + $0x64] sm:$0xf0]  ;;  %v8744_v29 = vld [vmem:[#allocation7 + $0x638] sm:$0xf0] }
 0x343   :  { %5542 = vmatpush.bf16.msrb.mxu0 %v8555_v5  ;;  %v9802_v5 = vld [vmem:[#allocation7 + $0x3ec] sm:$0xf]  ;;  %v9023_v11 = vor.u32 %v9946_v3, %v9022_v1  ;;  %v9936_v1 = vld [vmem:[#allocation10 + $0x14] sm:$0xf0] }
 0x344   :  { %5521 = vmatpush.bf16.msra.mxu2 %v8219_v34  ;;  %v9790_v34 = vld [vmem:[#allocation7 + $0x38c] sm:$0xf] }
 0x345   :  { %5555 = vmatpush.bf16.msrb.mxu1 %v8683_v33  ;;  %5480 = vmatpush.bf16.msrb.mxu3 %v8887_v59  ;;  %v8456_v33 = vld [vmem:[#allocation7 + $0x3f8] sm:$0xf0]  ;;  %v9942_v4 = vld [vmem:[#allocation10 + $0x44] sm:$0xf0] }
 0x346   :  { %v8459_v56 = vor.u32 %v9802_v5, %v8456_v33  ;;  %v8408_v59 = vld [vmem:[#allocation7 + $0x398] sm:$0xf0]  ;;  %v9786_v35 = vld [vmem:[#allocation7 + $0x36c] sm:$0xf]  ;;  %v9007_v47 = vor.u32 %v9942_v4, %v9006_v28  ;;  %v9054_v4 = vld [vmem:[#allocation10 + $0xa0] sm:$0xf] }
 0x347   :  { %5543 = vmatpush.bf16.msrb.mxu0 %v8539_v54  ;;  %5522 = vmatmul.bf16.vlgmr.msra.gmra.mxu2 %v10441_v2  ;;  %v8855_v54 = vor.u32 %v9904_v50, %v8854_v10  ;;  %v8440_v2 = vld [vmem:[#allocation7 + $0x3d8] sm:$0xf0]  ;;  %v8395_v33 = vor.u32 %v9786_v35, %v8392_v58 }
 0x348   :  { %5566 = vmatpush.bf16.msrb.mxu2 %v8843_v20  ;;  %v8443_v42 = vor.u32 %v9798_v7, %v8440_v2  ;;  %v9015_v20 = vor.u32 %v9944_v53, %v9014_v51  ;;  %v9940_v10 = vld [vmem:[#allocation10 + $0x34] sm:$0xf0]  ;;  %v9070_v7 = vld [vmem:[#allocation10 + $0xc0] sm:$0xf]  ;;  %v9958_v2 = vld [vmem:[#allocation10 + $0xc4] sm:$0xf0] }
 0x349   :  { %5556 = vmatpush.bf16.msrb.mxu1 %v8667_v57  ;;  %5481 = vmatpush.bf16.msrb.mxu3 %v8871_v44  ;;  %v8475_v57 = vor.u32 %v9806_v45, %v8472_v46  ;;  %v9962_v44 = vld [vmem:[#allocation10 + $0xe4] sm:$0xf0]  ;;  %v8376_v46 = vld [vmem:[#allocation7 + $0x358] sm:$0xf0]  ;;  %v9071_v3 = vor.u32 %v9958_v2, %v9070_v7  ;;  %v9062_v53 = vld [vmem:[#allocation10 + $0xb0] sm:$0xf] }
 0x34a   :  { %v9087_v50 = vor.u32 %v9962_v44, %v9086_v13  ;;  %v9046_v13 = vld [vmem:[#allocation10 + $0x90] sm:$0xf]  ;;  %v9952_v44 = vld [vmem:[#allocation10 + $0x94] sm:$0xf0]  ;;  %v9914_v7 = vld [vmem:[#allocation7 + $0x76c] sm:$0xf] }
 0x34b   :  { %5544 = vmatpush.bf16.msrb.mxu0 %v8523_v9  ;;  %v8424_v9 = vld [vmem:[#allocation7 + $0x3b8] sm:$0xf0] }
 0x34c   :  { %5567 = vmatpush.bf16.msrb.mxu2 %v8827_v17  ;;  %v8427_v16 = vor.u32 %v9794_v22, %v8424_v9  ;;  %v8998_v17 = vld [vmem:[#allocation10 + $0x30] sm:$0xf]  ;;  %v8344_v22 = vld [vmem:[#allocation7 + $0x318] sm:$0xf0] }
 0x34d   :  { %5557 = vmatpush.bf16.msrb.mxu1 %v8651_v12  ;;  %5482 = vmatpush.bf16.msrb.mxu3 %v8855_v54  ;;  %v8779_v12 = vor.u32 %v9882_v6, %v8776_v38  ;;  %v8999_v48 = vor.u32 %v9940_v10, %v8998_v17  ;;  %v9938_v54 = vld [vmem:[#allocation10 + $0x24] sm:$0xf0]  ;;  %v8363_v6 = vor.u32 %v9778_v60, %v8360_v43  ;;  %v8936_v10 = vld [vmem:[#allocation7 + $0x7b8] sm:$0xf0]  ;;  %v10544_v43 = vld [vmem:[#allocation8] sm:$0xf] }
 0x34e   :  { %v9774_v38 = vld [vmem:[#allocation7 + $0x30c] sm:$0xf]  ;;  %v8904_v2 = vld [vmem:[#allocation7 + $0x778] sm:$0xf0] }
 0x34f   :  { %5545 = vmatpush.bf16.msrb.mxu0 %v8507_v25  ;;  %v9964_v25 = vld [vmem:[#allocation10 + $0xf4] sm:$0xf0]  ;;  %v9922_v17 = vld [vmem:[#allocation7 + $0x7ac] sm:$0xf] }
 0x350   :  { %5568 = vmatpush.bf16.msrb.mxu2 %v8811_v55  ;;  %5483 = vmatmul.bf16.vlgmr.msrb.gmra.mxu3 %v10503_v18  ;;  %v9095_v27 = vor.u32 %v9964_v25, %v9094_v23  ;;  %v9079_v55 = vor.u32 %v9960_v52, %v9078_v39  ;;  %v8347_v23 = vor.u32 %v9774_v38, %v8344_v22 }
 0x351   :  { %5558 = vmatpush.bf16.msrb.mxu1 %v8635_v49  ;;  %5527 = vmatpush.bf16.msra.mxu3 %v8459_v56  ;;  %v8411_v49 = vor.u32 %v9790_v34, %v8408_v59  ;;  %v8974_v34 = vld [vmem:[#allocation10] sm:$0xf]  ;;  %v9947_v59 = vld [vmem:[#allocation10 + $0x74] sm:$0xf] }
 0x353   :  { %5546 = vmatpush.bf16.msrb.mxu0 %v8491_v40  ;;  %v5265_v40 = vpop.f32.mrf.mxu2 }
 0x354   :  { %5569 = vmatpush.bf16.msrb.mxu2 %v8795_v41  ;;  %v9943_v40 = vld [vmem:[#allocation10 + $0x54] sm:$0xf] }
 0x355   :  { %5559 = vmatpush.bf16.msrb.mxu1 %v8619_v30  ;;  %5528 = vmatpush.bf16.msra.mxu3 %v8443_v42  ;;  %v8728_v30 = vld [vmem:[#allocation7 + $0x618] sm:$0xf0] }
 0x356   :  { %v8731_v56 = vor.u32 %v9870_v37, %v8728_v30  ;;  %v9918_v37 = vld [vmem:[#allocation7 + $0x78c] sm:$0xf]  ;;  %v9038_v30 = vld [vmem:[#allocation10 + $0x80] sm:$0xf] }
 0x357   :  { %5547 = vmatpush.bf16.msrb.mxu0 %v8475_v57  ;;  %v10534_v8 = vpop.f32.mrf.mxu0  ;;  %v8379_v57 = vor.u32 %v9782_v14, %v8376_v46  ;;  %v8939_v14 = vor.u32 %v9922_v17, %v8936_v10  ;;  %v9950_v46 = vld [vmem:[#allocation10 + $0x84] sm:$0xf0] }
 0x358   :  { %5570 = vmatpush.bf16.msrb.mxu2 %v8779_v12  ;;  %v9956_v12 = vld [vmem:[#allocation10 + $0xb4] sm:$0xf0]  ;;  %v9039_v52 = vor.u32 %v9950_v46, %v9038_v30  ;;  %v9064_v30 = vld [vmem:[#allocation10 + $0xb8] sm:$0xf0] }
 0x359   :  { %5560 = vmatpush.bf16.msrb.mxu1 %v8603_v61  ;;  %5529 = vmatpush.bf16.msra.mxu3 %v8427_v16  ;;  %v10536_v45 = vpop.f32.mrf.mxu1  ;;  %v8991_v61 = vor.u32 %v9938_v54, %v8990_v31  ;;  %v8968_v16 = vld [vmem:[#allocation7 + $0x7f8] sm:$0xf0]  ;;  %v9963_v31 = vld [vmem:[#allocation10 + $0xf4] sm:$0xf]  ;;  %v9096_v54 = vld [vmem:[#allocation10 + $0xf8] sm:$0xf0] }
 0x35a   :  { %5548 = vmatmul.bf16.vlgmr.msrb.gmra.mxu0 %v10463_v21  ;;  %v8763_v21 = vor.u32 %v9878_v0, %v8760_v36  ;;  %v9934_v0 = vld [vmem:[#allocation10 + $0x4] sm:$0xf0]  ;;  %v9063_v36 = vor.u32 %v9956_v12, %v9062_v53 }
 0x35b   :  { %5998 = vmatpush.bf16.msra.mxu0 %v9031_v62  ;;  %v8982_v62 = vld [vmem:[#allocation10 + $0x10] sm:$0xf]  ;;  %v10538_v42 = vpop.f32.mrf.mxu2  ;;  %v8975_v28 = vor.u32 %v9934_v0, %v8974_v34  ;;  %v9959_v0 = vld [vmem:[#allocation10 + $0xd4] sm:$0xf] }
 0x35c   :  { %5561 = vmatmul.bf16.vlgmr.msrb.gmra.mxu1 %v10465_v19  ;;  %v9874_v19 = vld [vmem:[#allocation7 + $0x62c] sm:$0xf]  ;;  %5571 = vmatpush.bf16.msrb.mxu2 %v8763_v21  ;;  %v8983_v51 = vor.u32 %v9936_v1, %v8982_v62  ;;  %v9961_v1 = vld [vmem:[#allocation10 + $0xe4] sm:$0xf] }
 0x35d   :  { %6011 = vmatpush.bf16.msra.mxu1 %v9095_v27  ;;  %v8747_v5 = vor.u32 %v9874_v19, %v8744_v29  ;;  %5530 = vmatpush.bf16.msra.mxu3 %v8411_v49  ;;  %v9954_v27 = vld [vmem:[#allocation10 + $0xa4] sm:$0xf0]  ;;  %v8952_v49 = vld [vmem:[#allocation7 + $0x7d8] sm:$0xf0]  ;;  %v9945_v29 = vld [vmem:[#allocation10 + $0x64] sm:$0xf] }
 0x35e   :  { %v9926_v21 = vld [vmem:[#allocation7 + $0x7cc] sm:$0xf]  ;;  %v9055_v19 = vor.u32 %v9954_v27, %v9054_v4 }
 0x35f   :  { %5999 = vmatpush.bf16.msra.mxu0 %v9023_v11  ;;  %v5343_v41 = vpop.f32.mrf.mxu0  ;;  %v9930_v11 = vld [vmem:[#allocation7 + $0x7ec] sm:$0xf] }
 0x360   :  { %5572 = vmatpush.bf16.msrb.mxu2 %v8747_v5  ;;  %v8971_v25 = vor.u32 %v9930_v11, %v8968_v16  ;;  %v9047_v5 = vor.u32 %v9952_v44, %v9046_v13  ;;  %v9939_v41 = vld [vmem:[#allocation10 + $0x34] sm:$0xf]  ;;  %v9910_v11 = vld [vmem:[#allocation7 + $0x74c] sm:$0xf]  ;;  %v8888_v16 = vld [vmem:[#allocation7 + $0x758] sm:$0xf0] }
 0x361   :  { %6012 = vmatpush.bf16.msra.mxu1 %v9087_v50  ;;  %5531 = vmatpush.bf16.msra.mxu3 %v8395_v33  ;;  %v5356_v9 = vpop.f32.mrf.mxu1  ;;  %v9016_v33 = vld [vmem:[#allocation10 + $0x58] sm:$0xf0] }
 0x362   :  { %v9019_v39 = vor.u32 %v9943_v40, %v9016_v33  ;;  %v8907_v9 = vor.u32 %v9914_v7, %v8904_v2  ;;  %v5316_v2 = vadd.f32 %v10538_v42, %v10526_v24 }
 0x363   :  { %6000 = vmatpush.bf16.msra.mxu0 %v9015_v20  ;;  %v9032_v20 = vld [vmem:[#allocation10 + $0x78] sm:$0xf0]  ;;  %v5317_v58 = vpop.f32.mrf.mxu2 }
 0x364   :  { %5573 = vmatpush.bf16.msrb.mxu2 %v8731_v56  ;;  %v9035_v35 = vor.u32 %v9947_v59, %v9032_v20  ;;  %v9008_v56 = vld [vmem:[#allocation10 + $0x48] sm:$0xf0]  ;;  %v9937_v20 = vld [vmem:[#allocation10 + $0x24] sm:$0xf] }
 0x365   :  { %6013 = vmatpush.bf16.msra.mxu1 %v9079_v55  ;;  %5532 = vmatpush.bf16.msra.mxu3 %v8379_v57  ;;  %v9941_v55 = vld [vmem:[#allocation10 + $0x44] sm:$0xf]  ;;  %v9099_v57 = vor.u32 %v9963_v31, %v9096_v54  ;;  %v9072_v58 = vld [vmem:[#allocation10 + $0xc8] sm:$0xf0] }
 0x366   :  { %v9011_v62 = vor.u32 %v9941_v55, %v9008_v56  ;;  %v9056_v31 = vld [vmem:[#allocation10 + $0xa8] sm:$0xf0] }
 0x367   :  { %6001 = vmatpush.bf16.msra.mxu0 %v9007_v47  ;;  %5574 = vmatmul.bf16.vlgmr.msrb.gmra.mxu2 %v10488_v63  ;;  %v9024_v63 = vld [vmem:[#allocation10 + $0x68] sm:$0xf0]  ;;  %v8955_v47 = vor.u32 %v9926_v21, %v8952_v49  ;;  %v8891_v21 = vor.u32 %v9910_v11, %v8888_v16  ;;  %v9906_v49 = vld [vmem:[#allocation7 + $0x72c] sm:$0xf]  ;;  %v9142_v16 = vld [vmem:[#allocation10 + $0x150] sm:$0xf] }
 0x368   :  { %v9027_v50 = vor.u32 %v9945_v29, %v9024_v63  ;;  %v9935_v29 = vld [vmem:[#allocation10 + $0x14] sm:$0xf]  ;;  %v8984_v63 = vld [vmem:[#allocation10 + $0x18] sm:$0xf0] }
 0x369   :  { %6014 = vmatpush.bf16.msra.mxu1 %v9071_v3  ;;  %5533 = vmatpush.bf16.msra.mxu3 %v8363_v6  ;;  %v9088_v3 = vld [vmem:[#allocation10 + $0xe8] sm:$0xf0]  ;;  %v9000_v6 = vld [vmem:[#allocation10 + $0x38] sm:$0xf0]  ;;  %v8987_v33 = vor.u32 %v9935_v29, %v8984_v63  ;;  %v9118_v29 = vld [vmem:[#allocation10 + $0x120] sm:$0xf] }
 0x36a   :  { %v9091_v38 = vor.u32 %v9961_v1, %v9088_v3  ;;  %v9003_v34 = vor.u32 %v9939_v41, %v9000_v6  ;;  %v9158_v1 = vld [vmem:[#allocation10 + $0x170] sm:$0xf]  ;;  %v9980_v3 = vld [vmem:[#allocation10 + $0x174] sm:$0xf0]  ;;  %v9949_v41 = vld [vmem:[#allocation10 + $0x84] sm:$0xf] }
 0x36b   :  { %6002 = vmatpush.bf16.msra.mxu0 %v8999_v48  ;;  %v8920_v48 = vld [vmem:[#allocation7 + $0x798] sm:$0xf0]  ;;  %v10542_v60 = vpop.f32.mrf.mxu2  ;;  %v9159_v6 = vor.u32 %v9980_v3, %v9158_v1  ;;  %v9970_v63 = vld [vmem:[#allocation10 + $0x124] sm:$0xf0] }
 0x36d   :  { %6015 = vmatpush.bf16.msra.mxu1 %v9063_v36  ;;  %5534 = vmatpush.bf16.msra.mxu3 %v8347_v23  ;;  %v9080_v36 = vld [vmem:[#allocation10 + $0xd8] sm:$0xf0]  ;;  %v8992_v23 = vld [vmem:[#allocation10 + $0x28] sm:$0xf0] }
 0x36e   :  { %v5276_v59 = vpop.f32.mrf.mxu3  ;;  %6024 = vmatpush.bf16.msra.mxu2 %v9159_v6 }
 0x36f   :  { %6003 = vmatpush.bf16.msra.mxu0 %v8991_v61  ;;  %v3890_v61 = vperm.slane %v10544_v43, 2 }
 0x370   :  { %5535 = vmatmul.bf16.vlgmr.msra.gmra.mxu3 %v10443_v32  ;;  %v8923_v32 = vor.u32 %v9918_v37, %v8920_v48  ;;  %v9955_v37 = vld [vmem:[#allocation10 + $0xb4] sm:$0xf]  ;;  %v8976_v48 = vld [vmem:[#allocation10 + $0x8] sm:$0xf0] }
 0x371   :  { %6016 = vmatpush.bf16.msra.mxu1 %v9055_v19  ;;  %5579 = vmatpush.bf16.msrb.mxu3 %v8971_v25  ;;  %v9083_v25 = vor.u32 %v9959_v0, %v9080_v36  ;;  %v9957_v19 = vld [vmem:[#allocation10 + $0xc4] sm:$0xf] }
 0x372   :  { %v9075_v13 = vor.u32 %v9957_v19, %v9072_v58 }
 0x373   :  { %6004 = vmatpush.bf16.msra.mxu0 %v8983_v51  ;;  %v5264_v51 = vadd.f32 %v10532_v15, %v10519_v26  ;;  %v5369_v27 = vpop.f32.mrf.mxu2  ;;  %v8995_v15 = vor.u32 %v9937_v20, %v8992_v23  ;;  %v9134_v20 = vld [vmem:[#allocation10 + $0x140] sm:$0xf]  ;;  %v9974_v23 = vld [vmem:[#allocation10 + $0x144] sm:$0xf0] }
 0x375   :  { %6017 = vmatpush.bf16.msra.mxu1 %v9047_v5  ;;  %5580 = vmatpush.bf16.msrb.mxu3 %v8955_v47  ;;  %v5277_v4 = vadd.f32 %v5276_v59, %v5264_v51  ;;  %v8856_v5 = vld [vmem:[#allocation7 + $0x718] sm:$0xf0]  ;;  %v9150_v51 = vld [vmem:[#allocation10 + $0x160] sm:$0xf] }
 0x376   :  { %v5278_v46 = vpop.f32.mrf.mxu3 }
 0x377   :  { %6005 = vmatpush.bf16.msra.mxu0 %v8975_v28  ;;  %v5393_v22 = vpop.f32.mrf.mxu0  ;;  %vm5592_vm8 = vcmp.gt.f32.partialorder %v5277_v4, 0.0  ;;  %v5596_v26 = vmul.f32 0.2, %v5277_v4  ;;  %v9152_v46 = vld [vmem:[#allocation10 + $0x168] sm:$0xf0] }
 0x378   :  { %v5394_v53 = vadd.f32 %v5393_v22, %v3890_v61 }
 0x379   :  { %6018 = vmatpush.bf16.msra.mxu1 %v9039_v52  ;;  %5581 = vmatpush.bf16.msrb.mxu3 %v8939_v14  ;;  %v5406_v12 = vpop.f32.mrf.mxu1  ;;  %v5600_v47 = vsel %vm5592_vm8, %v5277_v4, %v5596_v26  ;;  %v9933_v14 = vld [vmem:[#allocation10 + $0x4] sm:$0xf]  ;;  %v9135_v4 = vor.u32 %v9974_v23, %v9134_v20  ;;  %v9972_v26 = vld [vmem:[#allocation10 + $0x134] sm:$0xf0]  ;;  %v9222_v20 = vld [vmem:[#allocation10 + $0x1f0] sm:$0xf] }
 0x37a   :  { %v10549_v28 = vadd.f32 %v5406_v12, %v5394_v53  ;;  %v5604_v44 = vpack.c.bf16 %v5600_v47, %v5600_v47  ;;  %v9953_v52 = vld [vmem:[#allocation10 + $0xa4] sm:$0xf]  ;;  %v8979_v55 = vor.u32 %v9933_v14, %v8976_v48  ;;  %v9978_v53 = vld [vmem:[#allocation10 + $0x164] sm:$0xf0]  ;;  %v9119_v47 = vor.u32 %v9970_v63, %v9118_v29  ;;  %v9996_v23 = vld [vmem:[#allocation10 + $0x1f4] sm:$0xf0] }
 0x37b   :  { %6050 = vmatpush.bf16.msrb.mxu0 %v9035_v35  ;;  %v8872_v35 = vld [vmem:[#allocation7 + $0x738] sm:$0xf0]  ;;  %v9059_v56 = vor.u32 %v9953_v52, %v9056_v31  ;;  %v9151_v24 = vor.u32 %v9978_v53, %v9150_v51  ;;  %v3891_v48 = vperm.slane %v10544_v43, 3  ;;  %v9975_v31 = vld [vmem:[#allocation10 + $0x154] sm:$0xf] }
 0x37c   :  { %v8875_v10 = vor.u32 %v9906_v49, %v8872_v35  ;;  %6006 = vmatmul.bf16.vlgmr.msra.gmra.mxu0 %v5604_v44  ;;  %v9126_v35 = vld [vmem:[#allocation10 + $0x130] sm:$0xf]  ;;  %v9971_v43 = vld [vmem:[#allocation10 + $0x134] sm:$0xf] }
 0x37d   :  { %6063 = vmatpush.bf16.msrb.mxu1 %v9099_v57  ;;  %5582 = vmatpush.bf16.msrb.mxu3 %v8923_v32  ;;  %v9951_v57 = vld [vmem:[#allocation10 + $0x94] sm:$0xf]  ;;  %v9048_v32 = vld [vmem:[#allocation10 + $0x98] sm:$0xf0]  ;;  %v9127_v19 = vor.u32 %v9972_v26, %v9126_v35  ;;  %v9992_v26 = vld [vmem:[#allocation10 + $0x1d4] sm:$0xf0] }
 0x37e   :  { %v9051_v61 = vor.u32 %v9951_v57, %v9048_v32  ;;  %v5328_v7 = vpop.f32.mrf.mxu3  ;;  %6025 = vmatpush.bf16.msra.mxu2 %v9151_v24  ;;  %v9112_v24 = vld [vmem:[#allocation10 + $0x118] sm:$0xf0] }
 0x37f   :  { %6051 = vmatpush.bf16.msrb.mxu0 %v9027_v50  ;;  %v5395_v17 = vpop.f32.mrf.mxu0  ;;  %v9902_v50 = vld [vmem:[#allocation7 + $0x70c] sm:$0xf] }
 0x380   :  { %v8859_v54 = vor.u32 %v9902_v50, %v8856_v5  ;;  %v9966_v50 = vld [vmem:[#allocation10 + $0x104] sm:$0xf0] }
 0x381   :  { %6064 = vmatpush.bf16.msrb.mxu1 %v9091_v38  ;;  %5583 = vmatpush.bf16.msrb.mxu3 %v8907_v9  ;;  %v5408_v40 = vpop.f32.mrf.mxu1  ;;  %v9040_v38 = vld [vmem:[#allocation10 + $0x88] sm:$0xf0] }
 0x382   :  { %v9043_v22 = vor.u32 %v9949_v41, %v9040_v38  ;;  %v9979_v40 = vld [vmem:[#allocation10 + $0x174] sm:$0xf]  ;;  %v9128_v41 = vld [vmem:[#allocation10 + $0x138] sm:$0xf0] }
 0x383   :  { %6052 = vmatpush.bf16.msrb.mxu0 %v9019_v39  ;;  %v9067_v39 = vor.u32 %v9955_v37, %v9064_v30  ;;  %v10554_v9 = vpop.f32.mrf.mxu2  ;;  %v9977_v30 = vld [vmem:[#allocation10 + $0x164] sm:$0xf]  ;;  %v9131_v38 = vor.u32 %v9971_v43, %v9128_v41  ;;  %v9208_v43 = vld [vmem:[#allocation10 + $0x1d8] sm:$0xf0] }
 0x385   :  { %6065 = vmatpush.bf16.msrb.mxu1 %v9083_v25  ;;  %5584 = vmatpush.bf16.msrb.mxu3 %v8891_v21 }
 0x386   :  { %v5330_v12 = vpop.f32.mrf.mxu3 }
 0x387   :  { %6053 = vmatpush.bf16.msrb.mxu0 %v9011_v62  ;;  %v5329_v62 = vadd.f32 %v5328_v7, %v5316_v2  ;;  %v9973_v7 = vld [vmem:[#allocation10 + $0x144] sm:$0xf]  ;;  %v9136_v2 = vld [vmem:[#allocation10 + $0x148] sm:$0xf0]  ;;  %v9967_v12 = vld [vmem:[#allocation10 + $0x114] sm:$0xf] }
 0x388   :  { %v9139_v1 = vor.u32 %v9973_v7, %v9136_v2  ;;  %v9993_v7 = vld [vmem:[#allocation10 + $0x1e4] sm:$0xf]  ;;  %v9216_v2 = vld [vmem:[#allocation10 + $0x1e8] sm:$0xf0] }
 0x389   :  { %6066 = vmatpush.bf16.msrb.mxu1 %v9075_v13  ;;  %5585 = vmatpush.bf16.msrb.mxu3 %v8875_v10  ;;  %v5342_v11 = vadd.f32 %v10534_v8, %v5329_v62  ;;  %v9110_v13 = vld [vmem:[#allocation10 + $0x110] sm:$0xf]  ;;  %v9102_v10 = vld [vmem:[#allocation10 + $0x100] sm:$0xf] }
 0x38a   :  { %v9103_v5 = vor.u32 %v9966_v50, %v9102_v10  ;;  %v9190_v10 = vld [vmem:[#allocation10 + $0x1b0] sm:$0xf] }
 0x38b   :  { %6054 = vmatpush.bf16.msrb.mxu0 %v9003_v34  ;;  %v5355_v42 = vadd.f32 %v10536_v45, %v5342_v11  ;;  %v9976_v34 = vld [vmem:[#allocation10 + $0x154] sm:$0xf0]  ;;  %v5421_v59 = vpop.f32.mrf.mxu2  ;;  %v9120_v11 = vld [vmem:[#allocation10 + $0x128] sm:$0xf0] }
 0x38c   :  { %v9143_v36 = vor.u32 %v9976_v34, %v9142_v16  ;;  %v5420_v16 = vadd.f32 %v10554_v9, %v10549_v28  ;;  %v9965_v34 = vld [vmem:[#allocation10 + $0x104] sm:$0xf]  ;;  %v9206_v9 = vld [vmem:[#allocation10 + $0x1d0] sm:$0xf] }
 0x38d   :  { %6067 = vmatpush.bf16.msrb.mxu1 %v9067_v39  ;;  %5586 = vmatpush.bf16.msrb.mxu3 %v8859_v54  ;;  %v5368_v8 = vadd.f32 %v10542_v60, %v5355_v42  ;;  %v9155_v39 = vor.u32 %v9977_v30, %v9152_v46  ;;  %v9144_v54 = vld [vmem:[#allocation10 + $0x158] sm:$0xf0]  ;;  %v9115_v42 = vor.u32 %v9967_v12, %v9112_v24 }
 0x38e   :  { %6026 = vmatpush.bf16.msra.mxu2 %v9143_v36  ;;  %v9147_v57 = vor.u32 %v9975_v31, %v9144_v54  ;;  %v9104_v36 = vld [vmem:[#allocation10 + $0x108] sm:$0xf0]  ;;  %v9166_v31 = vld [vmem:[#allocation10 + $0x180] sm:$0xf]  ;;  %v9982_v54 = vld [vmem:[#allocation10 + $0x184] sm:$0xf0] }
 0x38f   :  { %6055 = vmatpush.bf16.msrb.mxu0 %v8995_v15  ;;  %v9192_v12 = vld [vmem:[#allocation10 + $0x1b8] sm:$0xf0] }
 0x390   :  { %5587 = vmatmul.bf16.vlgmr.msrb.gmra.mxu3 %v10503_v18 }
 0x391   :  { %6068 = vmatpush.bf16.msrb.mxu1 %v9059_v56 }
 0x392   :  { %v5380_v25 = vpop.f32.mrf.mxu3  ;;  %6027 = vmatpush.bf16.msra.mxu2 %v9135_v4 }
 0x393   :  { %6056 = vmatpush.bf16.msrb.mxu0 %v8987_v33  ;;  %v5381_v27 = vadd.f32 %v5380_v25, %v5368_v8  ;;  %v9160_v33 = vld [vmem:[#allocation10 + $0x178] sm:$0xf0]  ;;  %v9107_v8 = vor.u32 %v9965_v34, %v9104_v36  ;;  %v9223_v25 = vor.u32 %v9996_v23, %v9222_v20 }
 0x394   :  { %v9163_v14 = vor.u32 %v9979_v40, %v9160_v33  ;;  %v9182_v33 = vld [vmem:[#allocation10 + $0x1a0] sm:$0xf] }
 0x395   :  { %6069 = vmatpush.bf16.msrb.mxu1 %v9051_v61  ;;  %vm5593_vm9 = vcmp.gt.f32.partialorder %v5381_v27, 0.0  ;;  %v5597_v21 = vmul.f32 0.2, %v5381_v27  ;;  %6037 = vmatpush.bf16.msra.mxu3 %v9223_v25 }
 0x396   :  { %6028 = vmatpush.bf16.msra.mxu2 %v9127_v19  ;;  %v9207_v19 = vor.u32 %v9992_v26, %v9206_v9 }
 0x397   :  { %6057 = vmatpush.bf16.msrb.mxu0 %v8979_v55  ;;  %v10557_v18 = vpop.f32.mrf.mxu0  ;;  %v5601_v15 = vsel %vm5593_vm9, %v5381_v27, %v5597_v21  ;;  %v9214_v21 = vld [vmem:[#allocation10 + $0x1e0] sm:$0xf] }
 0x398   :  { %v5605_v58 = vpack.c.bf16 %v5601_v15, %v5601_v15 }
 0x399   :  { %6070 = vmatpush.bf16.msrb.mxu1 %v9043_v22  ;;  %v10560_v0 = vpop.f32.mrf.mxu1  ;;  %v9969_v22 = vld [vmem:[#allocation10 + $0x124] sm:$0xf] }
 0x39a   :  { %6058 = vmatmul.bf16.vlgmr.msrb.gmra.mxu0 %v5604_v44  ;;  %v5382_v60 = vpop.f32.mrf.mxu3  ;;  %6019 = vmatmul.bf16.vlgmr.msra.gmra.mxu1 %v5605_v58  ;;  %v9968_v44 = vld [vmem:[#allocation10 + $0x114] sm:$0xf0]  ;;  %v9123_v51 = vor.u32 %v9969_v22, %v9120_v11  ;;  %v9200_v22 = vld [vmem:[#allocation10 + $0x1c8] sm:$0xf0] }
 0x39b   :  { %6029 = vmatpush.bf16.msra.mxu2 %v9119_v47  ;;  %v9111_v17 = vor.u32 %v9968_v44, %v9110_v13 }
 0x39f   :  { %v5447_v49 = vpop.f32.mrf.mxu0  ;;  %6030 = vmatpush.bf16.msra.mxu2 %v9111_v17 }
 0x3a0   :  { %v9994_v49 = vld [vmem:[#allocation10 + $0x1e4] sm:$0xf0] }
 0x3a1   :  { %v5460_v45 = vpop.f32.mrf.mxu1  ;;  %v9215_v35 = vor.u32 %v9994_v49, %v9214_v21  ;;  %v9168_v21 = vld [vmem:[#allocation10 + $0x188] sm:$0xf0] }
 0x3a3   :  { %6031 = vmatpush.bf16.msra.mxu2 %v9103_v5  ;;  %6038 = vmatpush.bf16.msra.mxu3 %v9215_v35 }
 0x3a7   :  { %v5471_v37 = vpop.f32.mrf.mxu2  ;;  %6076 = vmatpush.bf16.msrb.mxu2 %v9163_v14  ;;  %6039 = vmatpush.bf16.msra.mxu3 %v9207_v19  ;;  %v9986_v14 = vld [vmem:[#allocation10 + $0x1a4] sm:$0xf0] }
 0x3aa   :  { %6071 = vmatmul.bf16.vlgmr.msrb.gmra.mxu1 %v5605_v58  ;;  %v9198_v58 = vld [vmem:[#allocation10 + $0x1c0] sm:$0xf] }
 0x3ab   :  { %6077 = vmatpush.bf16.msrb.mxu2 %v9155_v39  ;;  %v9984_v39 = vld [vmem:[#allocation10 + $0x194] sm:$0xf0] }
 0x3af   :  { %v5473_v61 = vpop.f32.mrf.mxu2  ;;  %6078 = vmatpush.bf16.msrb.mxu2 %v9147_v57  ;;  %v9167_v57 = vor.u32 %v9982_v54, %v9166_v31 }
 0x3b2   :  { %v5432_v62 = vpop.f32.mrf.mxu3 }
 0x3b3   :  { %6079 = vmatpush.bf16.msrb.mxu2 %v9139_v1  ;;  %v5433_v59 = vadd.f32 %v5432_v62, %v5420_v16  ;;  %v9219_v1 = vor.u32 %v9993_v7, %v9216_v2  ;;  %v9184_v16 = vld [vmem:[#allocation10 + $0x1a8] sm:$0xf0] }
 0x3b5   :  { %v5446_v4 = vadd.f32 %v10557_v18, %v5433_v59  ;;  %v9990_v18 = vld [vmem:[#allocation10 + $0x1c4] sm:$0xf0]  ;;  %v9983_v59 = vld [vmem:[#allocation10 + $0x194] sm:$0xf] }
 0x3b6   :  { %v9199_v60 = vor.u32 %v9990_v18, %v9198_v58 }
 0x3b7   :  { %v5497_v52 = vpop.f32.mrf.mxu0  ;;  %6080 = vmatpush.bf16.msrb.mxu2 %v9131_v38  ;;  %v5459_v28 = vadd.f32 %v10560_v0, %v5446_v4  ;;  %v9988_v0 = vld [vmem:[#allocation10 + $0x1b4] sm:$0xf0]  ;;  %v9989_v38 = vld [vmem:[#allocation10 + $0x1c4] sm:$0xf] }
 0x3b8   :  { %v5498_v55 = vadd.f32 %v5497_v52, %v3891_v48  ;;  %6040 = vmatpush.bf16.msra.mxu3 %v9199_v60  ;;  %v9191_v40 = vor.u32 %v9988_v0, %v9190_v10  ;;  %v9174_v48 = vld [vmem:[#allocation10 + $0x190] sm:$0xf]  ;;  %v9981_v4 = vld [vmem:[#allocation10 + $0x184] sm:$0xf]  ;;  %v5672_v60 = vld [vmem:[#allocation11] sm:$0x3] }
 0x3b9   :  { %v5510_v56 = vpop.f32.mrf.mxu1  ;;  %v5472_v29 = vadd.f32 %v5471_v37, %v5459_v28  ;;  %v9183_v37 = vor.u32 %v9986_v14, %v9182_v33  ;;  %v9175_v52 = vor.u32 %v9984_v39, %v9174_v48  ;;  %v9171_v35 = vor.u32 %v9981_v4, %v9168_v21 }
 0x3ba   :  { %v10564_v32 = vadd.f32 %v5510_v56, %v5498_v55  ;;  %v5434_v53 = vpop.f32.mrf.mxu3  ;;  %v9995_v55 = vld [vmem:[#allocation10 + $0x1f4] sm:$0xf]  ;;  %v9224_v56 = vld [vmem:[#allocation10 + $0x1f8] sm:$0xf0]  ;;  %v5675_v0 = vperm.slane %v5672_v60, 1 }
 0x3bb   :  { %6081 = vmatpush.bf16.msrb.mxu2 %v9123_v51  ;;  %v9227_v61 = vor.u32 %v9995_v55, %v9224_v56  ;;  %v9203_v51 = vor.u32 %v9989_v38, %v9200_v22  ;;  %v9987_v53 = vld [vmem:[#allocation10 + $0x1b4] sm:$0xf] }
 0x3bc   :  { %6041 = vmatpush.bf16.msra.mxu3 %v9191_v40  ;;  %v9195_v24 = vor.u32 %v9987_v53, %v9192_v12  ;;  %v10010_v53 = vld [vmem:[#allocation2] ss:$0 sm:$0xff] }
 0x3bf   :  { %v5499_v3 = vpop.f32.mrf.mxu0  ;;  %6082 = vmatpush.bf16.msrb.mxu2 %v9115_v42  ;;  %v9985_v42 = vld [vmem:[#allocation10 + $0x1a4] sm:$0xf] }
 0x3c0   :  { %6042 = vmatpush.bf16.msra.mxu3 %v9183_v37  ;;  %v9991_v3 = vld [vmem:[#allocation10 + $0x1d4] sm:$0xf]  ;;  %v9187_v34 = vor.u32 %v9985_v42, %v9184_v16 }
 0x3c1   :  { %v5512_v6 = vpop.f32.mrf.mxu1  ;;  %v9211_v41 = vor.u32 %v9991_v3, %v9208_v43 }
 0x3c3   :  { %6083 = vmatpush.bf16.msrb.mxu2 %v9107_v8  ;;  %v9176_v8 = vld [vmem:[#allocation10 + $0x198] sm:$0xf0] }
 0x3c4   :  { %6043 = vmatpush.bf16.msra.mxu3 %v9175_v52  ;;  %v9179_v20 = vor.u32 %v9983_v59, %v9176_v8  ;;  %v6108_v52 = vld [vmem:[#allocation13] sm:$0x3] }
 0x3c5   :  { %v6109_v54 = vunpack.c.l.bf16 %v6108_v52 }
 0x3c7   :  { %v6111_v56 = vperm.slane %v6109_v54, 0 }
 0x3c8   :  { %6044 = vmatpush.bf16.msra.mxu3 %v9167_v57  ;;  %v6112_v57 = vperm.slane %v6109_v54, 2 }
 0x3ca   :  { %v10569_v27 = vpop.f32.mrf.mxu2  ;;  %v6116_v3 = vperm.slane %v6112_v57, 0 }
 0x3cb   :  { %v5524_v23 = vadd.f32 %v10569_v27, %v10564_v32 }
 0x3cc   :  { %6089 = vmatpush.bf16.msrb.mxu3 %v9227_v61 }
 0x3d0   :  { %6090 = vmatpush.bf16.msrb.mxu3 %v9219_v1  ;;  %v6115_v1 = vperm.slane %v6111_v56, 0 }
 0x3d2   :  { %v5525_v63 = vpop.f32.mrf.mxu2 }
 0x3d3   :  { %v5484_v47 = vpop.f32.mrf.mxu3 }
 0x3d4   :  { %v5485_v13 = vadd.f32 %v5484_v47, %v5472_v29  ;;  %6091 = vmatpush.bf16.msrb.mxu3 %v9211_v41 }
 0x3d6   :  { %vm5594_vm10 = vcmp.gt.f32.partialorder %v5485_v13, 0.0  ;;  %v5598_v44 = vmul.f32 0.2, %v5485_v13 }
 0x3d7   :  { %v10571_v45 = vpop.f32.mrf.mxu0 }
 0x3d8   :  { %v5602_v5 = vsel %vm5594_vm10, %v5485_v13, %v5598_v44  ;;  %6092 = vmatpush.bf16.msrb.mxu3 %v9203_v51  ;;  %v5674_v44 = vperm.slane %v5672_v60, 0 }
 0x3d9   :  { %v10574_v15 = vpop.f32.mrf.mxu1  ;;  %v5606_v30 = vpack.c.bf16 %v5602_v5, %v5602_v5 }
 0x3db   :  { %v5486_v46 = vpop.f32.mrf.mxu3  ;;  %6032 = vmatmul.bf16.vlgmr.msra.gmra.mxu2 %v5606_v30 }
 0x3dc   :  { %6093 = vmatpush.bf16.msrb.mxu3 %v9195_v24 }
 0x3df   :  { %v5551_v17 = vpop.f32.mrf.mxu0 }
 0x3e0   :  { %6094 = vmatpush.bf16.msrb.mxu3 %v9187_v34 }
 0x3e1   :  { %v5564_v50 = vpop.f32.mrf.mxu1 }
 0x3e4   :  { %6095 = vmatpush.bf16.msrb.mxu3 %v9179_v20 }
 0x3e8   :  { %6096 = vmatpush.bf16.msrb.mxu3 %v9171_v35 }
 0x3ea   :  { %v5575_v62 = vpop.f32.mrf.mxu2 }
 0x3eb   :  { %6084 = vmatmul.bf16.vlgmr.msrb.gmra.mxu2 %v5606_v30 }
 0x3f2   :  { %v5577_v6 = vpop.f32.mrf.mxu2 }
 0x3f3   :  { %v5536_v11 = vpop.f32.mrf.mxu3 }
 0x3f4   :  { %v5537_v49 = vadd.f32 %v5536_v11, %v5524_v23 }
 0x3f6   :  { %v5550_v28 = vadd.f32 %v10571_v45, %v5537_v49 }
 0x3f8   :  { %v5563_v26 = vadd.f32 %v10574_v15, %v5550_v28 }
 0x3f9   :  { %v6007_v25 = vpop.f32.mrf.mxu0 }
 0x3fa   :  { %v5576_v19 = vadd.f32 %v5575_v62, %v5563_v26  ;;  %v6008_v17 = vadd.f32 %v6007_v25, %v5674_v44 }
 0x3fb   :  { %v5538_v36 = vpop.f32.mrf.mxu3 }
 0x401   :  { %v6009_v9 = vpop.f32.mrf.mxu0 }
 0x413   :  { %v5588_v29 = vpop.f32.mrf.mxu3 }
 0x414   :  { %v5589_v63 = vadd.f32 %v5588_v29, %v5576_v19 }
 0x416   :  { %vm5595_vm11 = vcmp.gt.f32.partialorder %v5589_v63, 0.0  ;;  %v5599_v18 = vmul.f32 0.2, %v5589_v63 }
 0x417   :  { %v6059_v58 = vpop.f32.mrf.mxu0  ;;  %v6020_v10 = vpop.f32.mrf.mxu1 }
 0x418   :  { %v5603_v47 = vsel %vm5595_vm11, %v5589_v63, %v5599_v18  ;;  %v6021_v50 = vadd.f32 %v6020_v10, %v6008_v17  ;;  %v6060_v15 = vadd.f32 %v6059_v58, %v5675_v0 }
 0x419   :  { %v5607_v32 = vpack.c.bf16 %v5603_v47, %v5603_v47 }
 0x41b   :  { %v5590_v27 = vpop.f32.mrf.mxu3  ;;  %6045 = vmatmul.bf16.vlgmr.msra.gmra.mxu3 %v5607_v32 }
 0x41f   :  { %v6061_v13 = vpop.f32.mrf.mxu0  ;;  %v6022_v45 = vpop.f32.mrf.mxu1 }
 0x427   :  { %v6072_v5 = vpop.f32.mrf.mxu1 }
 0x428   :  { %v6073_v40 = vadd.f32 %v6072_v5, %v6060_v15 }
 0x42b   :  { %6097 = vmatmul.bf16.vlgmr.msrb.gmra.mxu3 %v5607_v32 }
 0x42f   :  { %v6074_v33 = vpop.f32.mrf.mxu1 }
 0x45e   :  { %v6033_v14 = vpop.f32.mrf.mxu2 }
 0x45f   :  { %v6034_v30 = vadd.f32 %v6033_v14, %v6021_v50 }
 0x466   :  { %v6035_v37 = vpop.f32.mrf.mxu2 }
 0x46e   :  { %v6085_v46 = vpop.f32.mrf.mxu2 }
 0x46f   :  { %v6086_v61 = vadd.f32 %v6085_v46, %v6073_v40 }
 0x476   :  { %v6087_v48 = vpop.f32.mrf.mxu2 }
 0x49e   :  { %v6046_v39 = vpop.f32.mrf.mxu3 }
 0x49f   :  { %v6047_v55 = vadd.f32 %v6046_v39, %v6034_v30 }
 0x4a1   :  { %v6104_v7 = vmul.f32 0.2, %v6047_v55  ;;  %vm6102_vm12 = vcmp.gt.f32.partialorder %v6047_v55, 0.0 }
 0x4a3   :  { %v6106_v41 = vsel %vm6102_vm12, %v6047_v55, %v6104_v7 }
 0x4a4   :  { %v6117_v38 = vmul.f32 %v6115_v1, %v6106_v41 }
 0x4a6   :  { %v6048_v31 = vpop.f32.mrf.mxu3 }
 0x4ae   :  { %v6098_v2 = vpop.f32.mrf.mxu3 }
 0x4af   :  { %v6099_v62 = vadd.f32 %v6098_v2, %v6086_v61 }
 0x4b1   :  { %vm6103_vm13 = vcmp.gt.f32.partialorder %v6099_v62, 0.0  ;;  %v6105_v43 = vmul.f32 0.2, %v6099_v62 }
 0x4b3   :  { %v6107_v6 = vsel %vm6103_vm13, %v6099_v62, %v6105_v43 }
 0x4b4   :  { %v6118_v22 = vmul.f32 %v6116_v3, %v6107_v6 }
 0x4b6   :  { %v6100_v11 = vpop.f32.mrf.mxu3  ;;  %v6119_v51 = vadd.f32 %v6118_v22, %v6117_v38 }
 0x4b8   :  { %6120 = vadd.xlane.f32.xlu0 %v6119_v51 }
 0x52b   :  { %v6121_v12 = vpop.xlane.xlu0 %6120 }
 0x52c   :  { %v6126_v24 = vadd.f32 %v10010_v53, %v6121_v12 }
 0x52e   :  { %v9228_v42 = vmul.f32 -1.442695, %v6126_v24 }
 0x530   :  { %10011 = vpow2.f32 %v9228_v42 }
 0x536   :  { %v10012_v16 = vpop.eup %10011 }
 0x537   :  { %v6130_v34 = vadd.f32 1.0, %v10012_v16 }
 0x539   :  { %10013 = vrcp.f32 %v6130_v34  ;;  %v6142_v20 = vand.u32 2147483648, %v6130_v34  ;;  %v6140_v25 = vand.u32 2147483647, %v6130_v34  ;;  %vm6136_vm15 = vweird.f32 %v6130_v34 }
 0x53b   :  { %v6143_v21 = vor.u32 1.1754944e-38, %v6142_v20  ;;  %vm6141_vm2 = vcmp.eq.f32.partialorder %v6140_v25, 8.507059e+37 }
 0x53f   :  { %v10014_v36 = vpop.eup %10013 }
 0x540   :  { %v6132_v59 = vmul.f32 %v10014_v36, %v6130_v34  ;;  %vm6137_vm14 = vweird.f32 %v10014_v36 }
 0x541   :  { %vm6138_vm0 = vmor %vm6136_vm15, %vm6137_vm14 }
 0x542   :  { %v6133_v8 = vsub.f32 1.0, %v6132_v59 }
 0x544   :  { %v6134_v23 = vmul.f32 %v10014_v36, %v6133_v8 }
 0x546   :  { %v6135_v4 = vadd.f32 %v10014_v36, %v6134_v23 }
 0x548   :  { %v6139_v49 = vsel %vm6138_vm0, %v10014_v36, %v6135_v4 }
 0x549   :  { %v6144_v35 = vsel %vm6141_vm2, %v6143_v21, %v6139_v49 }
 0x54a   :  { %6147 = vst.msk [vmem:[%s10592_s9] sm:$0xff] %vm6146_vm1, %v6144_v35 }
 0x54b   :  { %6152 = vsyncpa [#allocation4], 1 }
 0x54c   :  { %6153 = vsyncpa [#allocation6], 1 }
 0x54d   :  { %6154 = vsyncpa [#allocation9], 1 }
 0x54e   :  { %6155 = vsyncpa [#allocation12], 1 }

</bundles_post_ra>
